<compile_context>
chip_gen: v6e
topology: v6e:2x2x1
jax: 0.10.0
libtpu: 0.0.40
codegen_flags: <defaults>
</compile_context>

<pallas_src>
import math
import functools

import jax
import jax.numpy as jnp
from jax.experimental import pallas as pl
from jax.experimental.pallas import tpu as pltpu

_LN_EPS = 1e-5

# Canonical order of the weight/static operands passed to the fused kernel.
_PARAM_ORDER = (
    "pe",
    "enc_emb_w", "dec_emb_w",
    # encoder layers (stacked on a leading layer axis)
    "e_wqkv", "e_bqkv", "e_wo", "e_bo", "e_ln1_g", "e_ln1_b",
    "e_w1", "e_b1", "e_w2", "e_b2", "e_ln2_g", "e_ln2_b",
    # decoder layers (stacked on a leading layer axis)
    "d_sa_wqkv", "d_sa_bqkv", "d_sa_wo", "d_sa_bo",
    "d_ca_wq", "d_ca_bq", "d_ca_wkv", "d_ca_bkv", "d_ca_wo", "d_ca_bo",
    "d_ln1_g", "d_ln1_b", "d_ln2_g", "d_ln2_b",
    "d_w1", "d_b1", "d_w2", "d_b2", "d_ln3_g", "d_ln3_b",
    # final norms + output projection
    "enc_norm_g", "enc_norm_b", "dec_norm_g", "dec_norm_b",
    "proj_w", "proj_b",
)


# ----------------------------- kernel helpers --------------------------------

def _layernorm(z, g, b, eps):
    mu = jnp.mean(z, axis=-1, keepdims=True)
    zc = z - mu
    var = jnp.mean(zc * zc, axis=-1, keepdims=True)    # biased var (torch LN)
    return zc * jax.lax.rsqrt(var + eps) * g + b


def _mha(q, k, v, wo, bo, *, n_heads, causal):
    """Multi-head attention + output projection on VMEM-resident values.

    Per-head scores/softmax (static unrolled loop over heads); all head
    contexts are concatenated into one (L, D) tensor so the output projection
    is a single (L, D) @ (D, D) MXU dot."""
    L, D = q.shape
    S = k.shape[0]
    E = D // n_heads
    scale = 1.0 / math.sqrt(E)

    if causal:
        row = jax.lax.broadcasted_iota(jnp.int32, (L, S), 0)
        col = jax.lax.broadcasted_iota(jnp.int32, (L, S), 1)
        neg = jnp.where(col > row, jnp.float32(-1e30), jnp.float32(0.0))

    ctx = []
    for h in range(n_heads):                            # static unrolled loop
        qh = q[:, h * E:(h + 1) * E]
        kh = k[:, h * E:(h + 1) * E]
        vh = v[:, h * E:(h + 1) * E]
        s = jnp.dot(qh, kh.T, preferred_element_type=jnp.float32) * scale
        if causal:
            s = s + neg
        m = jnp.max(s, axis=-1, keepdims=True)
        p = jnp.exp(s - m)
        inv = pl.reciprocal(jnp.sum(p, axis=-1, keepdims=True), approx=True)
        ctx.append(jnp.dot(p, vh, preferred_element_type=jnp.float32) * inv)
    ctx = jnp.concatenate(ctx, axis=-1)                 # (L, D)
    return jnp.dot(ctx, wo, preferred_element_type=jnp.float32) + bo


# ------------------------------- fused kernel ---------------------------------

def _fused_forward_kernel(*refs, n_heads, e_layers, d_layers, pred_len, eps):
    """Whole forward for one batch element: embeddings, encoder stack, final
    encoder norm, decoder stack (causal self-attn + cross-attn), final decoder
    norm and output projection.  Grid = (B,)."""
    xc_enc_ref, xc_dec_ref = refs[0], refs[1]
    o_ref = refs[-1]
    wd = dict(zip(_PARAM_ORDER, refs[2:-1]))

    xc_enc = xc_enc_ref[0]                              # (L,  3C+1)
    xc_dec = xc_dec_ref[0]                              # (Ld, 3C+1)
    L = xc_enc.shape[0]
    Ld = xc_dec.shape[0]
    pe = wd["pe"][...]                                  # (max_len, D)

    # ---- DataEmbedding: token-conv taps + time feature (pre-packed) + PE ----
    enc = jnp.dot(xc_enc, wd["enc_emb_w"][...],
                  preferred_element_type=jnp.float32) + pe[:L]
    dec = jnp.dot(xc_dec, wd["dec_emb_w"][...],
                  preferred_element_type=jnp.float32) + pe[:Ld]
    D = enc.shape[-1]

    # ---------------------------- encoder stack ------------------------------
    for l in range(e_layers):
        qkv = jnp.dot(enc, wd["e_wqkv"][l],
                      preferred_element_type=jnp.float32) + wd["e_bqkv"][l]
        attn = _mha(qkv[:, :D], qkv[:, D:2 * D], qkv[:, 2 * D:],
                    wd["e_wo"][l], wd["e_bo"][l], n_heads=n_heads, causal=False)
        enc = _layernorm(enc + attn, wd["e_ln1_g"][l], wd["e_ln1_b"][l], eps)
        h = jnp.maximum(
            jnp.dot(enc, wd["e_w1"][l], preferred_element_type=jnp.float32)
            + wd["e_b1"][l], 0.0)
        ffn = jnp.dot(h, wd["e_w2"][l],
                      preferred_element_type=jnp.float32) + wd["e_b2"][l]
        enc = _layernorm(enc + ffn, wd["e_ln2_g"][l], wd["e_ln2_b"][l], eps)
    enc = _layernorm(enc, wd["enc_norm_g"][...], wd["enc_norm_b"][...], eps)

    # ---------------------------- decoder stack ------------------------------
    for l in range(d_layers):
        # causal self-attention (fused QKV)
        qkv = jnp.dot(dec, wd["d_sa_wqkv"][l],
                      preferred_element_type=jnp.float32) + wd["d_sa_bqkv"][l]
        attn = _mha(qkv[:, :D], qkv[:, D:2 * D], qkv[:, 2 * D:],
                    wd["d_sa_wo"][l], wd["d_sa_bo"][l],
                    n_heads=n_heads, causal=True)
        dec = _layernorm(dec + attn, wd["d_ln1_g"][l], wd["d_ln1_b"][l], eps)

        # cross-attention (Q from decoder, fused KV from encoder output)
        q = jnp.dot(dec, wd["d_ca_wq"][l],
                    preferred_element_type=jnp.float32) + wd["d_ca_bq"][l]
        kv = jnp.dot(enc, wd["d_ca_wkv"][l],
                     preferred_element_type=jnp.float32) + wd["d_ca_bkv"][l]
        attn = _mha(q, kv[:, :D], kv[:, D:],
                    wd["d_ca_wo"][l], wd["d_ca_bo"][l],
                    n_heads=n_heads, causal=False)
        dec = _layernorm(dec + attn, wd["d_ln2_g"][l], wd["d_ln2_b"][l], eps)

        # FFN (conv k=1 -> relu -> conv k=1)
        h = jnp.maximum(
            jnp.dot(dec, wd["d_w1"][l], preferred_element_type=jnp.float32)
            + wd["d_b1"][l], 0.0)
        ffn = jnp.dot(h, wd["d_w2"][l],
                      preferred_element_type=jnp.float32) + wd["d_b2"][l]
        dec = _layernorm(dec + ffn, wd["d_ln3_g"][l], wd["d_ln3_b"][l], eps)
    dec = _layernorm(dec, wd["dec_norm_g"][...], wd["dec_norm_b"][...], eps)

    out = jnp.dot(dec, wd["proj_w"][...],
                  preferred_element_type=jnp.float32) + wd["proj_b"][...]
    # only the last pred_len steps are returned (static slice)
    o_ref[0] = out[Ld - pred_len:, :].astype(o_ref.dtype)


# ----------------------------- pallas_call wrapper ----------------------------

def _const_spec(a):
    zero = (0,) * a.ndim
    return pl.BlockSpec(a.shape, lambda b: zero)


def _batch_spec(a):
    nd = a.ndim
    return pl.BlockSpec((1,) + tuple(a.shape[1:]),
                        lambda b: (b,) + (0,) * (nd - 1))


def transformer_fused_forward(params, cfg, xc_enc, xc_dec):
    B = xc_enc.shape[0]
    pred_len, c_out = cfg["pred_len"], cfg["c_out"]
    flat = [params[k] for k in _PARAM_ORDER]

    kern = functools.partial(
        _fused_forward_kernel,
        n_heads=cfg["n_heads"], e_layers=cfg["e_layers"],
        d_layers=cfg["d_layers"], pred_len=pred_len, eps=_LN_EPS)

    return pl.pallas_call(
        kern,
        out_shape=jax.ShapeDtypeStruct((B, pred_len, c_out), jnp.float32),
        grid=(B,),
        in_specs=[_batch_spec(xc_enc), _batch_spec(xc_dec)]
                 + [_const_spec(a) for a in flat],
        out_specs=pl.BlockSpec((1, pred_len, c_out), lambda b: (b, 0, 0)),
        compiler_params=pltpu.CompilerParams(
            dimension_semantics=("parallel",)),     # B>=2 keeps both v7x TCs busy
    )(xc_enc, xc_dec, *flat)


# ------------------------------ model pieces ---------------------------------

def positional_embedding(max_len, d_model):
    position = jnp.arange(max_len, dtype=jnp.float32)[:, None]
    div_term = jnp.exp(jnp.arange(0, d_model, 2, dtype=jnp.float32)
                       * -(math.log(10000.0) / d_model))
    pe = jnp.zeros((max_len, d_model), jnp.float32)
    pe = pe.at[:, 0::2].set(jnp.sin(position * div_term))
    pe = pe.at[:, 1::2].set(jnp.cos(position * div_term))
    return pe


def _w(key, shape, scale=0.02):
    return scale * jax.random.normal(key, shape, dtype=jnp.float32)


def init_params(key, cfg):
    D, F = cfg["d_model"], cfg["d_ff"]
    El, Dl = cfg["e_layers"], cfg["d_layers"]
    C, Cd, c_out = cfg["enc_in"], cfg["dec_in"], cfg["c_out"]
    max_len = max(cfg["seq_len"], cfg["label_len"] + cfg["pred_len"])

    ks = iter(jax.random.split(key, 16))
    ones = lambda s: jnp.ones(s, jnp.float32)
    zeros = lambda s: jnp.zeros(s, jnp.float32)

    return dict(
        pe=positional_embedding(max_len, D),
        # embedding weight = [conv taps prev|cur|next (3*c_in rows) | time row]
        enc_emb_w=_w(next(ks), (3 * C + 1, D)),
        dec_emb_w=_w(next(ks), (3 * Cd + 1, D)),
        # encoder layers (stacked)
        e_wqkv=_w(next(ks), (El, D, 3 * D)), e_bqkv=zeros((El, 1, 3 * D)),
        e_wo=_w(next(ks), (El, D, D)), e_bo=zeros((El, 1, D)),
        e_ln1_g=ones((El, 1, D)), e_ln1_b=zeros((El, 1, D)),
        e_w1=_w(next(ks), (El, D, F)), e_b1=zeros((El, 1, F)),
        e_w2=_w(next(ks), (El, F, D)), e_b2=zeros((El, 1, D)),
        e_ln2_g=ones((El, 1, D)), e_ln2_b=zeros((El, 1, D)),
        # decoder layers (stacked)
        d_sa_wqkv=_w(next(ks), (Dl, D, 3 * D)), d_sa_bqkv=zeros((Dl, 1, 3 * D)),
        d_sa_wo=_w(next(ks), (Dl, D, D)), d_sa_bo=zeros((Dl, 1, D)),
        d_ca_wq=_w(next(ks), (Dl, D, D)), d_ca_bq=zeros((Dl, 1, D)),
        d_ca_wkv=_w(next(ks), (Dl, D, 2 * D)), d_ca_bkv=zeros((Dl, 1, 2 * D)),
        d_ca_wo=_w(next(ks), (Dl, D, D)), d_ca_bo=zeros((Dl, 1, D)),
        d_ln1_g=ones((Dl, 1, D)), d_ln1_b=zeros((Dl, 1, D)),
        d_ln2_g=ones((Dl, 1, D)), d_ln2_b=zeros((Dl, 1, D)),
        d_w1=_w(next(ks), (Dl, D, F)), d_b1=zeros((Dl, 1, F)),
        d_w2=_w(next(ks), (Dl, F, D)), d_b2=zeros((Dl, 1, D)),
        d_ln3_g=ones((Dl, 1, D)), d_ln3_b=zeros((Dl, 1, D)),
        # final norms + projection
        enc_norm_g=ones((1, D)), enc_norm_b=zeros((1, D)),
        dec_norm_g=ones((1, D)), dec_norm_b=zeros((1, D)),
        proj_w=_w(next(ks), (D, c_out)), proj_b=zeros((1, c_out)),
    )


# ------------------------------ forward pass ----------------------------------

def transformer_forward(params, cfg, x, x_mark=None, y=None, y_mark=None, y_mask=None):
    B, L, C = x.shape
    pred_len, label_len = cfg["pred_len"], cfg["label_len"]

    if x_mark is None:
        x_mark = jnp.broadcast_to((jnp.arange(L, dtype=x.dtype) / L)[None, :, None],
                                  (B, L, 1))
    if y is None:
        y = jnp.ones((B, pred_len, C), x.dtype)
    if y_mark is None:
        y_mark = jnp.broadcast_to(
            (jnp.arange(y.shape[1], dtype=y.dtype) / y.shape[1])[None, :, None],
            (B, y.shape[1], 1))
    if y_mask is None:
        y_mask = jnp.ones_like(y)

    x_mark = jnp.where(x_mark == 1.0, 0.9999, x_mark)
    y_mark = jnp.where(y_mark == 1.0, 0.9999, y_mark)

    x_dec = jnp.concatenate([x[:, -label_len:, :], jnp.zeros_like(y)], axis=1)
    x_mark_dec = jnp.concatenate([x_mark[:, -label_len:, :], y_mark], axis=1)

    # Circular-conv taps [x_{t-1}|x_t|x_{t+1}] + time feature, packed once in
    # the XLA wrapper (tiny arrays; a handful of fused XLA ops).
    # TODO(synk): could be built in-kernel with pltpu.roll to avoid the small
    # (B, L, 3C+1) HBM materialization entirely.
    def taps(v, vm):
        return jnp.concatenate(
            [jnp.roll(v, 1, axis=1), v, jnp.roll(v, -1, axis=1), vm], axis=-1)

    dec_out = transformer_fused_forward(params, cfg,
                                        taps(x, x_mark), taps(x_dec, x_mark_dec))

    f_dim = -1 if cfg["features"] == "MS" else 0
    return {"pred": dec_out[:, :, f_dim:],      # kernel already kept last pred_len steps
            "true": y[:, :, f_dim:],
            "mask": y_mask[:, :, f_dim:]}


# ---------------------------------- main ---------------------------------------

if __name__ == "__main__":
    cfg = dict(task_name="long_term_forecast", features="M",
               seq_len=8, label_len=4, pred_len=8,
               enc_in=4, dec_in=4, c_out=4,
               d_model=32, n_heads=4, d_ff=64,
               e_layers=2, d_layers=1)

    key = jax.random.PRNGKey(0)
    k_param, k_x = jax.random.split(key)
    params = init_params(k_param, cfg)

    x = jax.random.normal(k_x, (2, cfg["seq_len"], cfg["enc_in"]), dtype=jnp.float32)

    @jax.jit
    def run(params, x):
        return transformer_forward(params, cfg, x)

    out = run(params, x)
    jax.block_until_ready(out["pred"])

    assert out["pred"].shape == (2, cfg["pred_len"], cfg["c_out"])
    assert bool(jnp.all(jnp.isfinite(out["pred"])))
    print("KERNEL_OK")
</pallas_src>

<mosaic_0001>
module attributes {stable_mosaic.version = 11 : i64} {
  func.func @_fused_forward_kernel(%arg0: i32, %arg1: memref<1x8x13xf32, #tpu.memory_space<vmem>>, %arg2: memref<1x12x13xf32, #tpu.memory_space<vmem>>, %arg3: memref<12x32xf32, #tpu.memory_space<vmem>>, %arg4: memref<13x32xf32, #tpu.memory_space<vmem>>, %arg5: memref<13x32xf32, #tpu.memory_space<vmem>>, %arg6: memref<2x32x96xf32, #tpu.memory_space<vmem>>, %arg7: memref<2x1x96xf32, #tpu.memory_space<vmem>>, %arg8: memref<2x32x32xf32, #tpu.memory_space<vmem>>, %arg9: memref<2x1x32xf32, #tpu.memory_space<vmem>>, %arg10: memref<2x1x32xf32, #tpu.memory_space<vmem>>, %arg11: memref<2x1x32xf32, #tpu.memory_space<vmem>>, %arg12: memref<2x32x64xf32, #tpu.memory_space<vmem>>, %arg13: memref<2x1x64xf32, #tpu.memory_space<vmem>>, %arg14: memref<2x64x32xf32, #tpu.memory_space<vmem>>, %arg15: memref<2x1x32xf32, #tpu.memory_space<vmem>>, %arg16: memref<2x1x32xf32, #tpu.memory_space<vmem>>, %arg17: memref<2x1x32xf32, #tpu.memory_space<vmem>>, %arg18: memref<1x32x96xf32, #tpu.memory_space<vmem>>, %arg19: memref<1x1x96xf32, #tpu.memory_space<vmem>>, %arg20: memref<1x32x32xf32, #tpu.memory_space<vmem>>, %arg21: memref<1x1x32xf32, #tpu.memory_space<vmem>>, %arg22: memref<1x32x32xf32, #tpu.memory_space<vmem>>, %arg23: memref<1x1x32xf32, #tpu.memory_space<vmem>>, %arg24: memref<1x32x64xf32, #tpu.memory_space<vmem>>, %arg25: memref<1x1x64xf32, #tpu.memory_space<vmem>>, %arg26: memref<1x32x32xf32, #tpu.memory_space<vmem>>, %arg27: memref<1x1x32xf32, #tpu.memory_space<vmem>>, %arg28: memref<1x1x32xf32, #tpu.memory_space<vmem>>, %arg29: memref<1x1x32xf32, #tpu.memory_space<vmem>>, %arg30: memref<1x1x32xf32, #tpu.memory_space<vmem>>, %arg31: memref<1x1x32xf32, #tpu.memory_space<vmem>>, %arg32: memref<1x32x64xf32, #tpu.memory_space<vmem>>, %arg33: memref<1x1x64xf32, #tpu.memory_space<vmem>>, %arg34: memref<1x64x32xf32, #tpu.memory_space<vmem>>, %arg35: memref<1x1x32xf32, #tpu.memory_space<vmem>>, %arg36: memref<1x1x32xf32, #tpu.memory_space<vmem>>, %arg37: memref<1x1x32xf32, #tpu.memory_space<vmem>>, %arg38: memref<1x32xf32, #tpu.memory_space<vmem>>, %arg39: memref<1x32xf32, #tpu.memory_space<vmem>>, %arg40: memref<1x32xf32, #tpu.memory_space<vmem>>, %arg41: memref<1x32xf32, #tpu.memory_space<vmem>>, %arg42: memref<32x4xf32, #tpu.memory_space<vmem>>, %arg43: memref<1x4xf32, #tpu.memory_space<vmem>>, %arg44: memref<1x8x4xf32, #tpu.memory_space<vmem>>) attributes {dimension_semantics = [#tpu.dimension_semantics<parallel>], iteration_bounds = array<i64: 2>, scalar_prefetch = 0 : i64, scratch_operands = 0 : i64, tpu.core_type = #tpu.core_type<tc>, window_params = [{transform_indices = @transform_0, window_bounds = array<i64: 1, 8, 13>}, {transform_indices = @transform_1, window_bounds = array<i64: 1, 12, 13>}, {pipeline_mode = #tpu.pipeline_mode<synchronous>, transform_indices = @transform_2, window_bounds = array<i64: 12, 32>}, {pipeline_mode = #tpu.pipeline_mode<synchronous>, transform_indices = @transform_3, window_bounds = array<i64: 13, 32>}, {pipeline_mode = #tpu.pipeline_mode<synchronous>, transform_indices = @transform_4, window_bounds = array<i64: 13, 32>}, {pipeline_mode = #tpu.pipeline_mode<synchronous>, transform_indices = @transform_5, window_bounds = array<i64: 2, 32, 96>}, {pipeline_mode = #tpu.pipeline_mode<synchronous>, transform_indices = @transform_6, window_bounds = array<i64: 2, 1, 96>}, {pipeline_mode = #tpu.pipeline_mode<synchronous>, transform_indices = @transform_7, window_bounds = array<i64: 2, 32, 32>}, {pipeline_mode = #tpu.pipeline_mode<synchronous>, transform_indices = @transform_8, window_bounds = array<i64: 2, 1, 32>}, {pipeline_mode = #tpu.pipeline_mode<synchronous>, transform_indices = @transform_9, window_bounds = array<i64: 2, 1, 32>}, {pipeline_mode = #tpu.pipeline_mode<synchronous>, transform_indices = @transform_10, window_bounds = array<i64: 2, 1, 32>}, {pipeline_mode = #tpu.pipeline_mode<synchronous>, transform_indices = @transform_11, window_bounds = array<i64: 2, 32, 64>}, {pipeline_mode = #tpu.pipeline_mode<synchronous>, transform_indices = @transform_12, window_bounds = array<i64: 2, 1, 64>}, {pipeline_mode = #tpu.pipeline_mode<synchronous>, transform_indices = @transform_13, window_bounds = array<i64: 2, 64, 32>}, {pipeline_mode = #tpu.pipeline_mode<synchronous>, transform_indices = @transform_14, window_bounds = array<i64: 2, 1, 32>}, {pipeline_mode = #tpu.pipeline_mode<synchronous>, transform_indices = @transform_15, window_bounds = array<i64: 2, 1, 32>}, {pipeline_mode = #tpu.pipeline_mode<synchronous>, transform_indices = @transform_16, window_bounds = array<i64: 2, 1, 32>}, {pipeline_mode = #tpu.pipeline_mode<synchronous>, transform_indices = @transform_17, window_bounds = array<i64: 1, 32, 96>}, {pipeline_mode = #tpu.pipeline_mode<synchronous>, transform_indices = @transform_18, window_bounds = array<i64: 1, 1, 96>}, {pipeline_mode = #tpu.pipeline_mode<synchronous>, transform_indices = @transform_19, window_bounds = array<i64: 1, 32, 32>}, {pipeline_mode = #tpu.pipeline_mode<synchronous>, transform_indices = @transform_20, window_bounds = array<i64: 1, 1, 32>}, {pipeline_mode = #tpu.pipeline_mode<synchronous>, transform_indices = @transform_21, window_bounds = array<i64: 1, 32, 32>}, {pipeline_mode = #tpu.pipeline_mode<synchronous>, transform_indices = @transform_22, window_bounds = array<i64: 1, 1, 32>}, {pipeline_mode = #tpu.pipeline_mode<synchronous>, transform_indices = @transform_23, window_bounds = array<i64: 1, 32, 64>}, {pipeline_mode = #tpu.pipeline_mode<synchronous>, transform_indices = @transform_24, window_bounds = array<i64: 1, 1, 64>}, {pipeline_mode = #tpu.pipeline_mode<synchronous>, transform_indices = @transform_25, window_bounds = array<i64: 1, 32, 32>}, {pipeline_mode = #tpu.pipeline_mode<synchronous>, transform_indices = @transform_26, window_bounds = array<i64: 1, 1, 32>}, {pipeline_mode = #tpu.pipeline_mode<synchronous>, transform_indices = @transform_27, window_bounds = array<i64: 1, 1, 32>}, {pipeline_mode = #tpu.pipeline_mode<synchronous>, transform_indices = @transform_28, window_bounds = array<i64: 1, 1, 32>}, {pipeline_mode = #tpu.pipeline_mode<synchronous>, transform_indices = @transform_29, window_bounds = array<i64: 1, 1, 32>}, {pipeline_mode = #tpu.pipeline_mode<synchronous>, transform_indices = @transform_30, window_bounds = array<i64: 1, 1, 32>}, {pipeline_mode = #tpu.pipeline_mode<synchronous>, transform_indices = @transform_31, window_bounds = array<i64: 1, 32, 64>}, {pipeline_mode = #tpu.pipeline_mode<synchronous>, transform_indices = @transform_32, window_bounds = array<i64: 1, 1, 64>}, {pipeline_mode = #tpu.pipeline_mode<synchronous>, transform_indices = @transform_33, window_bounds = array<i64: 1, 64, 32>}, {pipeline_mode = #tpu.pipeline_mode<synchronous>, transform_indices = @transform_34, window_bounds = array<i64: 1, 1, 32>}, {pipeline_mode = #tpu.pipeline_mode<synchronous>, transform_indices = @transform_35, window_bounds = array<i64: 1, 1, 32>}, {pipeline_mode = #tpu.pipeline_mode<synchronous>, transform_indices = @transform_36, window_bounds = array<i64: 1, 1, 32>}, {pipeline_mode = #tpu.pipeline_mode<synchronous>, transform_indices = @transform_37, window_bounds = array<i64: 1, 32>}, {pipeline_mode = #tpu.pipeline_mode<synchronous>, transform_indices = @transform_38, window_bounds = array<i64: 1, 32>}, {pipeline_mode = #tpu.pipeline_mode<synchronous>, transform_indices = @transform_39, window_bounds = array<i64: 1, 32>}, {pipeline_mode = #tpu.pipeline_mode<synchronous>, transform_indices = @transform_40, window_bounds = array<i64: 1, 32>}, {pipeline_mode = #tpu.pipeline_mode<synchronous>, transform_indices = @transform_41, window_bounds = array<i64: 32, 4>}, {pipeline_mode = #tpu.pipeline_mode<synchronous>, transform_indices = @transform_42, window_bounds = array<i64: 1, 4>}, {transform_indices = @transform_43, window_bounds = array<i64: 1, 8, 4>}]} {
    %c0 = arith.constant 0 : index
    %c0_0 = arith.constant 0 : index
    %c0_1 = arith.constant 0 : index
    %0 = vector.load %arg1[%c0, %c0_0, %c0_1] : memref<1x8x13xf32, #tpu.memory_space<vmem>>, vector<1x8x13xf32>
    %1 = vector.shape_cast %0 : vector<1x8x13xf32> to vector<8x13xf32>
    %c0_2 = arith.constant 0 : index
    %c0_3 = arith.constant 0 : index
    %c0_4 = arith.constant 0 : index
    %2 = vector.load %arg2[%c0_2, %c0_3, %c0_4] : memref<1x12x13xf32, #tpu.memory_space<vmem>>, vector<1x12x13xf32>
    %3 = vector.shape_cast %2 : vector<1x12x13xf32> to vector<12x13xf32>
    %c0_5 = arith.constant 0 : index
    %c0_6 = arith.constant 0 : index
    %4 = vector.load %arg3[%c0_5, %c0_6] : memref<12x32xf32, #tpu.memory_space<vmem>>, vector<12x32xf32>
    %c0_7 = arith.constant 0 : index
    %c0_8 = arith.constant 0 : index
    %5 = vector.load %arg4[%c0_7, %c0_8] : memref<13x32xf32, #tpu.memory_space<vmem>>, vector<13x32xf32>
    %cst = arith.constant dense<0.000000e+00> : vector<8x32xf32>
    %6 = tpu.matmul %1, %5, %cst {dimension_numbers = #tpu.dot_dimension_numbers<[1], [0], [0], [1], [0, 0, 1, 1], [], []>} : vector<8x13xf32>, vector<13x32xf32>, vector<8x32xf32> -> vector<8x32xf32>
    %7 = vector.extract_strided_slice %4 {offsets = [0, 0], sizes = [8, 32], strides = [1, 1]} : vector<12x32xf32> to vector<8x32xf32>
    %8 = arith.addf %6, %7 : vector<8x32xf32>
    %c0_9 = arith.constant 0 : index
    %c0_10 = arith.constant 0 : index
    %9 = vector.load %arg5[%c0_9, %c0_10] : memref<13x32xf32, #tpu.memory_space<vmem>>, vector<13x32xf32>
    %cst_11 = arith.constant dense<0.000000e+00> : vector<12x32xf32>
    %10 = tpu.matmul %3, %9, %cst_11 {dimension_numbers = #tpu.dot_dimension_numbers<[1], [0], [0], [1], [0, 0, 1, 1], [], []>} : vector<12x13xf32>, vector<13x32xf32>, vector<12x32xf32> -> vector<12x32xf32>
    %11 = arith.addf %10, %4 : vector<12x32xf32>
    %c0_12 = arith.constant 0 : index
    %c0_13 = arith.constant 0 : index
    %c0_14 = arith.constant 0 : index
    %12 = vector.load %arg6[%c0_12, %c0_13, %c0_14] : memref<2x32x96xf32, #tpu.memory_space<vmem>>, vector<1x32x96xf32>
    %13 = vector.shape_cast %12 : vector<1x32x96xf32> to vector<32x96xf32>
    %cst_15 = arith.constant dense<0.000000e+00> : vector<8x96xf32>
    %14 = tpu.matmul %8, %13, %cst_15 {dimension_numbers = #tpu.dot_dimension_numbers<[1], [0], [0], [1], [0, 0, 1, 1], [], []>} : vector<8x32xf32>, vector<32x96xf32>, vector<8x96xf32> -> vector<8x96xf32>
    %c0_16 = arith.constant 0 : index
    %c0_17 = arith.constant 0 : index
    %c0_18 = arith.constant 0 : index
    %15 = vector.load %arg7[%c0_16, %c0_17, %c0_18] : memref<2x1x96xf32, #tpu.memory_space<vmem>>, vector<1x1x96xf32>
    %16 = vector.shape_cast %15 : vector<1x1x96xf32> to vector<1x96xf32>
    %17 = vector.broadcast %16 : vector<1x96xf32> to vector<8x96xf32>
    %18 = arith.addf %14, %17 : vector<8x96xf32>
    %19 = vector.extract_strided_slice %18 {offsets = [0, 0], sizes = [8, 32], strides = [1, 1]} : vector<8x96xf32> to vector<8x32xf32>
    %20 = vector.extract_strided_slice %18 {offsets = [0, 32], sizes = [8, 32], strides = [1, 1]} : vector<8x96xf32> to vector<8x32xf32>
    %21 = vector.extract_strided_slice %18 {offsets = [0, 64], sizes = [8, 32], strides = [1, 1]} : vector<8x96xf32> to vector<8x32xf32>
    %c0_19 = arith.constant 0 : index
    %c0_20 = arith.constant 0 : index
    %c0_21 = arith.constant 0 : index
    %22 = vector.load %arg8[%c0_19, %c0_20, %c0_21] : memref<2x32x32xf32, #tpu.memory_space<vmem>>, vector<1x32x32xf32>
    %23 = vector.shape_cast %22 : vector<1x32x32xf32> to vector<32x32xf32>
    %c0_22 = arith.constant 0 : index
    %c0_23 = arith.constant 0 : index
    %c0_24 = arith.constant 0 : index
    %24 = vector.load %arg9[%c0_22, %c0_23, %c0_24] : memref<2x1x32xf32, #tpu.memory_space<vmem>>, vector<1x1x32xf32>
    %25 = vector.shape_cast %24 : vector<1x1x32xf32> to vector<1x32xf32>
    %26 = vector.extract_strided_slice %19 {offsets = [0, 0], sizes = [8, 8], strides = [1, 1]} : vector<8x32xf32> to vector<8x8xf32>
    %27 = vector.extract_strided_slice %20 {offsets = [0, 0], sizes = [8, 8], strides = [1, 1]} : vector<8x32xf32> to vector<8x8xf32>
    %28 = vector.extract_strided_slice %21 {offsets = [0, 0], sizes = [8, 8], strides = [1, 1]} : vector<8x32xf32> to vector<8x8xf32>
    %29 = tpu.transpose %27, [1, 0] : vector<8x8xf32> -> vector<8x8xf32>
    %cst_25 = arith.constant dense<0.000000e+00> : vector<8x8xf32>
    %30 = tpu.matmul %26, %29, %cst_25 {dimension_numbers = #tpu.dot_dimension_numbers<[1], [0], [0], [1], [0, 0, 1, 1], [], []>} : vector<8x8xf32>, vector<8x8xf32>, vector<8x8xf32> -> vector<8x8xf32>
    %cst_26 = arith.constant 0.353553385 : f32
    %31 = vector.broadcast %cst_26 : f32 to vector<8x8xf32>
    %32 = arith.mulf %30, %31 : vector<8x8xf32>
    %cst_27 = arith.constant dense<0xFF800000> : vector<8xf32>
    %33 = vector.multi_reduction <maximumf>, %32, %cst_27 [1] : vector<8x8xf32> to vector<8xf32>
    %34 = vector.shape_cast %33 : vector<8xf32> to vector<8x1xf32>
    %35 = vector.broadcast %34 : vector<8x1xf32> to vector<8x8xf32>
    %36 = arith.subf %32, %35 : vector<8x8xf32>
    %37 = math.exp %36 : vector<8x8xf32>
    %cst_28 = arith.constant dense<0.000000e+00> : vector<8xf32>
    %38 = vector.multi_reduction <add>, %37, %cst_28 [1] : vector<8x8xf32> to vector<8xf32>
    %39 = vector.shape_cast %38 : vector<8xf32> to vector<8x1xf32>
    %40 = tpu.reciprocal %39 {approx = true} : vector<8x1xf32> -> vector<8x1xf32>
    %cst_29 = arith.constant dense<0.000000e+00> : vector<8x8xf32>
    %41 = tpu.matmul %37, %28, %cst_29 {dimension_numbers = #tpu.dot_dimension_numbers<[1], [0], [0], [1], [0, 0, 1, 1], [], []>} : vector<8x8xf32>, vector<8x8xf32>, vector<8x8xf32> -> vector<8x8xf32>
    %42 = vector.broadcast %40 : vector<8x1xf32> to vector<8x8xf32>
    %43 = arith.mulf %41, %42 : vector<8x8xf32>
    %44 = vector.extract_strided_slice %19 {offsets = [0, 8], sizes = [8, 8], strides = [1, 1]} : vector<8x32xf32> to vector<8x8xf32>
    %45 = vector.extract_strided_slice %20 {offsets = [0, 8], sizes = [8, 8], strides = [1, 1]} : vector<8x32xf32> to vector<8x8xf32>
    %46 = vector.extract_strided_slice %21 {offsets = [0, 8], sizes = [8, 8], strides = [1, 1]} : vector<8x32xf32> to vector<8x8xf32>
    %47 = tpu.transpose %45, [1, 0] : vector<8x8xf32> -> vector<8x8xf32>
    %cst_30 = arith.constant dense<0.000000e+00> : vector<8x8xf32>
    %48 = tpu.matmul %44, %47, %cst_30 {dimension_numbers = #tpu.dot_dimension_numbers<[1], [0], [0], [1], [0, 0, 1, 1], [], []>} : vector<8x8xf32>, vector<8x8xf32>, vector<8x8xf32> -> vector<8x8xf32>
    %cst_31 = arith.constant 0.353553385 : f32
    %49 = vector.broadcast %cst_31 : f32 to vector<8x8xf32>
    %50 = arith.mulf %48, %49 : vector<8x8xf32>
    %cst_32 = arith.constant dense<0xFF800000> : vector<8xf32>
    %51 = vector.multi_reduction <maximumf>, %50, %cst_32 [1] : vector<8x8xf32> to vector<8xf32>
    %52 = vector.shape_cast %51 : vector<8xf32> to vector<8x1xf32>
    %53 = vector.broadcast %52 : vector<8x1xf32> to vector<8x8xf32>
    %54 = arith.subf %50, %53 : vector<8x8xf32>
    %55 = math.exp %54 : vector<8x8xf32>
    %cst_33 = arith.constant dense<0.000000e+00> : vector<8xf32>
    %56 = vector.multi_reduction <add>, %55, %cst_33 [1] : vector<8x8xf32> to vector<8xf32>
    %57 = vector.shape_cast %56 : vector<8xf32> to vector<8x1xf32>
    %58 = tpu.reciprocal %57 {approx = true} : vector<8x1xf32> -> vector<8x1xf32>
    %cst_34 = arith.constant dense<0.000000e+00> : vector<8x8xf32>
    %59 = tpu.matmul %55, %46, %cst_34 {dimension_numbers = #tpu.dot_dimension_numbers<[1], [0], [0], [1], [0, 0, 1, 1], [], []>} : vector<8x8xf32>, vector<8x8xf32>, vector<8x8xf32> -> vector<8x8xf32>
    %60 = vector.broadcast %58 : vector<8x1xf32> to vector<8x8xf32>
    %61 = arith.mulf %59, %60 : vector<8x8xf32>
    %62 = vector.extract_strided_slice %19 {offsets = [0, 16], sizes = [8, 8], strides = [1, 1]} : vector<8x32xf32> to vector<8x8xf32>
    %63 = vector.extract_strided_slice %20 {offsets = [0, 16], sizes = [8, 8], strides = [1, 1]} : vector<8x32xf32> to vector<8x8xf32>
    %64 = vector.extract_strided_slice %21 {offsets = [0, 16], sizes = [8, 8], strides = [1, 1]} : vector<8x32xf32> to vector<8x8xf32>
    %65 = tpu.transpose %63, [1, 0] : vector<8x8xf32> -> vector<8x8xf32>
    %cst_35 = arith.constant dense<0.000000e+00> : vector<8x8xf32>
    %66 = tpu.matmul %62, %65, %cst_35 {dimension_numbers = #tpu.dot_dimension_numbers<[1], [0], [0], [1], [0, 0, 1, 1], [], []>} : vector<8x8xf32>, vector<8x8xf32>, vector<8x8xf32> -> vector<8x8xf32>
    %cst_36 = arith.constant 0.353553385 : f32
    %67 = vector.broadcast %cst_36 : f32 to vector<8x8xf32>
    %68 = arith.mulf %66, %67 : vector<8x8xf32>
    %cst_37 = arith.constant dense<0xFF800000> : vector<8xf32>
    %69 = vector.multi_reduction <maximumf>, %68, %cst_37 [1] : vector<8x8xf32> to vector<8xf32>
    %70 = vector.shape_cast %69 : vector<8xf32> to vector<8x1xf32>
    %71 = vector.broadcast %70 : vector<8x1xf32> to vector<8x8xf32>
    %72 = arith.subf %68, %71 : vector<8x8xf32>
    %73 = math.exp %72 : vector<8x8xf32>
    %cst_38 = arith.constant dense<0.000000e+00> : vector<8xf32>
    %74 = vector.multi_reduction <add>, %73, %cst_38 [1] : vector<8x8xf32> to vector<8xf32>
    %75 = vector.shape_cast %74 : vector<8xf32> to vector<8x1xf32>
    %76 = tpu.reciprocal %75 {approx = true} : vector<8x1xf32> -> vector<8x1xf32>
    %cst_39 = arith.constant dense<0.000000e+00> : vector<8x8xf32>
    %77 = tpu.matmul %73, %64, %cst_39 {dimension_numbers = #tpu.dot_dimension_numbers<[1], [0], [0], [1], [0, 0, 1, 1], [], []>} : vector<8x8xf32>, vector<8x8xf32>, vector<8x8xf32> -> vector<8x8xf32>
    %78 = vector.broadcast %76 : vector<8x1xf32> to vector<8x8xf32>
    %79 = arith.mulf %77, %78 : vector<8x8xf32>
    %80 = vector.extract_strided_slice %19 {offsets = [0, 24], sizes = [8, 8], strides = [1, 1]} : vector<8x32xf32> to vector<8x8xf32>
    %81 = vector.extract_strided_slice %20 {offsets = [0, 24], sizes = [8, 8], strides = [1, 1]} : vector<8x32xf32> to vector<8x8xf32>
    %82 = vector.extract_strided_slice %21 {offsets = [0, 24], sizes = [8, 8], strides = [1, 1]} : vector<8x32xf32> to vector<8x8xf32>
    %83 = tpu.transpose %81, [1, 0] : vector<8x8xf32> -> vector<8x8xf32>
    %cst_40 = arith.constant dense<0.000000e+00> : vector<8x8xf32>
    %84 = tpu.matmul %80, %83, %cst_40 {dimension_numbers = #tpu.dot_dimension_numbers<[1], [0], [0], [1], [0, 0, 1, 1], [], []>} : vector<8x8xf32>, vector<8x8xf32>, vector<8x8xf32> -> vector<8x8xf32>
    %cst_41 = arith.constant 0.353553385 : f32
    %85 = vector.broadcast %cst_41 : f32 to vector<8x8xf32>
    %86 = arith.mulf %84, %85 : vector<8x8xf32>
    %cst_42 = arith.constant dense<0xFF800000> : vector<8xf32>
    %87 = vector.multi_reduction <maximumf>, %86, %cst_42 [1] : vector<8x8xf32> to vector<8xf32>
    %88 = vector.shape_cast %87 : vector<8xf32> to vector<8x1xf32>
    %89 = vector.broadcast %88 : vector<8x1xf32> to vector<8x8xf32>
    %90 = arith.subf %86, %89 : vector<8x8xf32>
    %91 = math.exp %90 : vector<8x8xf32>
    %cst_43 = arith.constant dense<0.000000e+00> : vector<8xf32>
    %92 = vector.multi_reduction <add>, %91, %cst_43 [1] : vector<8x8xf32> to vector<8xf32>
    %93 = vector.shape_cast %92 : vector<8xf32> to vector<8x1xf32>
    %94 = tpu.reciprocal %93 {approx = true} : vector<8x1xf32> -> vector<8x1xf32>
    %cst_44 = arith.constant dense<0.000000e+00> : vector<8x8xf32>
    %95 = tpu.matmul %91, %82, %cst_44 {dimension_numbers = #tpu.dot_dimension_numbers<[1], [0], [0], [1], [0, 0, 1, 1], [], []>} : vector<8x8xf32>, vector<8x8xf32>, vector<8x8xf32> -> vector<8x8xf32>
    %96 = vector.broadcast %94 : vector<8x1xf32> to vector<8x8xf32>
    %97 = arith.mulf %95, %96 : vector<8x8xf32>
    %98 = tpu.concatenate %43, %61, %79, %97 in 1 : vector<8x8xf32>, vector<8x8xf32>, vector<8x8xf32>, vector<8x8xf32> -> vector<8x32xf32>
    %cst_45 = arith.constant dense<0.000000e+00> : vector<8x32xf32>
    %99 = tpu.matmul %98, %23, %cst_45 {dimension_numbers = #tpu.dot_dimension_numbers<[1], [0], [0], [1], [0, 0, 1, 1], [], []>} : vector<8x32xf32>, vector<32x32xf32>, vector<8x32xf32> -> vector<8x32xf32>
    %100 = vector.broadcast %25 : vector<1x32xf32> to vector<8x32xf32>
    %101 = arith.addf %99, %100 : vector<8x32xf32>
    %102 = arith.addf %8, %101 : vector<8x32xf32>
    %c0_46 = arith.constant 0 : index
    %c0_47 = arith.constant 0 : index
    %c0_48 = arith.constant 0 : index
    %103 = vector.load %arg10[%c0_46, %c0_47, %c0_48] : memref<2x1x32xf32, #tpu.memory_space<vmem>>, vector<1x1x32xf32>
    %104 = vector.shape_cast %103 : vector<1x1x32xf32> to vector<1x32xf32>
    %c0_49 = arith.constant 0 : index
    %c0_50 = arith.constant 0 : index
    %c0_51 = arith.constant 0 : index
    %105 = vector.load %arg11[%c0_49, %c0_50, %c0_51] : memref<2x1x32xf32, #tpu.memory_space<vmem>>, vector<1x1x32xf32>
    %106 = vector.shape_cast %105 : vector<1x1x32xf32> to vector<1x32xf32>
    %cst_52 = arith.constant dense<0.000000e+00> : vector<8xf32>
    %107 = vector.multi_reduction <add>, %102, %cst_52 [1] : vector<8x32xf32> to vector<8xf32>
    %108 = vector.shape_cast %107 : vector<8xf32> to vector<8x1xf32>
    %cst_53 = arith.constant 3.200000e+01 : f32
    %109 = vector.broadcast %cst_53 : f32 to vector<8x1xf32>
    %110 = arith.divf %108, %109 : vector<8x1xf32>
    %111 = vector.broadcast %110 : vector<8x1xf32> to vector<8x32xf32>
    %112 = arith.subf %102, %111 : vector<8x32xf32>
    %113 = arith.mulf %112, %112 : vector<8x32xf32>
    %cst_54 = arith.constant dense<0.000000e+00> : vector<8xf32>
    %114 = vector.multi_reduction <add>, %113, %cst_54 [1] : vector<8x32xf32> to vector<8xf32>
    %115 = vector.shape_cast %114 : vector<8xf32> to vector<8x1xf32>
    %cst_55 = arith.constant 3.200000e+01 : f32
    %116 = vector.broadcast %cst_55 : f32 to vector<8x1xf32>
    %117 = arith.divf %115, %116 : vector<8x1xf32>
    %cst_56 = arith.constant 9.99999974E-6 : f32
    %118 = vector.broadcast %cst_56 : f32 to vector<8x1xf32>
    %119 = arith.addf %117, %118 : vector<8x1xf32>
    %120 = math.rsqrt %119 : vector<8x1xf32>
    %121 = vector.broadcast %120 : vector<8x1xf32> to vector<8x32xf32>
    %122 = arith.mulf %112, %121 : vector<8x32xf32>
    %123 = vector.broadcast %104 : vector<1x32xf32> to vector<8x32xf32>
    %124 = arith.mulf %122, %123 : vector<8x32xf32>
    %125 = vector.broadcast %106 : vector<1x32xf32> to vector<8x32xf32>
    %126 = arith.addf %124, %125 : vector<8x32xf32>
    %c0_57 = arith.constant 0 : index
    %c0_58 = arith.constant 0 : index
    %c0_59 = arith.constant 0 : index
    %127 = vector.load %arg12[%c0_57, %c0_58, %c0_59] : memref<2x32x64xf32, #tpu.memory_space<vmem>>, vector<1x32x64xf32>
    %128 = vector.shape_cast %127 : vector<1x32x64xf32> to vector<32x64xf32>
    %cst_60 = arith.constant dense<0.000000e+00> : vector<8x64xf32>
    %129 = tpu.matmul %126, %128, %cst_60 {dimension_numbers = #tpu.dot_dimension_numbers<[1], [0], [0], [1], [0, 0, 1, 1], [], []>} : vector<8x32xf32>, vector<32x64xf32>, vector<8x64xf32> -> vector<8x64xf32>
    %c0_61 = arith.constant 0 : index
    %c0_62 = arith.constant 0 : index
    %c0_63 = arith.constant 0 : index
    %130 = vector.load %arg13[%c0_61, %c0_62, %c0_63] : memref<2x1x64xf32, #tpu.memory_space<vmem>>, vector<1x1x64xf32>
    %131 = vector.shape_cast %130 : vector<1x1x64xf32> to vector<1x64xf32>
    %132 = vector.broadcast %131 : vector<1x64xf32> to vector<8x64xf32>
    %133 = arith.addf %129, %132 : vector<8x64xf32>
    %cst_64 = arith.constant 0.000000e+00 : f32
    %134 = vector.broadcast %cst_64 : f32 to vector<8x64xf32>
    %135 = arith.maximumf %133, %134 : vector<8x64xf32>
    %c0_65 = arith.constant 0 : index
    %c0_66 = arith.constant 0 : index
    %c0_67 = arith.constant 0 : index
    %136 = vector.load %arg14[%c0_65, %c0_66, %c0_67] : memref<2x64x32xf32, #tpu.memory_space<vmem>>, vector<1x64x32xf32>
    %137 = vector.shape_cast %136 : vector<1x64x32xf32> to vector<64x32xf32>
    %cst_68 = arith.constant dense<0.000000e+00> : vector<8x32xf32>
    %138 = tpu.matmul %135, %137, %cst_68 {dimension_numbers = #tpu.dot_dimension_numbers<[1], [0], [0], [1], [0, 0, 1, 1], [], []>} : vector<8x64xf32>, vector<64x32xf32>, vector<8x32xf32> -> vector<8x32xf32>
    %c0_69 = arith.constant 0 : index
    %c0_70 = arith.constant 0 : index
    %c0_71 = arith.constant 0 : index
    %139 = vector.load %arg15[%c0_69, %c0_70, %c0_71] : memref<2x1x32xf32, #tpu.memory_space<vmem>>, vector<1x1x32xf32>
    %140 = vector.shape_cast %139 : vector<1x1x32xf32> to vector<1x32xf32>
    %141 = vector.broadcast %140 : vector<1x32xf32> to vector<8x32xf32>
    %142 = arith.addf %138, %141 : vector<8x32xf32>
    %143 = arith.addf %126, %142 : vector<8x32xf32>
    %c0_72 = arith.constant 0 : index
    %c0_73 = arith.constant 0 : index
    %c0_74 = arith.constant 0 : index
    %144 = vector.load %arg16[%c0_72, %c0_73, %c0_74] : memref<2x1x32xf32, #tpu.memory_space<vmem>>, vector<1x1x32xf32>
    %145 = vector.shape_cast %144 : vector<1x1x32xf32> to vector<1x32xf32>
    %c0_75 = arith.constant 0 : index
    %c0_76 = arith.constant 0 : index
    %c0_77 = arith.constant 0 : index
    %146 = vector.load %arg17[%c0_75, %c0_76, %c0_77] : memref<2x1x32xf32, #tpu.memory_space<vmem>>, vector<1x1x32xf32>
    %147 = vector.shape_cast %146 : vector<1x1x32xf32> to vector<1x32xf32>
    %cst_78 = arith.constant dense<0.000000e+00> : vector<8xf32>
    %148 = vector.multi_reduction <add>, %143, %cst_78 [1] : vector<8x32xf32> to vector<8xf32>
    %149 = vector.shape_cast %148 : vector<8xf32> to vector<8x1xf32>
    %cst_79 = arith.constant 3.200000e+01 : f32
    %150 = vector.broadcast %cst_79 : f32 to vector<8x1xf32>
    %151 = arith.divf %149, %150 : vector<8x1xf32>
    %152 = vector.broadcast %151 : vector<8x1xf32> to vector<8x32xf32>
    %153 = arith.subf %143, %152 : vector<8x32xf32>
    %154 = arith.mulf %153, %153 : vector<8x32xf32>
    %cst_80 = arith.constant dense<0.000000e+00> : vector<8xf32>
    %155 = vector.multi_reduction <add>, %154, %cst_80 [1] : vector<8x32xf32> to vector<8xf32>
    %156 = vector.shape_cast %155 : vector<8xf32> to vector<8x1xf32>
    %cst_81 = arith.constant 3.200000e+01 : f32
    %157 = vector.broadcast %cst_81 : f32 to vector<8x1xf32>
    %158 = arith.divf %156, %157 : vector<8x1xf32>
    %cst_82 = arith.constant 9.99999974E-6 : f32
    %159 = vector.broadcast %cst_82 : f32 to vector<8x1xf32>
    %160 = arith.addf %158, %159 : vector<8x1xf32>
    %161 = math.rsqrt %160 : vector<8x1xf32>
    %162 = vector.broadcast %161 : vector<8x1xf32> to vector<8x32xf32>
    %163 = arith.mulf %153, %162 : vector<8x32xf32>
    %164 = vector.broadcast %145 : vector<1x32xf32> to vector<8x32xf32>
    %165 = arith.mulf %163, %164 : vector<8x32xf32>
    %166 = vector.broadcast %147 : vector<1x32xf32> to vector<8x32xf32>
    %167 = arith.addf %165, %166 : vector<8x32xf32>
    %c1 = arith.constant 1 : index
    %c0_83 = arith.constant 0 : index
    %c0_84 = arith.constant 0 : index
    %168 = vector.load %arg6[%c1, %c0_83, %c0_84] : memref<2x32x96xf32, #tpu.memory_space<vmem>>, vector<1x32x96xf32>
    %169 = vector.shape_cast %168 : vector<1x32x96xf32> to vector<32x96xf32>
    %cst_85 = arith.constant dense<0.000000e+00> : vector<8x96xf32>
    %170 = tpu.matmul %167, %169, %cst_85 {dimension_numbers = #tpu.dot_dimension_numbers<[1], [0], [0], [1], [0, 0, 1, 1], [], []>} : vector<8x32xf32>, vector<32x96xf32>, vector<8x96xf32> -> vector<8x96xf32>
    %c1_86 = arith.constant 1 : index
    %c0_87 = arith.constant 0 : index
    %c0_88 = arith.constant 0 : index
    %171 = vector.load %arg7[%c1_86, %c0_87, %c0_88] : memref<2x1x96xf32, #tpu.memory_space<vmem>>, vector<1x1x96xf32>
    %172 = vector.shape_cast %171 : vector<1x1x96xf32> to vector<1x96xf32>
    %173 = vector.broadcast %172 : vector<1x96xf32> to vector<8x96xf32>
    %174 = arith.addf %170, %173 : vector<8x96xf32>
    %175 = vector.extract_strided_slice %174 {offsets = [0, 0], sizes = [8, 32], strides = [1, 1]} : vector<8x96xf32> to vector<8x32xf32>
    %176 = vector.extract_strided_slice %174 {offsets = [0, 32], sizes = [8, 32], strides = [1, 1]} : vector<8x96xf32> to vector<8x32xf32>
    %177 = vector.extract_strided_slice %174 {offsets = [0, 64], sizes = [8, 32], strides = [1, 1]} : vector<8x96xf32> to vector<8x32xf32>
    %c1_89 = arith.constant 1 : index
    %c0_90 = arith.constant 0 : index
    %c0_91 = arith.constant 0 : index
    %178 = vector.load %arg8[%c1_89, %c0_90, %c0_91] : memref<2x32x32xf32, #tpu.memory_space<vmem>>, vector<1x32x32xf32>
    %179 = vector.shape_cast %178 : vector<1x32x32xf32> to vector<32x32xf32>
    %c1_92 = arith.constant 1 : index
    %c0_93 = arith.constant 0 : index
    %c0_94 = arith.constant 0 : index
    %180 = vector.load %arg9[%c1_92, %c0_93, %c0_94] : memref<2x1x32xf32, #tpu.memory_space<vmem>>, vector<1x1x32xf32>
    %181 = vector.shape_cast %180 : vector<1x1x32xf32> to vector<1x32xf32>
    %182 = vector.extract_strided_slice %175 {offsets = [0, 0], sizes = [8, 8], strides = [1, 1]} : vector<8x32xf32> to vector<8x8xf32>
    %183 = vector.extract_strided_slice %176 {offsets = [0, 0], sizes = [8, 8], strides = [1, 1]} : vector<8x32xf32> to vector<8x8xf32>
    %184 = vector.extract_strided_slice %177 {offsets = [0, 0], sizes = [8, 8], strides = [1, 1]} : vector<8x32xf32> to vector<8x8xf32>
    %185 = tpu.transpose %183, [1, 0] : vector<8x8xf32> -> vector<8x8xf32>
    %cst_95 = arith.constant dense<0.000000e+00> : vector<8x8xf32>
    %186 = tpu.matmul %182, %185, %cst_95 {dimension_numbers = #tpu.dot_dimension_numbers<[1], [0], [0], [1], [0, 0, 1, 1], [], []>} : vector<8x8xf32>, vector<8x8xf32>, vector<8x8xf32> -> vector<8x8xf32>
    %cst_96 = arith.constant 0.353553385 : f32
    %187 = vector.broadcast %cst_96 : f32 to vector<8x8xf32>
    %188 = arith.mulf %186, %187 : vector<8x8xf32>
    %cst_97 = arith.constant dense<0xFF800000> : vector<8xf32>
    %189 = vector.multi_reduction <maximumf>, %188, %cst_97 [1] : vector<8x8xf32> to vector<8xf32>
    %190 = vector.shape_cast %189 : vector<8xf32> to vector<8x1xf32>
    %191 = vector.broadcast %190 : vector<8x1xf32> to vector<8x8xf32>
    %192 = arith.subf %188, %191 : vector<8x8xf32>
    %193 = math.exp %192 : vector<8x8xf32>
    %cst_98 = arith.constant dense<0.000000e+00> : vector<8xf32>
    %194 = vector.multi_reduction <add>, %193, %cst_98 [1] : vector<8x8xf32> to vector<8xf32>
    %195 = vector.shape_cast %194 : vector<8xf32> to vector<8x1xf32>
    %196 = tpu.reciprocal %195 {approx = true} : vector<8x1xf32> -> vector<8x1xf32>
    %cst_99 = arith.constant dense<0.000000e+00> : vector<8x8xf32>
    %197 = tpu.matmul %193, %184, %cst_99 {dimension_numbers = #tpu.dot_dimension_numbers<[1], [0], [0], [1], [0, 0, 1, 1], [], []>} : vector<8x8xf32>, vector<8x8xf32>, vector<8x8xf32> -> vector<8x8xf32>
    %198 = vector.broadcast %196 : vector<8x1xf32> to vector<8x8xf32>
    %199 = arith.mulf %197, %198 : vector<8x8xf32>
    %200 = vector.extract_strided_slice %175 {offsets = [0, 8], sizes = [8, 8], strides = [1, 1]} : vector<8x32xf32> to vector<8x8xf32>
    %201 = vector.extract_strided_slice %176 {offsets = [0, 8], sizes = [8, 8], strides = [1, 1]} : vector<8x32xf32> to vector<8x8xf32>
    %202 = vector.extract_strided_slice %177 {offsets = [0, 8], sizes = [8, 8], strides = [1, 1]} : vector<8x32xf32> to vector<8x8xf32>
    %203 = tpu.transpose %201, [1, 0] : vector<8x8xf32> -> vector<8x8xf32>
    %cst_100 = arith.constant dense<0.000000e+00> : vector<8x8xf32>
    %204 = tpu.matmul %200, %203, %cst_100 {dimension_numbers = #tpu.dot_dimension_numbers<[1], [0], [0], [1], [0, 0, 1, 1], [], []>} : vector<8x8xf32>, vector<8x8xf32>, vector<8x8xf32> -> vector<8x8xf32>
    %cst_101 = arith.constant 0.353553385 : f32
    %205 = vector.broadcast %cst_101 : f32 to vector<8x8xf32>
    %206 = arith.mulf %204, %205 : vector<8x8xf32>
    %cst_102 = arith.constant dense<0xFF800000> : vector<8xf32>
    %207 = vector.multi_reduction <maximumf>, %206, %cst_102 [1] : vector<8x8xf32> to vector<8xf32>
    %208 = vector.shape_cast %207 : vector<8xf32> to vector<8x1xf32>
    %209 = vector.broadcast %208 : vector<8x1xf32> to vector<8x8xf32>
    %210 = arith.subf %206, %209 : vector<8x8xf32>
    %211 = math.exp %210 : vector<8x8xf32>
    %cst_103 = arith.constant dense<0.000000e+00> : vector<8xf32>
    %212 = vector.multi_reduction <add>, %211, %cst_103 [1] : vector<8x8xf32> to vector<8xf32>
    %213 = vector.shape_cast %212 : vector<8xf32> to vector<8x1xf32>
    %214 = tpu.reciprocal %213 {approx = true} : vector<8x1xf32> -> vector<8x1xf32>
    %cst_104 = arith.constant dense<0.000000e+00> : vector<8x8xf32>
    %215 = tpu.matmul %211, %202, %cst_104 {dimension_numbers = #tpu.dot_dimension_numbers<[1], [0], [0], [1], [0, 0, 1, 1], [], []>} : vector<8x8xf32>, vector<8x8xf32>, vector<8x8xf32> -> vector<8x8xf32>
    %216 = vector.broadcast %214 : vector<8x1xf32> to vector<8x8xf32>
    %217 = arith.mulf %215, %216 : vector<8x8xf32>
    %218 = vector.extract_strided_slice %175 {offsets = [0, 16], sizes = [8, 8], strides = [1, 1]} : vector<8x32xf32> to vector<8x8xf32>
    %219 = vector.extract_strided_slice %176 {offsets = [0, 16], sizes = [8, 8], strides = [1, 1]} : vector<8x32xf32> to vector<8x8xf32>
    %220 = vector.extract_strided_slice %177 {offsets = [0, 16], sizes = [8, 8], strides = [1, 1]} : vector<8x32xf32> to vector<8x8xf32>
    %221 = tpu.transpose %219, [1, 0] : vector<8x8xf32> -> vector<8x8xf32>
    %cst_105 = arith.constant dense<0.000000e+00> : vector<8x8xf32>
    %222 = tpu.matmul %218, %221, %cst_105 {dimension_numbers = #tpu.dot_dimension_numbers<[1], [0], [0], [1], [0, 0, 1, 1], [], []>} : vector<8x8xf32>, vector<8x8xf32>, vector<8x8xf32> -> vector<8x8xf32>
    %cst_106 = arith.constant 0.353553385 : f32
    %223 = vector.broadcast %cst_106 : f32 to vector<8x8xf32>
    %224 = arith.mulf %222, %223 : vector<8x8xf32>
    %cst_107 = arith.constant dense<0xFF800000> : vector<8xf32>
    %225 = vector.multi_reduction <maximumf>, %224, %cst_107 [1] : vector<8x8xf32> to vector<8xf32>
    %226 = vector.shape_cast %225 : vector<8xf32> to vector<8x1xf32>
    %227 = vector.broadcast %226 : vector<8x1xf32> to vector<8x8xf32>
    %228 = arith.subf %224, %227 : vector<8x8xf32>
    %229 = math.exp %228 : vector<8x8xf32>
    %cst_108 = arith.constant dense<0.000000e+00> : vector<8xf32>
    %230 = vector.multi_reduction <add>, %229, %cst_108 [1] : vector<8x8xf32> to vector<8xf32>
    %231 = vector.shape_cast %230 : vector<8xf32> to vector<8x1xf32>
    %232 = tpu.reciprocal %231 {approx = true} : vector<8x1xf32> -> vector<8x1xf32>
    %cst_109 = arith.constant dense<0.000000e+00> : vector<8x8xf32>
    %233 = tpu.matmul %229, %220, %cst_109 {dimension_numbers = #tpu.dot_dimension_numbers<[1], [0], [0], [1], [0, 0, 1, 1], [], []>} : vector<8x8xf32>, vector<8x8xf32>, vector<8x8xf32> -> vector<8x8xf32>
    %234 = vector.broadcast %232 : vector<8x1xf32> to vector<8x8xf32>
    %235 = arith.mulf %233, %234 : vector<8x8xf32>
    %236 = vector.extract_strided_slice %175 {offsets = [0, 24], sizes = [8, 8], strides = [1, 1]} : vector<8x32xf32> to vector<8x8xf32>
    %237 = vector.extract_strided_slice %176 {offsets = [0, 24], sizes = [8, 8], strides = [1, 1]} : vector<8x32xf32> to vector<8x8xf32>
    %238 = vector.extract_strided_slice %177 {offsets = [0, 24], sizes = [8, 8], strides = [1, 1]} : vector<8x32xf32> to vector<8x8xf32>
    %239 = tpu.transpose %237, [1, 0] : vector<8x8xf32> -> vector<8x8xf32>
    %cst_110 = arith.constant dense<0.000000e+00> : vector<8x8xf32>
    %240 = tpu.matmul %236, %239, %cst_110 {dimension_numbers = #tpu.dot_dimension_numbers<[1], [0], [0], [1], [0, 0, 1, 1], [], []>} : vector<8x8xf32>, vector<8x8xf32>, vector<8x8xf32> -> vector<8x8xf32>
    %cst_111 = arith.constant 0.353553385 : f32
    %241 = vector.broadcast %cst_111 : f32 to vector<8x8xf32>
    %242 = arith.mulf %240, %241 : vector<8x8xf32>
    %cst_112 = arith.constant dense<0xFF800000> : vector<8xf32>
    %243 = vector.multi_reduction <maximumf>, %242, %cst_112 [1] : vector<8x8xf32> to vector<8xf32>
    %244 = vector.shape_cast %243 : vector<8xf32> to vector<8x1xf32>
    %245 = vector.broadcast %244 : vector<8x1xf32> to vector<8x8xf32>
    %246 = arith.subf %242, %245 : vector<8x8xf32>
    %247 = math.exp %246 : vector<8x8xf32>
    %cst_113 = arith.constant dense<0.000000e+00> : vector<8xf32>
    %248 = vector.multi_reduction <add>, %247, %cst_113 [1] : vector<8x8xf32> to vector<8xf32>
    %249 = vector.shape_cast %248 : vector<8xf32> to vector<8x1xf32>
    %250 = tpu.reciprocal %249 {approx = true} : vector<8x1xf32> -> vector<8x1xf32>
    %cst_114 = arith.constant dense<0.000000e+00> : vector<8x8xf32>
    %251 = tpu.matmul %247, %238, %cst_114 {dimension_numbers = #tpu.dot_dimension_numbers<[1], [0], [0], [1], [0, 0, 1, 1], [], []>} : vector<8x8xf32>, vector<8x8xf32>, vector<8x8xf32> -> vector<8x8xf32>
    %252 = vector.broadcast %250 : vector<8x1xf32> to vector<8x8xf32>
    %253 = arith.mulf %251, %252 : vector<8x8xf32>
    %254 = tpu.concatenate %199, %217, %235, %253 in 1 : vector<8x8xf32>, vector<8x8xf32>, vector<8x8xf32>, vector<8x8xf32> -> vector<8x32xf32>
    %cst_115 = arith.constant dense<0.000000e+00> : vector<8x32xf32>
    %255 = tpu.matmul %254, %179, %cst_115 {dimension_numbers = #tpu.dot_dimension_numbers<[1], [0], [0], [1], [0, 0, 1, 1], [], []>} : vector<8x32xf32>, vector<32x32xf32>, vector<8x32xf32> -> vector<8x32xf32>
    %256 = vector.broadcast %181 : vector<1x32xf32> to vector<8x32xf32>
    %257 = arith.addf %255, %256 : vector<8x32xf32>
    %258 = arith.addf %167, %257 : vector<8x32xf32>
    %c1_116 = arith.constant 1 : index
    %c0_117 = arith.constant 0 : index
    %c0_118 = arith.constant 0 : index
    %259 = vector.load %arg10[%c1_116, %c0_117, %c0_118] : memref<2x1x32xf32, #tpu.memory_space<vmem>>, vector<1x1x32xf32>
    %260 = vector.shape_cast %259 : vector<1x1x32xf32> to vector<1x32xf32>
    %c1_119 = arith.constant 1 : index
    %c0_120 = arith.constant 0 : index
    %c0_121 = arith.constant 0 : index
    %261 = vector.load %arg11[%c1_119, %c0_120, %c0_121] : memref<2x1x32xf32, #tpu.memory_space<vmem>>, vector<1x1x32xf32>
    %262 = vector.shape_cast %261 : vector<1x1x32xf32> to vector<1x32xf32>
    %cst_122 = arith.constant dense<0.000000e+00> : vector<8xf32>
    %263 = vector.multi_reduction <add>, %258, %cst_122 [1] : vector<8x32xf32> to vector<8xf32>
    %264 = vector.shape_cast %263 : vector<8xf32> to vector<8x1xf32>
    %cst_123 = arith.constant 3.200000e+01 : f32
    %265 = vector.broadcast %cst_123 : f32 to vector<8x1xf32>
    %266 = arith.divf %264, %265 : vector<8x1xf32>
    %267 = vector.broadcast %266 : vector<8x1xf32> to vector<8x32xf32>
    %268 = arith.subf %258, %267 : vector<8x32xf32>
    %269 = arith.mulf %268, %268 : vector<8x32xf32>
    %cst_124 = arith.constant dense<0.000000e+00> : vector<8xf32>
    %270 = vector.multi_reduction <add>, %269, %cst_124 [1] : vector<8x32xf32> to vector<8xf32>
    %271 = vector.shape_cast %270 : vector<8xf32> to vector<8x1xf32>
    %cst_125 = arith.constant 3.200000e+01 : f32
    %272 = vector.broadcast %cst_125 : f32 to vector<8x1xf32>
    %273 = arith.divf %271, %272 : vector<8x1xf32>
    %cst_126 = arith.constant 9.99999974E-6 : f32
    %274 = vector.broadcast %cst_126 : f32 to vector<8x1xf32>
    %275 = arith.addf %273, %274 : vector<8x1xf32>
    %276 = math.rsqrt %275 : vector<8x1xf32>
    %277 = vector.broadcast %276 : vector<8x1xf32> to vector<8x32xf32>
    %278 = arith.mulf %268, %277 : vector<8x32xf32>
    %279 = vector.broadcast %260 : vector<1x32xf32> to vector<8x32xf32>
    %280 = arith.mulf %278, %279 : vector<8x32xf32>
    %281 = vector.broadcast %262 : vector<1x32xf32> to vector<8x32xf32>
    %282 = arith.addf %280, %281 : vector<8x32xf32>
    %c1_127 = arith.constant 1 : index
    %c0_128 = arith.constant 0 : index
    %c0_129 = arith.constant 0 : index
    %283 = vector.load %arg12[%c1_127, %c0_128, %c0_129] : memref<2x32x64xf32, #tpu.memory_space<vmem>>, vector<1x32x64xf32>
    %284 = vector.shape_cast %283 : vector<1x32x64xf32> to vector<32x64xf32>
    %cst_130 = arith.constant dense<0.000000e+00> : vector<8x64xf32>
    %285 = tpu.matmul %282, %284, %cst_130 {dimension_numbers = #tpu.dot_dimension_numbers<[1], [0], [0], [1], [0, 0, 1, 1], [], []>} : vector<8x32xf32>, vector<32x64xf32>, vector<8x64xf32> -> vector<8x64xf32>
    %c1_131 = arith.constant 1 : index
    %c0_132 = arith.constant 0 : index
    %c0_133 = arith.constant 0 : index
    %286 = vector.load %arg13[%c1_131, %c0_132, %c0_133] : memref<2x1x64xf32, #tpu.memory_space<vmem>>, vector<1x1x64xf32>
    %287 = vector.shape_cast %286 : vector<1x1x64xf32> to vector<1x64xf32>
    %288 = vector.broadcast %287 : vector<1x64xf32> to vector<8x64xf32>
    %289 = arith.addf %285, %288 : vector<8x64xf32>
    %cst_134 = arith.constant 0.000000e+00 : f32
    %290 = vector.broadcast %cst_134 : f32 to vector<8x64xf32>
    %291 = arith.maximumf %289, %290 : vector<8x64xf32>
    %c1_135 = arith.constant 1 : index
    %c0_136 = arith.constant 0 : index
    %c0_137 = arith.constant 0 : index
    %292 = vector.load %arg14[%c1_135, %c0_136, %c0_137] : memref<2x64x32xf32, #tpu.memory_space<vmem>>, vector<1x64x32xf32>
    %293 = vector.shape_cast %292 : vector<1x64x32xf32> to vector<64x32xf32>
    %cst_138 = arith.constant dense<0.000000e+00> : vector<8x32xf32>
    %294 = tpu.matmul %291, %293, %cst_138 {dimension_numbers = #tpu.dot_dimension_numbers<[1], [0], [0], [1], [0, 0, 1, 1], [], []>} : vector<8x64xf32>, vector<64x32xf32>, vector<8x32xf32> -> vector<8x32xf32>
    %c1_139 = arith.constant 1 : index
    %c0_140 = arith.constant 0 : index
    %c0_141 = arith.constant 0 : index
    %295 = vector.load %arg15[%c1_139, %c0_140, %c0_141] : memref<2x1x32xf32, #tpu.memory_space<vmem>>, vector<1x1x32xf32>
    %296 = vector.shape_cast %295 : vector<1x1x32xf32> to vector<1x32xf32>
    %297 = vector.broadcast %296 : vector<1x32xf32> to vector<8x32xf32>
    %298 = arith.addf %294, %297 : vector<8x32xf32>
    %299 = arith.addf %282, %298 : vector<8x32xf32>
    %c1_142 = arith.constant 1 : index
    %c0_143 = arith.constant 0 : index
    %c0_144 = arith.constant 0 : index
    %300 = vector.load %arg16[%c1_142, %c0_143, %c0_144] : memref<2x1x32xf32, #tpu.memory_space<vmem>>, vector<1x1x32xf32>
    %301 = vector.shape_cast %300 : vector<1x1x32xf32> to vector<1x32xf32>
    %c1_145 = arith.constant 1 : index
    %c0_146 = arith.constant 0 : index
    %c0_147 = arith.constant 0 : index
    %302 = vector.load %arg17[%c1_145, %c0_146, %c0_147] : memref<2x1x32xf32, #tpu.memory_space<vmem>>, vector<1x1x32xf32>
    %303 = vector.shape_cast %302 : vector<1x1x32xf32> to vector<1x32xf32>
    %cst_148 = arith.constant dense<0.000000e+00> : vector<8xf32>
    %304 = vector.multi_reduction <add>, %299, %cst_148 [1] : vector<8x32xf32> to vector<8xf32>
    %305 = vector.shape_cast %304 : vector<8xf32> to vector<8x1xf32>
    %cst_149 = arith.constant 3.200000e+01 : f32
    %306 = vector.broadcast %cst_149 : f32 to vector<8x1xf32>
    %307 = arith.divf %305, %306 : vector<8x1xf32>
    %308 = vector.broadcast %307 : vector<8x1xf32> to vector<8x32xf32>
    %309 = arith.subf %299, %308 : vector<8x32xf32>
    %310 = arith.mulf %309, %309 : vector<8x32xf32>
    %cst_150 = arith.constant dense<0.000000e+00> : vector<8xf32>
    %311 = vector.multi_reduction <add>, %310, %cst_150 [1] : vector<8x32xf32> to vector<8xf32>
    %312 = vector.shape_cast %311 : vector<8xf32> to vector<8x1xf32>
    %cst_151 = arith.constant 3.200000e+01 : f32
    %313 = vector.broadcast %cst_151 : f32 to vector<8x1xf32>
    %314 = arith.divf %312, %313 : vector<8x1xf32>
    %cst_152 = arith.constant 9.99999974E-6 : f32
    %315 = vector.broadcast %cst_152 : f32 to vector<8x1xf32>
    %316 = arith.addf %314, %315 : vector<8x1xf32>
    %317 = math.rsqrt %316 : vector<8x1xf32>
    %318 = vector.broadcast %317 : vector<8x1xf32> to vector<8x32xf32>
    %319 = arith.mulf %309, %318 : vector<8x32xf32>
    %320 = vector.broadcast %301 : vector<1x32xf32> to vector<8x32xf32>
    %321 = arith.mulf %319, %320 : vector<8x32xf32>
    %322 = vector.broadcast %303 : vector<1x32xf32> to vector<8x32xf32>
    %323 = arith.addf %321, %322 : vector<8x32xf32>
    %c0_153 = arith.constant 0 : index
    %c0_154 = arith.constant 0 : index
    %324 = vector.load %arg38[%c0_153, %c0_154] : memref<1x32xf32, #tpu.memory_space<vmem>>, vector<1x32xf32>
    %c0_155 = arith.constant 0 : index
    %c0_156 = arith.constant 0 : index
    %325 = vector.load %arg39[%c0_155, %c0_156] : memref<1x32xf32, #tpu.memory_space<vmem>>, vector<1x32xf32>
    %cst_157 = arith.constant dense<0.000000e+00> : vector<8xf32>
    %326 = vector.multi_reduction <add>, %323, %cst_157 [1] : vector<8x32xf32> to vector<8xf32>
    %327 = vector.shape_cast %326 : vector<8xf32> to vector<8x1xf32>
    %cst_158 = arith.constant 3.200000e+01 : f32
    %328 = vector.broadcast %cst_158 : f32 to vector<8x1xf32>
    %329 = arith.divf %327, %328 : vector<8x1xf32>
    %330 = vector.broadcast %329 : vector<8x1xf32> to vector<8x32xf32>
    %331 = arith.subf %323, %330 : vector<8x32xf32>
    %332 = arith.mulf %331, %331 : vector<8x32xf32>
    %cst_159 = arith.constant dense<0.000000e+00> : vector<8xf32>
    %333 = vector.multi_reduction <add>, %332, %cst_159 [1] : vector<8x32xf32> to vector<8xf32>
    %334 = vector.shape_cast %333 : vector<8xf32> to vector<8x1xf32>
    %cst_160 = arith.constant 3.200000e+01 : f32
    %335 = vector.broadcast %cst_160 : f32 to vector<8x1xf32>
    %336 = arith.divf %334, %335 : vector<8x1xf32>
    %cst_161 = arith.constant 9.99999974E-6 : f32
    %337 = vector.broadcast %cst_161 : f32 to vector<8x1xf32>
    %338 = arith.addf %336, %337 : vector<8x1xf32>
    %339 = math.rsqrt %338 : vector<8x1xf32>
    %340 = vector.broadcast %339 : vector<8x1xf32> to vector<8x32xf32>
    %341 = arith.mulf %331, %340 : vector<8x32xf32>
    %342 = vector.broadcast %324 : vector<1x32xf32> to vector<8x32xf32>
    %343 = arith.mulf %341, %342 : vector<8x32xf32>
    %344 = vector.broadcast %325 : vector<1x32xf32> to vector<8x32xf32>
    %345 = arith.addf %343, %344 : vector<8x32xf32>
    %c0_162 = arith.constant 0 : index
    %c0_163 = arith.constant 0 : index
    %c0_164 = arith.constant 0 : index
    %346 = vector.load %arg18[%c0_162, %c0_163, %c0_164] : memref<1x32x96xf32, #tpu.memory_space<vmem>>, vector<1x32x96xf32>
    %347 = vector.shape_cast %346 : vector<1x32x96xf32> to vector<32x96xf32>
    %cst_165 = arith.constant dense<0.000000e+00> : vector<12x96xf32>
    %348 = tpu.matmul %11, %347, %cst_165 {dimension_numbers = #tpu.dot_dimension_numbers<[1], [0], [0], [1], [0, 0, 1, 1], [], []>} : vector<12x32xf32>, vector<32x96xf32>, vector<12x96xf32> -> vector<12x96xf32>
    %c0_166 = arith.constant 0 : index
    %c0_167 = arith.constant 0 : index
    %c0_168 = arith.constant 0 : index
    %349 = vector.load %arg19[%c0_166, %c0_167, %c0_168] : memref<1x1x96xf32, #tpu.memory_space<vmem>>, vector<1x1x96xf32>
    %350 = vector.shape_cast %349 : vector<1x1x96xf32> to vector<1x96xf32>
    %351 = vector.broadcast %350 : vector<1x96xf32> to vector<12x96xf32>
    %352 = arith.addf %348, %351 : vector<12x96xf32>
    %353 = vector.extract_strided_slice %352 {offsets = [0, 0], sizes = [12, 32], strides = [1, 1]} : vector<12x96xf32> to vector<12x32xf32>
    %354 = vector.extract_strided_slice %352 {offsets = [0, 32], sizes = [12, 32], strides = [1, 1]} : vector<12x96xf32> to vector<12x32xf32>
    %355 = vector.extract_strided_slice %352 {offsets = [0, 64], sizes = [12, 32], strides = [1, 1]} : vector<12x96xf32> to vector<12x32xf32>
    %c0_169 = arith.constant 0 : index
    %c0_170 = arith.constant 0 : index
    %c0_171 = arith.constant 0 : index
    %356 = vector.load %arg20[%c0_169, %c0_170, %c0_171] : memref<1x32x32xf32, #tpu.memory_space<vmem>>, vector<1x32x32xf32>
    %357 = vector.shape_cast %356 : vector<1x32x32xf32> to vector<32x32xf32>
    %c0_172 = arith.constant 0 : index
    %c0_173 = arith.constant 0 : index
    %c0_174 = arith.constant 0 : index
    %358 = vector.load %arg21[%c0_172, %c0_173, %c0_174] : memref<1x1x32xf32, #tpu.memory_space<vmem>>, vector<1x1x32xf32>
    %359 = vector.shape_cast %358 : vector<1x1x32xf32> to vector<1x32xf32>
    %360 = tpu.iota {dimensions = array<i32: 0>} : vector<12x12xi32>
    %361 = tpu.iota {dimensions = array<i32: 1>} : vector<12x12xi32>
    %362 = arith.cmpi sgt, %361, %360 : vector<12x12xi32>
    %cst_175 = arith.constant -1.000000e+30 : f32
    %cst_176 = arith.constant 0.000000e+00 : f32
    %363 = vector.broadcast %cst_175 : f32 to vector<12x12xf32>
    %364 = vector.broadcast %cst_176 : f32 to vector<12x12xf32>
    %365 = arith.select %362, %363, %364 : vector<12x12xi1>, vector<12x12xf32>
    %366 = vector.extract_strided_slice %353 {offsets = [0, 0], sizes = [12, 8], strides = [1, 1]} : vector<12x32xf32> to vector<12x8xf32>
    %367 = vector.extract_strided_slice %354 {offsets = [0, 0], sizes = [12, 8], strides = [1, 1]} : vector<12x32xf32> to vector<12x8xf32>
    %368 = vector.extract_strided_slice %355 {offsets = [0, 0], sizes = [12, 8], strides = [1, 1]} : vector<12x32xf32> to vector<12x8xf32>
    %369 = tpu.transpose %367, [1, 0] : vector<12x8xf32> -> vector<8x12xf32>
    %cst_177 = arith.constant dense<0.000000e+00> : vector<12x12xf32>
    %370 = tpu.matmul %366, %369, %cst_177 {dimension_numbers = #tpu.dot_dimension_numbers<[1], [0], [0], [1], [0, 0, 1, 1], [], []>} : vector<12x8xf32>, vector<8x12xf32>, vector<12x12xf32> -> vector<12x12xf32>
    %cst_178 = arith.constant 0.353553385 : f32
    %371 = vector.broadcast %cst_178 : f32 to vector<12x12xf32>
    %372 = arith.mulf %370, %371 : vector<12x12xf32>
    %373 = arith.addf %372, %365 : vector<12x12xf32>
    %cst_179 = arith.constant dense<0xFF800000> : vector<12xf32>
    %374 = vector.multi_reduction <maximumf>, %373, %cst_179 [1] : vector<12x12xf32> to vector<12xf32>
    %375 = vector.shape_cast %374 : vector<12xf32> to vector<12x1xf32>
    %376 = vector.broadcast %375 : vector<12x1xf32> to vector<12x12xf32>
    %377 = arith.subf %373, %376 : vector<12x12xf32>
    %378 = math.exp %377 : vector<12x12xf32>
    %cst_180 = arith.constant dense<0.000000e+00> : vector<12xf32>
    %379 = vector.multi_reduction <add>, %378, %cst_180 [1] : vector<12x12xf32> to vector<12xf32>
    %380 = vector.shape_cast %379 : vector<12xf32> to vector<12x1xf32>
    %381 = tpu.reciprocal %380 {approx = true} : vector<12x1xf32> -> vector<12x1xf32>
    %cst_181 = arith.constant dense<0.000000e+00> : vector<12x8xf32>
    %382 = tpu.matmul %378, %368, %cst_181 {dimension_numbers = #tpu.dot_dimension_numbers<[1], [0], [0], [1], [0, 0, 1, 1], [], []>} : vector<12x12xf32>, vector<12x8xf32>, vector<12x8xf32> -> vector<12x8xf32>
    %383 = vector.broadcast %381 : vector<12x1xf32> to vector<12x8xf32>
    %384 = arith.mulf %382, %383 : vector<12x8xf32>
    %385 = vector.extract_strided_slice %353 {offsets = [0, 8], sizes = [12, 8], strides = [1, 1]} : vector<12x32xf32> to vector<12x8xf32>
    %386 = vector.extract_strided_slice %354 {offsets = [0, 8], sizes = [12, 8], strides = [1, 1]} : vector<12x32xf32> to vector<12x8xf32>
    %387 = vector.extract_strided_slice %355 {offsets = [0, 8], sizes = [12, 8], strides = [1, 1]} : vector<12x32xf32> to vector<12x8xf32>
    %388 = tpu.transpose %386, [1, 0] : vector<12x8xf32> -> vector<8x12xf32>
    %cst_182 = arith.constant dense<0.000000e+00> : vector<12x12xf32>
    %389 = tpu.matmul %385, %388, %cst_182 {dimension_numbers = #tpu.dot_dimension_numbers<[1], [0], [0], [1], [0, 0, 1, 1], [], []>} : vector<12x8xf32>, vector<8x12xf32>, vector<12x12xf32> -> vector<12x12xf32>
    %cst_183 = arith.constant 0.353553385 : f32
    %390 = vector.broadcast %cst_183 : f32 to vector<12x12xf32>
    %391 = arith.mulf %389, %390 : vector<12x12xf32>
    %392 = arith.addf %391, %365 : vector<12x12xf32>
    %cst_184 = arith.constant dense<0xFF800000> : vector<12xf32>
    %393 = vector.multi_reduction <maximumf>, %392, %cst_184 [1] : vector<12x12xf32> to vector<12xf32>
    %394 = vector.shape_cast %393 : vector<12xf32> to vector<12x1xf32>
    %395 = vector.broadcast %394 : vector<12x1xf32> to vector<12x12xf32>
    %396 = arith.subf %392, %395 : vector<12x12xf32>
    %397 = math.exp %396 : vector<12x12xf32>
    %cst_185 = arith.constant dense<0.000000e+00> : vector<12xf32>
    %398 = vector.multi_reduction <add>, %397, %cst_185 [1] : vector<12x12xf32> to vector<12xf32>
    %399 = vector.shape_cast %398 : vector<12xf32> to vector<12x1xf32>
    %400 = tpu.reciprocal %399 {approx = true} : vector<12x1xf32> -> vector<12x1xf32>
    %cst_186 = arith.constant dense<0.000000e+00> : vector<12x8xf32>
    %401 = tpu.matmul %397, %387, %cst_186 {dimension_numbers = #tpu.dot_dimension_numbers<[1], [0], [0], [1], [0, 0, 1, 1], [], []>} : vector<12x12xf32>, vector<12x8xf32>, vector<12x8xf32> -> vector<12x8xf32>
    %402 = vector.broadcast %400 : vector<12x1xf32> to vector<12x8xf32>
    %403 = arith.mulf %401, %402 : vector<12x8xf32>
    %404 = vector.extract_strided_slice %353 {offsets = [0, 16], sizes = [12, 8], strides = [1, 1]} : vector<12x32xf32> to vector<12x8xf32>
    %405 = vector.extract_strided_slice %354 {offsets = [0, 16], sizes = [12, 8], strides = [1, 1]} : vector<12x32xf32> to vector<12x8xf32>
    %406 = vector.extract_strided_slice %355 {offsets = [0, 16], sizes = [12, 8], strides = [1, 1]} : vector<12x32xf32> to vector<12x8xf32>
    %407 = tpu.transpose %405, [1, 0] : vector<12x8xf32> -> vector<8x12xf32>
    %cst_187 = arith.constant dense<0.000000e+00> : vector<12x12xf32>
    %408 = tpu.matmul %404, %407, %cst_187 {dimension_numbers = #tpu.dot_dimension_numbers<[1], [0], [0], [1], [0, 0, 1, 1], [], []>} : vector<12x8xf32>, vector<8x12xf32>, vector<12x12xf32> -> vector<12x12xf32>
    %cst_188 = arith.constant 0.353553385 : f32
    %409 = vector.broadcast %cst_188 : f32 to vector<12x12xf32>
    %410 = arith.mulf %408, %409 : vector<12x12xf32>
    %411 = arith.addf %410, %365 : vector<12x12xf32>
    %cst_189 = arith.constant dense<0xFF800000> : vector<12xf32>
    %412 = vector.multi_reduction <maximumf>, %411, %cst_189 [1] : vector<12x12xf32> to vector<12xf32>
    %413 = vector.shape_cast %412 : vector<12xf32> to vector<12x1xf32>
    %414 = vector.broadcast %413 : vector<12x1xf32> to vector<12x12xf32>
    %415 = arith.subf %411, %414 : vector<12x12xf32>
    %416 = math.exp %415 : vector<12x12xf32>
    %cst_190 = arith.constant dense<0.000000e+00> : vector<12xf32>
    %417 = vector.multi_reduction <add>, %416, %cst_190 [1] : vector<12x12xf32> to vector<12xf32>
    %418 = vector.shape_cast %417 : vector<12xf32> to vector<12x1xf32>
    %419 = tpu.reciprocal %418 {approx = true} : vector<12x1xf32> -> vector<12x1xf32>
    %cst_191 = arith.constant dense<0.000000e+00> : vector<12x8xf32>
    %420 = tpu.matmul %416, %406, %cst_191 {dimension_numbers = #tpu.dot_dimension_numbers<[1], [0], [0], [1], [0, 0, 1, 1], [], []>} : vector<12x12xf32>, vector<12x8xf32>, vector<12x8xf32> -> vector<12x8xf32>
    %421 = vector.broadcast %419 : vector<12x1xf32> to vector<12x8xf32>
    %422 = arith.mulf %420, %421 : vector<12x8xf32>
    %423 = vector.extract_strided_slice %353 {offsets = [0, 24], sizes = [12, 8], strides = [1, 1]} : vector<12x32xf32> to vector<12x8xf32>
    %424 = vector.extract_strided_slice %354 {offsets = [0, 24], sizes = [12, 8], strides = [1, 1]} : vector<12x32xf32> to vector<12x8xf32>
    %425 = vector.extract_strided_slice %355 {offsets = [0, 24], sizes = [12, 8], strides = [1, 1]} : vector<12x32xf32> to vector<12x8xf32>
    %426 = tpu.transpose %424, [1, 0] : vector<12x8xf32> -> vector<8x12xf32>
    %cst_192 = arith.constant dense<0.000000e+00> : vector<12x12xf32>
    %427 = tpu.matmul %423, %426, %cst_192 {dimension_numbers = #tpu.dot_dimension_numbers<[1], [0], [0], [1], [0, 0, 1, 1], [], []>} : vector<12x8xf32>, vector<8x12xf32>, vector<12x12xf32> -> vector<12x12xf32>
    %cst_193 = arith.constant 0.353553385 : f32
    %428 = vector.broadcast %cst_193 : f32 to vector<12x12xf32>
    %429 = arith.mulf %427, %428 : vector<12x12xf32>
    %430 = arith.addf %429, %365 : vector<12x12xf32>
    %cst_194 = arith.constant dense<0xFF800000> : vector<12xf32>
    %431 = vector.multi_reduction <maximumf>, %430, %cst_194 [1] : vector<12x12xf32> to vector<12xf32>
    %432 = vector.shape_cast %431 : vector<12xf32> to vector<12x1xf32>
    %433 = vector.broadcast %432 : vector<12x1xf32> to vector<12x12xf32>
    %434 = arith.subf %430, %433 : vector<12x12xf32>
    %435 = math.exp %434 : vector<12x12xf32>
    %cst_195 = arith.constant dense<0.000000e+00> : vector<12xf32>
    %436 = vector.multi_reduction <add>, %435, %cst_195 [1] : vector<12x12xf32> to vector<12xf32>
    %437 = vector.shape_cast %436 : vector<12xf32> to vector<12x1xf32>
    %438 = tpu.reciprocal %437 {approx = true} : vector<12x1xf32> -> vector<12x1xf32>
    %cst_196 = arith.constant dense<0.000000e+00> : vector<12x8xf32>
    %439 = tpu.matmul %435, %425, %cst_196 {dimension_numbers = #tpu.dot_dimension_numbers<[1], [0], [0], [1], [0, 0, 1, 1], [], []>} : vector<12x12xf32>, vector<12x8xf32>, vector<12x8xf32> -> vector<12x8xf32>
    %440 = vector.broadcast %438 : vector<12x1xf32> to vector<12x8xf32>
    %441 = arith.mulf %439, %440 : vector<12x8xf32>
    %442 = tpu.concatenate %384, %403, %422, %441 in 1 : vector<12x8xf32>, vector<12x8xf32>, vector<12x8xf32>, vector<12x8xf32> -> vector<12x32xf32>
    %cst_197 = arith.constant dense<0.000000e+00> : vector<12x32xf32>
    %443 = tpu.matmul %442, %357, %cst_197 {dimension_numbers = #tpu.dot_dimension_numbers<[1], [0], [0], [1], [0, 0, 1, 1], [], []>} : vector<12x32xf32>, vector<32x32xf32>, vector<12x32xf32> -> vector<12x32xf32>
    %444 = vector.broadcast %359 : vector<1x32xf32> to vector<12x32xf32>
    %445 = arith.addf %443, %444 : vector<12x32xf32>
    %446 = arith.addf %11, %445 : vector<12x32xf32>
    %c0_198 = arith.constant 0 : index
    %c0_199 = arith.constant 0 : index
    %c0_200 = arith.constant 0 : index
    %447 = vector.load %arg28[%c0_198, %c0_199, %c0_200] : memref<1x1x32xf32, #tpu.memory_space<vmem>>, vector<1x1x32xf32>
    %448 = vector.shape_cast %447 : vector<1x1x32xf32> to vector<1x32xf32>
    %c0_201 = arith.constant 0 : index
    %c0_202 = arith.constant 0 : index
    %c0_203 = arith.constant 0 : index
    %449 = vector.load %arg29[%c0_201, %c0_202, %c0_203] : memref<1x1x32xf32, #tpu.memory_space<vmem>>, vector<1x1x32xf32>
    %450 = vector.shape_cast %449 : vector<1x1x32xf32> to vector<1x32xf32>
    %cst_204 = arith.constant dense<0.000000e+00> : vector<12xf32>
    %451 = vector.multi_reduction <add>, %446, %cst_204 [1] : vector<12x32xf32> to vector<12xf32>
    %452 = vector.shape_cast %451 : vector<12xf32> to vector<12x1xf32>
    %cst_205 = arith.constant 3.200000e+01 : f32
    %453 = vector.broadcast %cst_205 : f32 to vector<12x1xf32>
    %454 = arith.divf %452, %453 : vector<12x1xf32>
    %455 = vector.broadcast %454 : vector<12x1xf32> to vector<12x32xf32>
    %456 = arith.subf %446, %455 : vector<12x32xf32>
    %457 = arith.mulf %456, %456 : vector<12x32xf32>
    %cst_206 = arith.constant dense<0.000000e+00> : vector<12xf32>
    %458 = vector.multi_reduction <add>, %457, %cst_206 [1] : vector<12x32xf32> to vector<12xf32>
    %459 = vector.shape_cast %458 : vector<12xf32> to vector<12x1xf32>
    %cst_207 = arith.constant 3.200000e+01 : f32
    %460 = vector.broadcast %cst_207 : f32 to vector<12x1xf32>
    %461 = arith.divf %459, %460 : vector<12x1xf32>
    %cst_208 = arith.constant 9.99999974E-6 : f32
    %462 = vector.broadcast %cst_208 : f32 to vector<12x1xf32>
    %463 = arith.addf %461, %462 : vector<12x1xf32>
    %464 = math.rsqrt %463 : vector<12x1xf32>
    %465 = vector.broadcast %464 : vector<12x1xf32> to vector<12x32xf32>
    %466 = arith.mulf %456, %465 : vector<12x32xf32>
    %467 = vector.broadcast %448 : vector<1x32xf32> to vector<12x32xf32>
    %468 = arith.mulf %466, %467 : vector<12x32xf32>
    %469 = vector.broadcast %450 : vector<1x32xf32> to vector<12x32xf32>
    %470 = arith.addf %468, %469 : vector<12x32xf32>
    %c0_209 = arith.constant 0 : index
    %c0_210 = arith.constant 0 : index
    %c0_211 = arith.constant 0 : index
    %471 = vector.load %arg22[%c0_209, %c0_210, %c0_211] : memref<1x32x32xf32, #tpu.memory_space<vmem>>, vector<1x32x32xf32>
    %472 = vector.shape_cast %471 : vector<1x32x32xf32> to vector<32x32xf32>
    %cst_212 = arith.constant dense<0.000000e+00> : vector<12x32xf32>
    %473 = tpu.matmul %470, %472, %cst_212 {dimension_numbers = #tpu.dot_dimension_numbers<[1], [0], [0], [1], [0, 0, 1, 1], [], []>} : vector<12x32xf32>, vector<32x32xf32>, vector<12x32xf32> -> vector<12x32xf32>
    %c0_213 = arith.constant 0 : index
    %c0_214 = arith.constant 0 : index
    %c0_215 = arith.constant 0 : index
    %474 = vector.load %arg23[%c0_213, %c0_214, %c0_215] : memref<1x1x32xf32, #tpu.memory_space<vmem>>, vector<1x1x32xf32>
    %475 = vector.shape_cast %474 : vector<1x1x32xf32> to vector<1x32xf32>
    %476 = vector.broadcast %475 : vector<1x32xf32> to vector<12x32xf32>
    %477 = arith.addf %473, %476 : vector<12x32xf32>
    %c0_216 = arith.constant 0 : index
    %c0_217 = arith.constant 0 : index
    %c0_218 = arith.constant 0 : index
    %478 = vector.load %arg24[%c0_216, %c0_217, %c0_218] : memref<1x32x64xf32, #tpu.memory_space<vmem>>, vector<1x32x64xf32>
    %479 = vector.shape_cast %478 : vector<1x32x64xf32> to vector<32x64xf32>
    %cst_219 = arith.constant dense<0.000000e+00> : vector<8x64xf32>
    %480 = tpu.matmul %345, %479, %cst_219 {dimension_numbers = #tpu.dot_dimension_numbers<[1], [0], [0], [1], [0, 0, 1, 1], [], []>} : vector<8x32xf32>, vector<32x64xf32>, vector<8x64xf32> -> vector<8x64xf32>
    %c0_220 = arith.constant 0 : index
    %c0_221 = arith.constant 0 : index
    %c0_222 = arith.constant 0 : index
    %481 = vector.load %arg25[%c0_220, %c0_221, %c0_222] : memref<1x1x64xf32, #tpu.memory_space<vmem>>, vector<1x1x64xf32>
    %482 = vector.shape_cast %481 : vector<1x1x64xf32> to vector<1x64xf32>
    %483 = vector.broadcast %482 : vector<1x64xf32> to vector<8x64xf32>
    %484 = arith.addf %480, %483 : vector<8x64xf32>
    %485 = vector.extract_strided_slice %484 {offsets = [0, 0], sizes = [8, 32], strides = [1, 1]} : vector<8x64xf32> to vector<8x32xf32>
    %486 = vector.extract_strided_slice %484 {offsets = [0, 32], sizes = [8, 32], strides = [1, 1]} : vector<8x64xf32> to vector<8x32xf32>
    %c0_223 = arith.constant 0 : index
    %c0_224 = arith.constant 0 : index
    %c0_225 = arith.constant 0 : index
    %487 = vector.load %arg26[%c0_223, %c0_224, %c0_225] : memref<1x32x32xf32, #tpu.memory_space<vmem>>, vector<1x32x32xf32>
    %488 = vector.shape_cast %487 : vector<1x32x32xf32> to vector<32x32xf32>
    %c0_226 = arith.constant 0 : index
    %c0_227 = arith.constant 0 : index
    %c0_228 = arith.constant 0 : index
    %489 = vector.load %arg27[%c0_226, %c0_227, %c0_228] : memref<1x1x32xf32, #tpu.memory_space<vmem>>, vector<1x1x32xf32>
    %490 = vector.shape_cast %489 : vector<1x1x32xf32> to vector<1x32xf32>
    %491 = vector.extract_strided_slice %477 {offsets = [0, 0], sizes = [12, 8], strides = [1, 1]} : vector<12x32xf32> to vector<12x8xf32>
    %492 = vector.extract_strided_slice %485 {offsets = [0, 0], sizes = [8, 8], strides = [1, 1]} : vector<8x32xf32> to vector<8x8xf32>
    %493 = vector.extract_strided_slice %486 {offsets = [0, 0], sizes = [8, 8], strides = [1, 1]} : vector<8x32xf32> to vector<8x8xf32>
    %494 = tpu.transpose %492, [1, 0] : vector<8x8xf32> -> vector<8x8xf32>
    %cst_229 = arith.constant dense<0.000000e+00> : vector<12x8xf32>
    %495 = tpu.matmul %491, %494, %cst_229 {dimension_numbers = #tpu.dot_dimension_numbers<[1], [0], [0], [1], [0, 0, 1, 1], [], []>} : vector<12x8xf32>, vector<8x8xf32>, vector<12x8xf32> -> vector<12x8xf32>
    %cst_230 = arith.constant 0.353553385 : f32
    %496 = vector.broadcast %cst_230 : f32 to vector<12x8xf32>
    %497 = arith.mulf %495, %496 : vector<12x8xf32>
    %cst_231 = arith.constant dense<0xFF800000> : vector<12xf32>
    %498 = vector.multi_reduction <maximumf>, %497, %cst_231 [1] : vector<12x8xf32> to vector<12xf32>
    %499 = vector.shape_cast %498 : vector<12xf32> to vector<12x1xf32>
    %500 = vector.broadcast %499 : vector<12x1xf32> to vector<12x8xf32>
    %501 = arith.subf %497, %500 : vector<12x8xf32>
    %502 = math.exp %501 : vector<12x8xf32>
    %cst_232 = arith.constant dense<0.000000e+00> : vector<12xf32>
    %503 = vector.multi_reduction <add>, %502, %cst_232 [1] : vector<12x8xf32> to vector<12xf32>
    %504 = vector.shape_cast %503 : vector<12xf32> to vector<12x1xf32>
    %505 = tpu.reciprocal %504 {approx = true} : vector<12x1xf32> -> vector<12x1xf32>
    %cst_233 = arith.constant dense<0.000000e+00> : vector<12x8xf32>
    %506 = tpu.matmul %502, %493, %cst_233 {dimension_numbers = #tpu.dot_dimension_numbers<[1], [0], [0], [1], [0, 0, 1, 1], [], []>} : vector<12x8xf32>, vector<8x8xf32>, vector<12x8xf32> -> vector<12x8xf32>
    %507 = vector.broadcast %505 : vector<12x1xf32> to vector<12x8xf32>
    %508 = arith.mulf %506, %507 : vector<12x8xf32>
    %509 = vector.extract_strided_slice %477 {offsets = [0, 8], sizes = [12, 8], strides = [1, 1]} : vector<12x32xf32> to vector<12x8xf32>
    %510 = vector.extract_strided_slice %485 {offsets = [0, 8], sizes = [8, 8], strides = [1, 1]} : vector<8x32xf32> to vector<8x8xf32>
    %511 = vector.extract_strided_slice %486 {offsets = [0, 8], sizes = [8, 8], strides = [1, 1]} : vector<8x32xf32> to vector<8x8xf32>
    %512 = tpu.transpose %510, [1, 0] : vector<8x8xf32> -> vector<8x8xf32>
    %cst_234 = arith.constant dense<0.000000e+00> : vector<12x8xf32>
    %513 = tpu.matmul %509, %512, %cst_234 {dimension_numbers = #tpu.dot_dimension_numbers<[1], [0], [0], [1], [0, 0, 1, 1], [], []>} : vector<12x8xf32>, vector<8x8xf32>, vector<12x8xf32> -> vector<12x8xf32>
    %cst_235 = arith.constant 0.353553385 : f32
    %514 = vector.broadcast %cst_235 : f32 to vector<12x8xf32>
    %515 = arith.mulf %513, %514 : vector<12x8xf32>
    %cst_236 = arith.constant dense<0xFF800000> : vector<12xf32>
    %516 = vector.multi_reduction <maximumf>, %515, %cst_236 [1] : vector<12x8xf32> to vector<12xf32>
    %517 = vector.shape_cast %516 : vector<12xf32> to vector<12x1xf32>
    %518 = vector.broadcast %517 : vector<12x1xf32> to vector<12x8xf32>
    %519 = arith.subf %515, %518 : vector<12x8xf32>
    %520 = math.exp %519 : vector<12x8xf32>
    %cst_237 = arith.constant dense<0.000000e+00> : vector<12xf32>
    %521 = vector.multi_reduction <add>, %520, %cst_237 [1] : vector<12x8xf32> to vector<12xf32>
    %522 = vector.shape_cast %521 : vector<12xf32> to vector<12x1xf32>
    %523 = tpu.reciprocal %522 {approx = true} : vector<12x1xf32> -> vector<12x1xf32>
    %cst_238 = arith.constant dense<0.000000e+00> : vector<12x8xf32>
    %524 = tpu.matmul %520, %511, %cst_238 {dimension_numbers = #tpu.dot_dimension_numbers<[1], [0], [0], [1], [0, 0, 1, 1], [], []>} : vector<12x8xf32>, vector<8x8xf32>, vector<12x8xf32> -> vector<12x8xf32>
    %525 = vector.broadcast %523 : vector<12x1xf32> to vector<12x8xf32>
    %526 = arith.mulf %524, %525 : vector<12x8xf32>
    %527 = vector.extract_strided_slice %477 {offsets = [0, 16], sizes = [12, 8], strides = [1, 1]} : vector<12x32xf32> to vector<12x8xf32>
    %528 = vector.extract_strided_slice %485 {offsets = [0, 16], sizes = [8, 8], strides = [1, 1]} : vector<8x32xf32> to vector<8x8xf32>
    %529 = vector.extract_strided_slice %486 {offsets = [0, 16], sizes = [8, 8], strides = [1, 1]} : vector<8x32xf32> to vector<8x8xf32>
    %530 = tpu.transpose %528, [1, 0] : vector<8x8xf32> -> vector<8x8xf32>
    %cst_239 = arith.constant dense<0.000000e+00> : vector<12x8xf32>
    %531 = tpu.matmul %527, %530, %cst_239 {dimension_numbers = #tpu.dot_dimension_numbers<[1], [0], [0], [1], [0, 0, 1, 1], [], []>} : vector<12x8xf32>, vector<8x8xf32>, vector<12x8xf32> -> vector<12x8xf32>
    %cst_240 = arith.constant 0.353553385 : f32
    %532 = vector.broadcast %cst_240 : f32 to vector<12x8xf32>
    %533 = arith.mulf %531, %532 : vector<12x8xf32>
    %cst_241 = arith.constant dense<0xFF800000> : vector<12xf32>
    %534 = vector.multi_reduction <maximumf>, %533, %cst_241 [1] : vector<12x8xf32> to vector<12xf32>
    %535 = vector.shape_cast %534 : vector<12xf32> to vector<12x1xf32>
    %536 = vector.broadcast %535 : vector<12x1xf32> to vector<12x8xf32>
    %537 = arith.subf %533, %536 : vector<12x8xf32>
    %538 = math.exp %537 : vector<12x8xf32>
    %cst_242 = arith.constant dense<0.000000e+00> : vector<12xf32>
    %539 = vector.multi_reduction <add>, %538, %cst_242 [1] : vector<12x8xf32> to vector<12xf32>
    %540 = vector.shape_cast %539 : vector<12xf32> to vector<12x1xf32>
    %541 = tpu.reciprocal %540 {approx = true} : vector<12x1xf32> -> vector<12x1xf32>
    %cst_243 = arith.constant dense<0.000000e+00> : vector<12x8xf32>
    %542 = tpu.matmul %538, %529, %cst_243 {dimension_numbers = #tpu.dot_dimension_numbers<[1], [0], [0], [1], [0, 0, 1, 1], [], []>} : vector<12x8xf32>, vector<8x8xf32>, vector<12x8xf32> -> vector<12x8xf32>
    %543 = vector.broadcast %541 : vector<12x1xf32> to vector<12x8xf32>
    %544 = arith.mulf %542, %543 : vector<12x8xf32>
    %545 = vector.extract_strided_slice %477 {offsets = [0, 24], sizes = [12, 8], strides = [1, 1]} : vector<12x32xf32> to vector<12x8xf32>
    %546 = vector.extract_strided_slice %485 {offsets = [0, 24], sizes = [8, 8], strides = [1, 1]} : vector<8x32xf32> to vector<8x8xf32>
    %547 = vector.extract_strided_slice %486 {offsets = [0, 24], sizes = [8, 8], strides = [1, 1]} : vector<8x32xf32> to vector<8x8xf32>
    %548 = tpu.transpose %546, [1, 0] : vector<8x8xf32> -> vector<8x8xf32>
    %cst_244 = arith.constant dense<0.000000e+00> : vector<12x8xf32>
    %549 = tpu.matmul %545, %548, %cst_244 {dimension_numbers = #tpu.dot_dimension_numbers<[1], [0], [0], [1], [0, 0, 1, 1], [], []>} : vector<12x8xf32>, vector<8x8xf32>, vector<12x8xf32> -> vector<12x8xf32>
    %cst_245 = arith.constant 0.353553385 : f32
    %550 = vector.broadcast %cst_245 : f32 to vector<12x8xf32>
    %551 = arith.mulf %549, %550 : vector<12x8xf32>
    %cst_246 = arith.constant dense<0xFF800000> : vector<12xf32>
    %552 = vector.multi_reduction <maximumf>, %551, %cst_246 [1] : vector<12x8xf32> to vector<12xf32>
    %553 = vector.shape_cast %552 : vector<12xf32> to vector<12x1xf32>
    %554 = vector.broadcast %553 : vector<12x1xf32> to vector<12x8xf32>
    %555 = arith.subf %551, %554 : vector<12x8xf32>
    %556 = math.exp %555 : vector<12x8xf32>
    %cst_247 = arith.constant dense<0.000000e+00> : vector<12xf32>
    %557 = vector.multi_reduction <add>, %556, %cst_247 [1] : vector<12x8xf32> to vector<12xf32>
    %558 = vector.shape_cast %557 : vector<12xf32> to vector<12x1xf32>
    %559 = tpu.reciprocal %558 {approx = true} : vector<12x1xf32> -> vector<12x1xf32>
    %cst_248 = arith.constant dense<0.000000e+00> : vector<12x8xf32>
    %560 = tpu.matmul %556, %547, %cst_248 {dimension_numbers = #tpu.dot_dimension_numbers<[1], [0], [0], [1], [0, 0, 1, 1], [], []>} : vector<12x8xf32>, vector<8x8xf32>, vector<12x8xf32> -> vector<12x8xf32>
    %561 = vector.broadcast %559 : vector<12x1xf32> to vector<12x8xf32>
    %562 = arith.mulf %560, %561 : vector<12x8xf32>
    %563 = tpu.concatenate %508, %526, %544, %562 in 1 : vector<12x8xf32>, vector<12x8xf32>, vector<12x8xf32>, vector<12x8xf32> -> vector<12x32xf32>
    %cst_249 = arith.constant dense<0.000000e+00> : vector<12x32xf32>
    %564 = tpu.matmul %563, %488, %cst_249 {dimension_numbers = #tpu.dot_dimension_numbers<[1], [0], [0], [1], [0, 0, 1, 1], [], []>} : vector<12x32xf32>, vector<32x32xf32>, vector<12x32xf32> -> vector<12x32xf32>
    %565 = vector.broadcast %490 : vector<1x32xf32> to vector<12x32xf32>
    %566 = arith.addf %564, %565 : vector<12x32xf32>
    %567 = arith.addf %470, %566 : vector<12x32xf32>
    %c0_250 = arith.constant 0 : index
    %c0_251 = arith.constant 0 : index
    %c0_252 = arith.constant 0 : index
    %568 = vector.load %arg30[%c0_250, %c0_251, %c0_252] : memref<1x1x32xf32, #tpu.memory_space<vmem>>, vector<1x1x32xf32>
    %569 = vector.shape_cast %568 : vector<1x1x32xf32> to vector<1x32xf32>
    %c0_253 = arith.constant 0 : index
    %c0_254 = arith.constant 0 : index
    %c0_255 = arith.constant 0 : index
    %570 = vector.load %arg31[%c0_253, %c0_254, %c0_255] : memref<1x1x32xf32, #tpu.memory_space<vmem>>, vector<1x1x32xf32>
    %571 = vector.shape_cast %570 : vector<1x1x32xf32> to vector<1x32xf32>
    %cst_256 = arith.constant dense<0.000000e+00> : vector<12xf32>
    %572 = vector.multi_reduction <add>, %567, %cst_256 [1] : vector<12x32xf32> to vector<12xf32>
    %573 = vector.shape_cast %572 : vector<12xf32> to vector<12x1xf32>
    %cst_257 = arith.constant 3.200000e+01 : f32
    %574 = vector.broadcast %cst_257 : f32 to vector<12x1xf32>
    %575 = arith.divf %573, %574 : vector<12x1xf32>
    %576 = vector.broadcast %575 : vector<12x1xf32> to vector<12x32xf32>
    %577 = arith.subf %567, %576 : vector<12x32xf32>
    %578 = arith.mulf %577, %577 : vector<12x32xf32>
    %cst_258 = arith.constant dense<0.000000e+00> : vector<12xf32>
    %579 = vector.multi_reduction <add>, %578, %cst_258 [1] : vector<12x32xf32> to vector<12xf32>
    %580 = vector.shape_cast %579 : vector<12xf32> to vector<12x1xf32>
    %cst_259 = arith.constant 3.200000e+01 : f32
    %581 = vector.broadcast %cst_259 : f32 to vector<12x1xf32>
    %582 = arith.divf %580, %581 : vector<12x1xf32>
    %cst_260 = arith.constant 9.99999974E-6 : f32
    %583 = vector.broadcast %cst_260 : f32 to vector<12x1xf32>
    %584 = arith.addf %582, %583 : vector<12x1xf32>
    %585 = math.rsqrt %584 : vector<12x1xf32>
    %586 = vector.broadcast %585 : vector<12x1xf32> to vector<12x32xf32>
    %587 = arith.mulf %577, %586 : vector<12x32xf32>
    %588 = vector.broadcast %569 : vector<1x32xf32> to vector<12x32xf32>
    %589 = arith.mulf %587, %588 : vector<12x32xf32>
    %590 = vector.broadcast %571 : vector<1x32xf32> to vector<12x32xf32>
    %591 = arith.addf %589, %590 : vector<12x32xf32>
    %c0_261 = arith.constant 0 : index
    %c0_262 = arith.constant 0 : index
    %c0_263 = arith.constant 0 : index
    %592 = vector.load %arg32[%c0_261, %c0_262, %c0_263] : memref<1x32x64xf32, #tpu.memory_space<vmem>>, vector<1x32x64xf32>
    %593 = vector.shape_cast %592 : vector<1x32x64xf32> to vector<32x64xf32>
    %cst_264 = arith.constant dense<0.000000e+00> : vector<12x64xf32>
    %594 = tpu.matmul %591, %593, %cst_264 {dimension_numbers = #tpu.dot_dimension_numbers<[1], [0], [0], [1], [0, 0, 1, 1], [], []>} : vector<12x32xf32>, vector<32x64xf32>, vector<12x64xf32> -> vector<12x64xf32>
    %c0_265 = arith.constant 0 : index
    %c0_266 = arith.constant 0 : index
    %c0_267 = arith.constant 0 : index
    %595 = vector.load %arg33[%c0_265, %c0_266, %c0_267] : memref<1x1x64xf32, #tpu.memory_space<vmem>>, vector<1x1x64xf32>
    %596 = vector.shape_cast %595 : vector<1x1x64xf32> to vector<1x64xf32>
    %597 = vector.broadcast %596 : vector<1x64xf32> to vector<12x64xf32>
    %598 = arith.addf %594, %597 : vector<12x64xf32>
    %cst_268 = arith.constant 0.000000e+00 : f32
    %599 = vector.broadcast %cst_268 : f32 to vector<12x64xf32>
    %600 = arith.maximumf %598, %599 : vector<12x64xf32>
    %c0_269 = arith.constant 0 : index
    %c0_270 = arith.constant 0 : index
    %c0_271 = arith.constant 0 : index
    %601 = vector.load %arg34[%c0_269, %c0_270, %c0_271] : memref<1x64x32xf32, #tpu.memory_space<vmem>>, vector<1x64x32xf32>
    %602 = vector.shape_cast %601 : vector<1x64x32xf32> to vector<64x32xf32>
    %cst_272 = arith.constant dense<0.000000e+00> : vector<12x32xf32>
    %603 = tpu.matmul %600, %602, %cst_272 {dimension_numbers = #tpu.dot_dimension_numbers<[1], [0], [0], [1], [0, 0, 1, 1], [], []>} : vector<12x64xf32>, vector<64x32xf32>, vector<12x32xf32> -> vector<12x32xf32>
    %c0_273 = arith.constant 0 : index
    %c0_274 = arith.constant 0 : index
    %c0_275 = arith.constant 0 : index
    %604 = vector.load %arg35[%c0_273, %c0_274, %c0_275] : memref<1x1x32xf32, #tpu.memory_space<vmem>>, vector<1x1x32xf32>
    %605 = vector.shape_cast %604 : vector<1x1x32xf32> to vector<1x32xf32>
    %606 = vector.broadcast %605 : vector<1x32xf32> to vector<12x32xf32>
    %607 = arith.addf %603, %606 : vector<12x32xf32>
    %608 = arith.addf %591, %607 : vector<12x32xf32>
    %c0_276 = arith.constant 0 : index
    %c0_277 = arith.constant 0 : index
    %c0_278 = arith.constant 0 : index
    %609 = vector.load %arg36[%c0_276, %c0_277, %c0_278] : memref<1x1x32xf32, #tpu.memory_space<vmem>>, vector<1x1x32xf32>
    %610 = vector.shape_cast %609 : vector<1x1x32xf32> to vector<1x32xf32>
    %c0_279 = arith.constant 0 : index
    %c0_280 = arith.constant 0 : index
    %c0_281 = arith.constant 0 : index
    %611 = vector.load %arg37[%c0_279, %c0_280, %c0_281] : memref<1x1x32xf32, #tpu.memory_space<vmem>>, vector<1x1x32xf32>
    %612 = vector.shape_cast %611 : vector<1x1x32xf32> to vector<1x32xf32>
    %cst_282 = arith.constant dense<0.000000e+00> : vector<12xf32>
    %613 = vector.multi_reduction <add>, %608, %cst_282 [1] : vector<12x32xf32> to vector<12xf32>
    %614 = vector.shape_cast %613 : vector<12xf32> to vector<12x1xf32>
    %cst_283 = arith.constant 3.200000e+01 : f32
    %615 = vector.broadcast %cst_283 : f32 to vector<12x1xf32>
    %616 = arith.divf %614, %615 : vector<12x1xf32>
    %617 = vector.broadcast %616 : vector<12x1xf32> to vector<12x32xf32>
    %618 = arith.subf %608, %617 : vector<12x32xf32>
    %619 = arith.mulf %618, %618 : vector<12x32xf32>
    %cst_284 = arith.constant dense<0.000000e+00> : vector<12xf32>
    %620 = vector.multi_reduction <add>, %619, %cst_284 [1] : vector<12x32xf32> to vector<12xf32>
    %621 = vector.shape_cast %620 : vector<12xf32> to vector<12x1xf32>
    %cst_285 = arith.constant 3.200000e+01 : f32
    %622 = vector.broadcast %cst_285 : f32 to vector<12x1xf32>
    %623 = arith.divf %621, %622 : vector<12x1xf32>
    %cst_286 = arith.constant 9.99999974E-6 : f32
    %624 = vector.broadcast %cst_286 : f32 to vector<12x1xf32>
    %625 = arith.addf %623, %624 : vector<12x1xf32>
    %626 = math.rsqrt %625 : vector<12x1xf32>
    %627 = vector.broadcast %626 : vector<12x1xf32> to vector<12x32xf32>
    %628 = arith.mulf %618, %627 : vector<12x32xf32>
    %629 = vector.broadcast %610 : vector<1x32xf32> to vector<12x32xf32>
    %630 = arith.mulf %628, %629 : vector<12x32xf32>
    %631 = vector.broadcast %612 : vector<1x32xf32> to vector<12x32xf32>
    %632 = arith.addf %630, %631 : vector<12x32xf32>
    %c0_287 = arith.constant 0 : index
    %c0_288 = arith.constant 0 : index
    %633 = vector.load %arg40[%c0_287, %c0_288] : memref<1x32xf32, #tpu.memory_space<vmem>>, vector<1x32xf32>
    %c0_289 = arith.constant 0 : index
    %c0_290 = arith.constant 0 : index
    %634 = vector.load %arg41[%c0_289, %c0_290] : memref<1x32xf32, #tpu.memory_space<vmem>>, vector<1x32xf32>
    %cst_291 = arith.constant dense<0.000000e+00> : vector<12xf32>
    %635 = vector.multi_reduction <add>, %632, %cst_291 [1] : vector<12x32xf32> to vector<12xf32>
    %636 = vector.shape_cast %635 : vector<12xf32> to vector<12x1xf32>
    %cst_292 = arith.constant 3.200000e+01 : f32
    %637 = vector.broadcast %cst_292 : f32 to vector<12x1xf32>
    %638 = arith.divf %636, %637 : vector<12x1xf32>
    %639 = vector.broadcast %638 : vector<12x1xf32> to vector<12x32xf32>
    %640 = arith.subf %632, %639 : vector<12x32xf32>
    %641 = arith.mulf %640, %640 : vector<12x32xf32>
    %cst_293 = arith.constant dense<0.000000e+00> : vector<12xf32>
    %642 = vector.multi_reduction <add>, %641, %cst_293 [1] : vector<12x32xf32> to vector<12xf32>
    %643 = vector.shape_cast %642 : vector<12xf32> to vector<12x1xf32>
    %cst_294 = arith.constant 3.200000e+01 : f32
    %644 = vector.broadcast %cst_294 : f32 to vector<12x1xf32>
    %645 = arith.divf %643, %644 : vector<12x1xf32>
    %cst_295 = arith.constant 9.99999974E-6 : f32
    %646 = vector.broadcast %cst_295 : f32 to vector<12x1xf32>
    %647 = arith.addf %645, %646 : vector<12x1xf32>
    %648 = math.rsqrt %647 : vector<12x1xf32>
    %649 = vector.broadcast %648 : vector<12x1xf32> to vector<12x32xf32>
    %650 = arith.mulf %640, %649 : vector<12x32xf32>
    %651 = vector.broadcast %633 : vector<1x32xf32> to vector<12x32xf32>
    %652 = arith.mulf %650, %651 : vector<12x32xf32>
    %653 = vector.broadcast %634 : vector<1x32xf32> to vector<12x32xf32>
    %654 = arith.addf %652, %653 : vector<12x32xf32>
    %c0_296 = arith.constant 0 : index
    %c0_297 = arith.constant 0 : index
    %655 = vector.load %arg42[%c0_296, %c0_297] : memref<32x4xf32, #tpu.memory_space<vmem>>, vector<32x4xf32>
    %cst_298 = arith.constant dense<0.000000e+00> : vector<12x4xf32>
    %656 = tpu.matmul %654, %655, %cst_298 {dimension_numbers = #tpu.dot_dimension_numbers<[1], [0], [0], [1], [0, 0, 1, 1], [], []>} : vector<12x32xf32>, vector<32x4xf32>, vector<12x4xf32> -> vector<12x4xf32>
    %c0_299 = arith.constant 0 : index
    %c0_300 = arith.constant 0 : index
    %657 = vector.load %arg43[%c0_299, %c0_300] : memref<1x4xf32, #tpu.memory_space<vmem>>, vector<1x4xf32>
    %658 = vector.broadcast %657 : vector<1x4xf32> to vector<12x4xf32>
    %659 = arith.addf %656, %658 : vector<12x4xf32>
    %660 = vector.extract_strided_slice %659 {offsets = [4, 0], sizes = [8, 4], strides = [1, 1]} : vector<12x4xf32> to vector<8x4xf32>
    %c0_301 = arith.constant 0 : index
    %c0_302 = arith.constant 0 : index
    %c0_303 = arith.constant 0 : index
    %661 = vector.load %arg44[%c0_301, %c0_302, %c0_303] : memref<1x8x4xf32, #tpu.memory_space<vmem>>, vector<1x8x4xf32>
    %662 = vector.shape_cast %661 : vector<1x8x4xf32> to vector<8x4xf32>
    %663 = vector.shape_cast %660 : vector<8x4xf32> to vector<1x8x4xf32>
    tpu.vector_store %arg44[%c0_301, %c0_302, %c0_303], %663 {strides = array<i32>} : memref<1x8x4xf32, #tpu.memory_space<vmem>>, vector<1x8x4xf32>,
    return
  }
  func.func @transform_0(%arg0: i32) -> (i32, i32, i32) {
    %c0_i32 = arith.constant 0 : i32
    %c0_i32_0 = arith.constant 0 : i32
    %c0_i32_1 = arith.constant 0 : i32
    return %arg0, %c0_i32, %c0_i32_0 : i32, i32, i32
  }
  func.func @transform_1(%arg0: i32) -> (i32, i32, i32) {
    %c0_i32 = arith.constant 0 : i32
    %c0_i32_0 = arith.constant 0 : i32
    %c0_i32_1 = arith.constant 0 : i32
    return %arg0, %c0_i32, %c0_i32_0 : i32, i32, i32
  }
  func.func @transform_2(%arg0: i32) -> (i32, i32) {
    %c0_i32 = arith.constant 0 : i32
    %c0_i32_0 = arith.constant 0 : i32
    %c0_i32_1 = arith.constant 0 : i32
    return %c0_i32, %c0_i32_0 : i32, i32
  }
  func.func @transform_3(%arg0: i32) -> (i32, i32) {
    %c0_i32 = arith.constant 0 : i32
    %c0_i32_0 = arith.constant 0 : i32
    %c0_i32_1 = arith.constant 0 : i32
    return %c0_i32, %c0_i32_0 : i32, i32
  }
  func.func @transform_4(%arg0: i32) -> (i32, i32) {
    %c0_i32 = arith.constant 0 : i32
    %c0_i32_0 = arith.constant 0 : i32
    %c0_i32_1 = arith.constant 0 : i32
    return %c0_i32, %c0_i32_0 : i32, i32
  }
  func.func @transform_5(%arg0: i32) -> (i32, i32, i32) {
    %c0_i32 = arith.constant 0 : i32
    %c0_i32_0 = arith.constant 0 : i32
    %c0_i32_1 = arith.constant 0 : i32
    %c0_i32_2 = arith.constant 0 : i32
    return %c0_i32, %c0_i32_0, %c0_i32_1 : i32, i32, i32
  }
  func.func @transform_6(%arg0: i32) -> (i32, i32, i32) {
    %c0_i32 = arith.constant 0 : i32
    %c0_i32_0 = arith.constant 0 : i32
    %c0_i32_1 = arith.constant 0 : i32
    %c0_i32_2 = arith.constant 0 : i32
    return %c0_i32, %c0_i32_0, %c0_i32_1 : i32, i32, i32
  }
  func.func @transform_7(%arg0: i32) -> (i32, i32, i32) {
    %c0_i32 = arith.constant 0 : i32
    %c0_i32_0 = arith.constant 0 : i32
    %c0_i32_1 = arith.constant 0 : i32
    %c0_i32_2 = arith.constant 0 : i32
    return %c0_i32, %c0_i32_0, %c0_i32_1 : i32, i32, i32
  }
  func.func @transform_8(%arg0: i32) -> (i32, i32, i32) {
    %c0_i32 = arith.constant 0 : i32
    %c0_i32_0 = arith.constant 0 : i32
    %c0_i32_1 = arith.constant 0 : i32
    %c0_i32_2 = arith.constant 0 : i32
    return %c0_i32, %c0_i32_0, %c0_i32_1 : i32, i32, i32
  }
  func.func @transform_9(%arg0: i32) -> (i32, i32, i32) {
    %c0_i32 = arith.constant 0 : i32
    %c0_i32_0 = arith.constant 0 : i32
    %c0_i32_1 = arith.constant 0 : i32
    %c0_i32_2 = arith.constant 0 : i32
    return %c0_i32, %c0_i32_0, %c0_i32_1 : i32, i32, i32
  }
  func.func @transform_10(%arg0: i32) -> (i32, i32, i32) {
    %c0_i32 = arith.constant 0 : i32
    %c0_i32_0 = arith.constant 0 : i32
    %c0_i32_1 = arith.constant 0 : i32
    %c0_i32_2 = arith.constant 0 : i32
    return %c0_i32, %c0_i32_0, %c0_i32_1 : i32, i32, i32
  }
  func.func @transform_11(%arg0: i32) -> (i32, i32, i32) {
    %c0_i32 = arith.constant 0 : i32
    %c0_i32_0 = arith.constant 0 : i32
    %c0_i32_1 = arith.constant 0 : i32
    %c0_i32_2 = arith.constant 0 : i32
    return %c0_i32, %c0_i32_0, %c0_i32_1 : i32, i32, i32
  }
  func.func @transform_12(%arg0: i32) -> (i32, i32, i32) {
    %c0_i32 = arith.constant 0 : i32
    %c0_i32_0 = arith.constant 0 : i32
    %c0_i32_1 = arith.constant 0 : i32
    %c0_i32_2 = arith.constant 0 : i32
    return %c0_i32, %c0_i32_0, %c0_i32_1 : i32, i32, i32
  }
  func.func @transform_13(%arg0: i32) -> (i32, i32, i32) {
    %c0_i32 = arith.constant 0 : i32
    %c0_i32_0 = arith.constant 0 : i32
    %c0_i32_1 = arith.constant 0 : i32
    %c0_i32_2 = arith.constant 0 : i32
    return %c0_i32, %c0_i32_0, %c0_i32_1 : i32, i32, i32
  }
  func.func @transform_14(%arg0: i32) -> (i32, i32, i32) {
    %c0_i32 = arith.constant 0 : i32
    %c0_i32_0 = arith.constant 0 : i32
    %c0_i32_1 = arith.constant 0 : i32
    %c0_i32_2 = arith.constant 0 : i32
    return %c0_i32, %c0_i32_0, %c0_i32_1 : i32, i32, i32
  }
  func.func @transform_15(%arg0: i32) -> (i32, i32, i32) {
    %c0_i32 = arith.constant 0 : i32
    %c0_i32_0 = arith.constant 0 : i32
    %c0_i32_1 = arith.constant 0 : i32
    %c0_i32_2 = arith.constant 0 : i32
    return %c0_i32, %c0_i32_0, %c0_i32_1 : i32, i32, i32
  }
  func.func @transform_16(%arg0: i32) -> (i32, i32, i32) {
    %c0_i32 = arith.constant 0 : i32
    %c0_i32_0 = arith.constant 0 : i32
    %c0_i32_1 = arith.constant 0 : i32
    %c0_i32_2 = arith.constant 0 : i32
    return %c0_i32, %c0_i32_0, %c0_i32_1 : i32, i32, i32
  }
  func.func @transform_17(%arg0: i32) -> (i32, i32, i32) {
    %c0_i32 = arith.constant 0 : i32
    %c0_i32_0 = arith.constant 0 : i32
    %c0_i32_1 = arith.constant 0 : i32
    %c0_i32_2 = arith.constant 0 : i32
    return %c0_i32, %c0_i32_0, %c0_i32_1 : i32, i32, i32
  }
  func.func @transform_18(%arg0: i32) -> (i32, i32, i32) {
    %c0_i32 = arith.constant 0 : i32
    %c0_i32_0 = arith.constant 0 : i32
    %c0_i32_1 = arith.constant 0 : i32
    %c0_i32_2 = arith.constant 0 : i32
    return %c0_i32, %c0_i32_0, %c0_i32_1 : i32, i32, i32
  }
  func.func @transform_19(%arg0: i32) -> (i32, i32, i32) {
    %c0_i32 = arith.constant 0 : i32
    %c0_i32_0 = arith.constant 0 : i32
    %c0_i32_1 = arith.constant 0 : i32
    %c0_i32_2 = arith.constant 0 : i32
    return %c0_i32, %c0_i32_0, %c0_i32_1 : i32, i32, i32
  }
  func.func @transform_20(%arg0: i32) -> (i32, i32, i32) {
    %c0_i32 = arith.constant 0 : i32
    %c0_i32_0 = arith.constant 0 : i32
    %c0_i32_1 = arith.constant 0 : i32
    %c0_i32_2 = arith.constant 0 : i32
    return %c0_i32, %c0_i32_0, %c0_i32_1 : i32, i32, i32
  }
  func.func @transform_21(%arg0: i32) -> (i32, i32, i32) {
    %c0_i32 = arith.constant 0 : i32
    %c0_i32_0 = arith.constant 0 : i32
    %c0_i32_1 = arith.constant 0 : i32
    %c0_i32_2 = arith.constant 0 : i32
    return %c0_i32, %c0_i32_0, %c0_i32_1 : i32, i32, i32
  }
  func.func @transform_22(%arg0: i32) -> (i32, i32, i32) {
    %c0_i32 = arith.constant 0 : i32
    %c0_i32_0 = arith.constant 0 : i32
    %c0_i32_1 = arith.constant 0 : i32
    %c0_i32_2 = arith.constant 0 : i32
    return %c0_i32, %c0_i32_0, %c0_i32_1 : i32, i32, i32
  }
  func.func @transform_23(%arg0: i32) -> (i32, i32, i32) {
    %c0_i32 = arith.constant 0 : i32
    %c0_i32_0 = arith.constant 0 : i32
    %c0_i32_1 = arith.constant 0 : i32
    %c0_i32_2 = arith.constant 0 : i32
    return %c0_i32, %c0_i32_0, %c0_i32_1 : i32, i32, i32
  }
  func.func @transform_24(%arg0: i32) -> (i32, i32, i32) {
    %c0_i32 = arith.constant 0 : i32
    %c0_i32_0 = arith.constant 0 : i32
    %c0_i32_1 = arith.constant 0 : i32
    %c0_i32_2 = arith.constant 0 : i32
    return %c0_i32, %c0_i32_0, %c0_i32_1 : i32, i32, i32
  }
  func.func @transform_25(%arg0: i32) -> (i32, i32, i32) {
    %c0_i32 = arith.constant 0 : i32
    %c0_i32_0 = arith.constant 0 : i32
    %c0_i32_1 = arith.constant 0 : i32
    %c0_i32_2 = arith.constant 0 : i32
    return %c0_i32, %c0_i32_0, %c0_i32_1 : i32, i32, i32
  }
  func.func @transform_26(%arg0: i32) -> (i32, i32, i32) {
    %c0_i32 = arith.constant 0 : i32
    %c0_i32_0 = arith.constant 0 : i32
    %c0_i32_1 = arith.constant 0 : i32
    %c0_i32_2 = arith.constant 0 : i32
    return %c0_i32, %c0_i32_0, %c0_i32_1 : i32, i32, i32
  }
  func.func @transform_27(%arg0: i32) -> (i32, i32, i32) {
    %c0_i32 = arith.constant 0 : i32
    %c0_i32_0 = arith.constant 0 : i32
    %c0_i32_1 = arith.constant 0 : i32
    %c0_i32_2 = arith.constant 0 : i32
    return %c0_i32, %c0_i32_0, %c0_i32_1 : i32, i32, i32
  }
  func.func @transform_28(%arg0: i32) -> (i32, i32, i32) {
    %c0_i32 = arith.constant 0 : i32
    %c0_i32_0 = arith.constant 0 : i32
    %c0_i32_1 = arith.constant 0 : i32
    %c0_i32_2 = arith.constant 0 : i32
    return %c0_i32, %c0_i32_0, %c0_i32_1 : i32, i32, i32
  }
  func.func @transform_29(%arg0: i32) -> (i32, i32, i32) {
    %c0_i32 = arith.constant 0 : i32
    %c0_i32_0 = arith.constant 0 : i32
    %c0_i32_1 = arith.constant 0 : i32
    %c0_i32_2 = arith.constant 0 : i32
    return %c0_i32, %c0_i32_0, %c0_i32_1 : i32, i32, i32
  }
  func.func @transform_30(%arg0: i32) -> (i32, i32, i32) {
    %c0_i32 = arith.constant 0 : i32
    %c0_i32_0 = arith.constant 0 : i32
    %c0_i32_1 = arith.constant 0 : i32
    %c0_i32_2 = arith.constant 0 : i32
    return %c0_i32, %c0_i32_0, %c0_i32_1 : i32, i32, i32
  }
  func.func @transform_31(%arg0: i32) -> (i32, i32, i32) {
    %c0_i32 = arith.constant 0 : i32
    %c0_i32_0 = arith.constant 0 : i32
    %c0_i32_1 = arith.constant 0 : i32
    %c0_i32_2 = arith.constant 0 : i32
    return %c0_i32, %c0_i32_0, %c0_i32_1 : i32, i32, i32
  }
  func.func @transform_32(%arg0: i32) -> (i32, i32, i32) {
    %c0_i32 = arith.constant 0 : i32
    %c0_i32_0 = arith.constant 0 : i32
    %c0_i32_1 = arith.constant 0 : i32
    %c0_i32_2 = arith.constant 0 : i32
    return %c0_i32, %c0_i32_0, %c0_i32_1 : i32, i32, i32
  }
  func.func @transform_33(%arg0: i32) -> (i32, i32, i32) {
    %c0_i32 = arith.constant 0 : i32
    %c0_i32_0 = arith.constant 0 : i32
    %c0_i32_1 = arith.constant 0 : i32
    %c0_i32_2 = arith.constant 0 : i32
    return %c0_i32, %c0_i32_0, %c0_i32_1 : i32, i32, i32
  }
  func.func @transform_34(%arg0: i32) -> (i32, i32, i32) {
    %c0_i32 = arith.constant 0 : i32
    %c0_i32_0 = arith.constant 0 : i32
    %c0_i32_1 = arith.constant 0 : i32
    %c0_i32_2 = arith.constant 0 : i32
    return %c0_i32, %c0_i32_0, %c0_i32_1 : i32, i32, i32
  }
  func.func @transform_35(%arg0: i32) -> (i32, i32, i32) {
    %c0_i32 = arith.constant 0 : i32
    %c0_i32_0 = arith.constant 0 : i32
    %c0_i32_1 = arith.constant 0 : i32
    %c0_i32_2 = arith.constant 0 : i32
    return %c0_i32, %c0_i32_0, %c0_i32_1 : i32, i32, i32
  }
  func.func @transform_36(%arg0: i32) -> (i32, i32, i32) {
    %c0_i32 = arith.constant 0 : i32
    %c0_i32_0 = arith.constant 0 : i32
    %c0_i32_1 = arith.constant 0 : i32
    %c0_i32_2 = arith.constant 0 : i32
    return %c0_i32, %c0_i32_0, %c0_i32_1 : i32, i32, i32
  }
  func.func @transform_37(%arg0: i32) -> (i32, i32) {
    %c0_i32 = arith.constant 0 : i32
    %c0_i32_0 = arith.constant 0 : i32
    %c0_i32_1 = arith.constant 0 : i32
    return %c0_i32, %c0_i32_0 : i32, i32
  }
  func.func @transform_38(%arg0: i32) -> (i32, i32) {
    %c0_i32 = arith.constant 0 : i32
    %c0_i32_0 = arith.constant 0 : i32
    %c0_i32_1 = arith.constant 0 : i32
    return %c0_i32, %c0_i32_0 : i32, i32
  }
  func.func @transform_39(%arg0: i32) -> (i32, i32) {
    %c0_i32 = arith.constant 0 : i32
    %c0_i32_0 = arith.constant 0 : i32
    %c0_i32_1 = arith.constant 0 : i32
    return %c0_i32, %c0_i32_0 : i32, i32
  }
  func.func @transform_40(%arg0: i32) -> (i32, i32) {
    %c0_i32 = arith.constant 0 : i32
    %c0_i32_0 = arith.constant 0 : i32
    %c0_i32_1 = arith.constant 0 : i32
    return %c0_i32, %c0_i32_0 : i32, i32
  }
  func.func @transform_41(%arg0: i32) -> (i32, i32) {
    %c0_i32 = arith.constant 0 : i32
    %c0_i32_0 = arith.constant 0 : i32
    %c0_i32_1 = arith.constant 0 : i32
    return %c0_i32, %c0_i32_0 : i32, i32
  }
  func.func @transform_42(%arg0: i32) -> (i32, i32) {
    %c0_i32 = arith.constant 0 : i32
    %c0_i32_0 = arith.constant 0 : i32
    %c0_i32_1 = arith.constant 0 : i32
    return %c0_i32, %c0_i32_0 : i32, i32
  }
  func.func @transform_43(%arg0: i32) -> (i32, i32, i32) {
    %c0_i32 = arith.constant 0 : i32
    %c0_i32_0 = arith.constant 0 : i32
    %c0_i32_1 = arith.constant 0 : i32
    return %arg0, %c0_i32, %c0_i32_0 : i32, i32, i32
  }
}

</mosaic_0001>

<bundles_post_ra>
// kernel: run.1
= control target key start
LH: loop header
LB: loop body
LE: loop exit
PB: predicated region body
PF: predicated region fallthrough
CT: control target
= control target key end

     0   :  { %s7406_s6 = smov 1   ;;  %s7407_s10 = smov 2   ;;  %s8385_s0 = inlined_call_operand.smem [shape: u32[44], index: -1, kind: input, shape index: {}] }
   0x1   :  { %s7474_s5 = sld [smem:[%s8385_s0]]   ;;  %s7408_s14 = smov 3  }
   0x2   :  { %s7479_s9 = sld [smem:[%s8385_s0 + %s7406_s6]]   ;;  %s7409_s18 = smov 4  }
   0x3   :  { %s7484_s13 = sld [smem:[%s8385_s0 + %s7407_s10]]   ;;  %s7410_s22 = smov 5  }
   0x4   :  { %s7489_s17 = sld [smem:[%s8385_s0 + %s7408_s14]]   ;;  %s7411_s26 = smov 6  }
   0x5   :  { %s7494_s21 = sld [smem:[%s8385_s0 + %s7409_s18]]   ;;  %s7412_s30 = smov 7  }
   0x6   :  { %s7499_s25 = sld [smem:[%s8385_s0 + %s7410_s22]]   ;;  %s7413_s4 = smov 8  }
   0x7   :  { %8434 = sst [smem:[#allocation5_spill]] %s7474_s5  ;;  %s7414_s10 = smov 9  }
   0x8   :  { %8435 = sst [smem:[#allocation6_spill]] %s7479_s9  ;;  %s7415_s15 = smov 10  }
   0x9   :  { %8436 = sst [smem:[#allocation7_spill]] %s7484_s13  ;;  %s7416_s20 = smov 11  }
   0xa   :  { %s7504_s29 = sld [smem:[%s8385_s0 + %s7411_s26]]   ;;  %s7417_s26 = smov 12  }
   0xb   :  { %s7509_s3 = sld [smem:[%s8385_s0 + %s7412_s30]]   ;;  %s7418_s1 = smov 13  }
   0xc   :  { %s7514_s8 = sld [smem:[%s8385_s0 + %s7413_s4]]   ;;  %s7419_s7 = smov 14  }
   0xd   :  { %s7519_s14 = sld [smem:[%s8385_s0 + %s7414_s10]]   ;;  %s7421_s22 = smov 16  }
   0xe   :  { %s7524_s19 = sld [smem:[%s8385_s0 + %s7415_s15]]   ;;  %s7420_s15 = smov 15  }
   0xf   :  { %s7529_s24 = sld [smem:[%s8385_s0 + %s7416_s20]]   ;;  %s7422_s28 = smov 17  }
  0x10   :  { %s7534_s30 = sld [smem:[%s8385_s0 + %s7417_s26]]  }
  0x11   :  { %8437 = sst [smem:[#allocation8_spill]] %s7509_s3 }
  0x12   :  { %8438 = sst [smem:[#allocation9_spill]] %s7514_s8 }
  0x13   :  { %8439 = sst [smem:[#allocation10_spill]] %s7519_s14 }
  0x14   :  { %s7539_s6 = sld [smem:[%s8385_s0 + %s7418_s1]]  }
  0x15   :  { %s7544_s12 = sld [smem:[%s8385_s0 + %s7419_s7]]   ;;  %s7423_s7 = smov 18  }
  0x16   :  { %s7549_s20 = sld [smem:[%s8385_s0 + %s7420_s15]]   ;;  %s7424_s15 = smov 19  }
  0x17   :  { %s7554_s27 = sld [smem:[%s8385_s0 + %s7421_s22]]   ;;  %s7425_s22 = smov 20  }
  0x18   :  { %s7559_s4 = sld [smem:[%s8385_s0 + %s7422_s28]]   ;;  %s7426_s28 = smov 21  }
  0x1a   :  { %8440 = sst [smem:[#allocation11_spill]] %s7539_s6 }
  0x1b   :  { %8441 = sst [smem:[#allocation12_spill]] %s7544_s12 }
  0x1c   :  { %8442 = sst [smem:[#allocation13_spill]] %s7549_s20 }
  0x1d   :  { %8443 = sst [smem:[#allocation14_spill]] %s7554_s27 }
  0x1e   :  { %8444 = sst [smem:[#allocation15_spill]] %s7559_s4 }
  0x1f   :  { %s7564_s12 = sld [smem:[%s8385_s0 + %s7423_s7]]   ;;  %s7427_s7 = smov 22  }
  0x20   :  { %s7569_s20 = sld [smem:[%s8385_s0 + %s7424_s15]]   ;;  %s7428_s15 = smov 23  }
  0x21   :  { %s7574_s27 = sld [smem:[%s8385_s0 + %s7425_s22]]   ;;  %s7429_s22 = smov 24  }
  0x22   :  { %s7579_s4 = sld [smem:[%s8385_s0 + %s7426_s28]]   ;;  %s7430_s28 = smov 25  }
  0x25   :  { %8445 = sst [smem:[#allocation16_spill]] %s7564_s12 }
  0x26   :  { %8446 = sst [smem:[#allocation17_spill]] %s7569_s20 }
  0x27   :  { %8447 = sst [smem:[#allocation18_spill]] %s7574_s27 }
  0x28   :  { %8448 = sst [smem:[#allocation19_spill]] %s7579_s4 }
  0x29   :  { %s7584_s12 = sld [smem:[%s8385_s0 + %s7427_s7]]   ;;  %s7431_s7 = smov 26  }
  0x2a   :  { %s7589_s20 = sld [smem:[%s8385_s0 + %s7428_s15]]   ;;  %s7432_s15 = smov 27  }
  0x2b   :  { %s7594_s27 = sld [smem:[%s8385_s0 + %s7429_s22]]   ;;  %s7433_s22 = smov 28  }
  0x2c   :  { %s7599_s4 = sld [smem:[%s8385_s0 + %s7430_s28]]   ;;  %s7434_s28 = smov 29  }
  0x2f   :  { %8449 = sst [smem:[#allocation20_spill]] %s7584_s12 }
  0x30   :  { %8450 = sst [smem:[#allocation21_spill]] %s7589_s20 }
  0x31   :  { %8451 = sst [smem:[#allocation22_spill]] %s7594_s27 }
  0x32   :  { %8452 = sst [smem:[#allocation23_spill]] %s7599_s4 }
  0x33   :  { %s7604_s12 = sld [smem:[%s8385_s0 + %s7431_s7]]   ;;  %s7435_s7 = smov 30  }
  0x34   :  { %s7609_s20 = sld [smem:[%s8385_s0 + %s7432_s15]]   ;;  %s7436_s15 = smov 31  }
  0x35   :  { %s7614_s27 = sld [smem:[%s8385_s0 + %s7433_s22]]   ;;  %s7437_s22 = smov 32  }
  0x36   :  { %s7619_s4 = sld [smem:[%s8385_s0 + %s7434_s28]]   ;;  %s7438_s28 = smov 33  }
  0x39   :  { %8453 = sst [smem:[#allocation24_spill]] %s7604_s12 }
  0x3a   :  { %8454 = sst [smem:[#allocation25_spill]] %s7609_s20 }
  0x3b   :  { %8455 = sst [smem:[#allocation26_spill]] %s7614_s27 }
  0x3c   :  { %8456 = sst [smem:[#allocation27_spill]] %s7619_s4 }
  0x3d   :  { %s7624_s12 = sld [smem:[%s8385_s0 + %s7435_s7]]   ;;  %s7439_s7 = smov 34  }
  0x3e   :  { %s7629_s20 = sld [smem:[%s8385_s0 + %s7436_s15]]   ;;  %s7440_s15 = smov 35  }
  0x3f   :  { %s7634_s27 = sld [smem:[%s8385_s0 + %s7437_s22]]   ;;  %s7441_s22 = smov 36  }
  0x40   :  { %s7639_s4 = sld [smem:[%s8385_s0 + %s7438_s28]]   ;;  %s7442_s28 = smov 37  }
  0x43   :  { %8457 = sst [smem:[#allocation28_spill]] %s7624_s12 }
  0x44   :  { %8458 = sst [smem:[#allocation29_spill]] %s7629_s20 }
  0x45   :  { %8459 = sst [smem:[#allocation30_spill]] %s7634_s27 }
  0x46   :  { %8460 = sst [smem:[#allocation31_spill]] %s7639_s4 }
  0x47   :  { %s7644_s12 = sld [smem:[%s8385_s0 + %s7439_s7]]   ;;  %s7443_s7 = smov 38  }
  0x48   :  { %s7649_s20 = sld [smem:[%s8385_s0 + %s7440_s15]]   ;;  %s7444_s15 = smov 39  }
  0x49   :  { %s7654_s27 = sld [smem:[%s8385_s0 + %s7441_s22]]   ;;  %s7445_s22 = smov 40  }
  0x4a   :  { %s7659_s4 = sld [smem:[%s8385_s0 + %s7442_s28]]   ;;  %s7446_s28 = smov 41  }
  0x4d   :  { %8461 = sst [smem:[#allocation32_spill]] %s7644_s12 }
  0x4e   :  { %8462 = sst [smem:[#allocation33_spill]] %s7649_s20 }
  0x4f   :  { %8463 = sst [smem:[#allocation34_spill]] %s7654_s27 }
  0x50   :  { %8464 = sst [smem:[#allocation35_spill]] %s7659_s4 }
  0x51   :  { %s7664_s12 = sld [smem:[%s8385_s0 + %s7443_s7]]   ;;  %s7447_s7 = smov 42  }
  0x52   :  { %s7669_s20 = sld [smem:[%s8385_s0 + %s7444_s15]]   ;;  %s7448_s15 = smov 43  }
  0x53   :  { %s7674_s27 = sld [smem:[%s8385_s0 + %s7445_s22]]  }
  0x54   :  { %s7679_s4 = sld [smem:[%s8385_s0 + %s7446_s28]]  }
  0x57   :  { %8465 = sst [smem:[#allocation36_spill]] %s7664_s12 }
  0x58   :  { %8466 = sst [smem:[#allocation37_spill]] %s7669_s20 }
  0x59   :  { %s7684_s12 = sld [smem:[%s8385_s0 + %s7447_s7]]  }
  0x5a   :  { %s7689_s20 = sld [smem:[%s8385_s0 + %s7448_s15]]  }
  0x5f   :  { %8467 = sst [smem:[#allocation38_spill]] %s7684_s12 }
  0x60   :  { %92 = vsyncpa [#allocation3], 0  ;;  %s7691_s22 = smov 0  }
  0x61 LB: > { %s8468_s14 = sld [smem:[#allocation10_spill]]  ;;  %s7697_s23 = sadd.s32 4294967295, %s7404_s22   ;;  %s7404_s22 = sphi %s7691_s22, %s98_s22  }
  0x62   : > { %s8469_s13 = sld [smem:[#allocation7_spill]]  ;;  %p6410_p0 = scmp.ge.s32.totalorder %s7404_s22, 1 }
  0x63   : > { %s8470_s8 = sld [smem:[#allocation9_spill]]  ;;  %p1042_p1 = scmp.lt.s32.totalorder %s7404_s22, 3 }
  0x64   : > { %s8471_s6 = sld [smem:[#allocation11_spill]]  ;;  %p7176_p3 = scmp.eq.s32.totalorder %s7697_s23, 0 }
  0x65   : > { %s8472_s3 = sld [smem:[#allocation8_spill]]  ;;  %p7701_p2 = pnand %p6410_p0, %p1042_p1 }
  0x66   : > { %s7449_s26 = smov [#allocation2]  }
  0x67   : > { %s1175_s28 = sshll.u32 %s7449_s26, 4  ;;  %p7172_p4 = pneg %p7701_p2  ;;  %s1176_s28 = int_to_ptr.vmem [resolvable:$true] %s1175_s28 }
  0x68   : > { %s7379_s1 = scalar_lea.vmem %s1176_s28, 16  ;;  %s7386_s2 = scalar_lea.vmem %s1176_s28, 32 }
  0x69   : > { %p7173_p5 = pnand %p7176_p3, %p7172_p4  ;;  %p7380_p7 = scmp.ne.s32.totalorder %s1176_s28, %s7379_s1 }
  0x6a   : > { %p7387_p10 = scmp.lt.s32.totalorder %s1176_s28, %s1176_s28  ;;  %p7388_p11 = scmp.lt.s32.totalorder %s7386_s2, %s7379_s1 }
  0x6b   : > { %p7370_p6 = pneg %p7173_p5 }
  0x6c   : > { %p7389_p12 = por %p7388_p11, %p7387_p10 }
  0x6d   : > { %p7382_p8 = pnand %p7380_p7, %p7370_p6 }
  0x6f   : > { %p7383_p9 = pneg %p7382_p8 }
  0x71   : > { %p7390_p13 = pnand %p7389_p12, %p7383_p9 }
  0x73   : > { %7393 = shalt.err (!%p7390_p13)
}
  0x74   : > { %s8474_s12 = sld [smem:[#allocation38_spill]] }
  0x76   : > { %1203 = sbr.rel (%p7701_p2) target bundleno = 9084 (0x237c), region = 192 }
  0x7a   : > { %7175 = dma.hbm_to_vmem [thread:$0]  (!%p7173_p5), %s8474_s12, 16, %s1176_s28, [#allocation3]  }
  0x7b   : > { %7399 = dma.done.wait (%p7176_p3), [#allocation3], 16  }
  0x7c   : > { %7401 = vsyncadd (%p7176_p3), [#allocation3], 4294967280  ;;  %s8475_s5 = sld [smem:[#allocation5_spill]]  ;;  %p1310_p0 = scmp.lt.s32.totalorder %s7697_s23, 1  ;;  %v7450_v0 = vmov 0.0   ;;  %vm7451_vm0 = vmmov 0  }
  0x7d   : > { %6778 = vmatprep.subr.mxu1 %v7450_v0  ;;  %6782 = vmatprep.mubr.msk.f32.mxu1 %vm7451_vm0, %v7450_v0  ;;  %vm1334_vm1 = vcmask 1044480   ;;  %v1329_v1 = vld [vmem:[%s7489_s17 + $0x8] sm:$0x1f]  ;;  %v1328_v2 = vld [vmem:[%s7489_s17] sm:$0xff]  ;;  %vm1330_vm2 = vcmask 105472   ;;  %v1497_v4 = vld [vmem:[%s7499_s25 + $0x18] sm:$0xff] }
  0x7e   : > { %s8519_s23 = smov (!%p1310_p0, %s7697_s23), 1  ;;  %6792 = vmatprep.subr.mxu0 %v7450_v0  ;;  %6800 = vmatprep.mubr.msk.f32.mxu0 %vm7451_vm0, %v7450_v0  ;;  %v1496_v5 = vld [vmem:[%s7499_s25 + $0x10] sm:$0xff]  ;;  %v1495_v6 = vld [vmem:[%s7499_s25 + $0x8] sm:$0xff]  ;;  %s8476_s9 = sld [smem:[#allocation6_spill]]  ;;  %v1494_v7 = vld [vmem:[%s7499_s25] sm:$0xff]  ;;  %vm1505_vm3 = vcmask 261120  }
  0x7f   : > { %s8396_s7 = sshll.u32 %s8519_s23, 3  ;;  %6779 = vmatpush3.msk.msra.mxu1 %vm1334_vm1, %v1329_v1  ;;  %6793 = vmatpush3.msra.mxu0 %v1497_v4  ;;  %v7745_v8 = vld [vmem:[%s8469_s13] sm:$0xff]  ;;  %v1409_v12 = vld [vmem:[%s7494_s21 + $0x8] sm:$0x1f]  ;;  %s6583_s11 = sshll.u32 %s8519_s23, 4  ;;  %vm1587_vm4 = vcmask 64512  }
  0x80   : > { %6780 = vmatprep.subr.mxu1 %v7450_v0  ;;  %6794 = vmatprep.subr.mxu0 %v7450_v0  ;;  %v1408_v13 = vld [vmem:[%s7494_s21] sm:$0xff]  ;;  %s8419_s16 = smov 120   ;;  %s8423_s18 = smov 96   ;;  %vm2261_vm5 = vcmask 130048   ;;  %vm2263_vm6 = vcmask 195584   ;;  %vm2475_vm7 = vcmask 523264  }
  0x81   : > { %6781 = vmatpush3.msra.mxu1 %v1328_v2  ;;  %6795 = vmatpush3.msra.mxu0 %v1496_v5  ;;  %v6424_v16 = vld [vmem:[%s7504_s29] ss:$0 sm:$0xff]  ;;  %s8415_s0 = smov 80   ;;  %s8421_s26 = smov 88   ;;  %vm3931_vm8 = vcmask 1043456   ;;  %vm3902_vm11 = vcmask 93184  }
  0x82   : > { %s1313_s10 = scalar_lea.vmem %s8475_s5, %s8396_s7  ;;  %6796 = vmatprep.subr.mxu0 %v7450_v0  ;;  %6785 = vmatprep.subr.msk.mxu1 %vm1334_vm1, %v1409_v12  ;;  %s8411_s28 = smov 72   ;;  %vm3898_vm12 = vcmask 97280   ;;  %vm4750_vm13 = vcmask 257024   ;;  %vm5060_vm14 = vcmask 60416   ;;  %vm6286_vm15 = vcmask 27648  }
  0x83   : > { %v1323_v3 = vld [vmem:[%s1313_s10] sm:$0xff]  ;;  %6797 = vmatpush3.msra.mxu0 %v1495_v6  ;;  %s8413_s1 = smov 112   ;;  %s8409_s2 = smov 104  }
  0x84   : > { %6783 = vmatmul.mubr.msk.f32.vlgmr.msra.gmra.mxu1 %vm1330_vm2, %v1323_v3  ;;  %6798 = vmatprep.subr.mxu0 %v7450_v0  ;;  %s1318_s15 = scalar_lea.vmem %s8476_s9, %s6583_s11  ;;  %s8417_s10 = smov 56  }
  0x85   : > { %6799 = vmatpush3.msra.mxu0 %v1494_v7  ;;  %6786 = vmatpush3.msk.msra.mxu1 %vm1334_vm1, %v1409_v12  ;;  %v1324_v14 = vld [vmem:[%s1318_s15] sm:$0xff]  ;;  %v1325_v15 = vld [vmem:[%s1318_s15 + $0x8] sm:$0xf]  ;;  %s8407_s11 = smov 64   ;;  %s8401_s15 = smov 40  }
  0x86   : > { %6813 = vmatprep.subr.mxu0 %v7450_v0  ;;  %6787 = vmatprep.subr.mxu1 %v1408_v13  ;;  %s8397_s7 = smov 48   ;;  %s8489_s5 = smov 88  }
  0x87   : > { %6789 = vmatprep.mubr.msk.f32.mxu1 %vm1330_vm2, %v1324_v14  ;;  %6788 = vmatpush3.msra.mxu1 %v1408_v13  ;;  %s8497_s9 = sld [smem:[#allocation18_spill]] }
  0x88   : > { %6790 = vmatmul.mubr.msk.f32.vlgmr.msra.gmra.mxu1 %vm1330_vm2, %v1325_v15  ;;  %6803 = vmatprep.subr.mxu1 %v7450_v0  ;;  %s8501_s12 = sld [smem:[#allocation36_spill]] }
  0x89   : > { %6805 = vmatprep.mubr.msk.f32.mxu1 %vm7451_vm0, %v7450_v0 }
 0x144   : > { %v1404_v9 = vpop.f32.mrf.mxu1 }
 0x145   : > { %v7748_v10 = vadd.f32 %v1404_v9, %v7745_v8 }
 0x146   : > { %v6784_v11 = vpop.f32.mrf.mxu1 }
 0x147   : > { %6801 = vmatmul.mubr.msk.f32.vlgmr.msra.gmra.mxu0 %vm1505_vm3, %v7748_v10 }
 0x148   : > { %6815 = vmatprep.mubr.msk.f32.mxu0 %vm7451_vm0, %v7450_v0  ;;  %v7803_v27 = vpop.f32.mrf.mxu1 }
 0x14a   : > { %v7805_v28 = vpop.f32.mrf.mxu1 }
 0x207   : > { %v1575_v17 = vpop.f32.mrf.mxu0 }
 0x208   : > { %v7766_v18 = vadd.f32 %v6424_v16, %v1575_v17  ;;  %v1582_v16 = vld [vmem:[%s8472_s3 + $0x18] sm:$0xff]  ;;  %v1581_v17 = vld [vmem:[%s8472_s3 + $0x10] sm:$0xff] }
 0x209   : > { %v6802_v19 = vpop.f32.mrf.mxu0 }
 0x20a   : > { %1750 = vrot.lane.b32.xlu1 %v7766_v18, %s8419_s16  ;;  %1585 = vrot.lane.b32.xlu0 %v7766_v18, %s8423_s18 }
 0x20e   : > { %1918 = vrot.lane.b32.xlu1 %v7766_v18, %s8415_s0  ;;  %1752 = vrot.lane.b32.xlu0 %v7766_v18, %s8421_s26 }
 0x212   : > { %2084 = vrot.lane.b32.xlu1 %v7766_v18, %s8411_s28  ;;  %1916 = vrot.lane.b32.xlu0 %v7766_v18, %s8413_s1 }
 0x216   : > { %2082 = vrot.lane.b32.xlu0 %v7766_v18, %s8409_s2 }
 0x27c   : > { %v1751_v20 = vpop.permute.xlu1 %1750  ;;  %v1586_v21 = vpop.permute.xlu0 %1585 }
 0x27d   : > { %6804 = vmatpush3.xpose.msk.msra.mxu1 %vm1587_vm4, %v1586_v21 }
 0x27e   : > { %6808 = vmatprep.subr.mxu1 %v7450_v0 }
 0x280   : > { %6806 = vmatmul.mubr.msk.f32.vlgmr.msra.gmra.mxu1 %vm1587_vm4, %v7766_v18  ;;  %v1753_v22 = vpop.permute.xlu0 %1752  ;;  %v1919_v23 = vpop.permute.xlu1 %1918 }
 0x281   : > { %6814 = vmatpush3.xpose.msk.msra.mxu0 %vm1587_vm4, %v1753_v22  ;;  %6810 = vmatprep.mubr.msk.f32.mxu1 %vm7451_vm0, %v7450_v0 }
 0x282   : > { %6823 = vmatprep.subr.mxu0 %v7450_v0 }
 0x284   : > { %6816 = vmatmul.mubr.msk.f32.vlgmr.msra.gmra.mxu0 %vm1587_vm4, %v1751_v20  ;;  %v1917_v24 = vpop.permute.xlu0 %1916  ;;  %v2085_v25 = vpop.permute.xlu1 %2084 }
 0x285   : > { %6824 = vmatpush3.xpose.msk.msra.mxu0 %vm1587_vm4, %v1919_v23  ;;  %6825 = vmatprep.mubr.msk.f32.mxu0 %vm7451_vm0, %v7450_v0 }
 0x286   : > { %6833 = vmatprep.subr.mxu0 %v7450_v0 }
 0x288   : > { %6826 = vmatmul.mubr.msk.f32.vlgmr.msra.gmra.mxu0 %vm1587_vm4, %v1917_v24  ;;  %v2083_v26 = vpop.permute.xlu0 %2082  ;;  %v1579_v24 = vld [vmem:[%s8472_s3] sm:$0xff] }
 0x289   : > { %6834 = vmatpush3.xpose.msk.msra.mxu0 %vm1587_vm4, %v2085_v25  ;;  %6835 = vmatprep.mubr.msk.f32.mxu0 %vm7451_vm0, %v7450_v0 }
 0x28a   : > { %6843 = vmatprep.subr.mxu0 %v7450_v0 }
 0x28c   : > { %6836 = vmatmul.mubr.msk.f32.vlgmr.msra.gmra.mxu0 %vm1587_vm4, %v2083_v26 }
 0x28d   : > { %6851 = vmatprep.mubr.msk.f32.mxu0 %vm7451_vm0, %v7450_v0  ;;  %6844 = vmatpush3.msra.mxu0 %v1582_v16 }
 0x28e   : > { %6845 = vmatprep.subr.mxu0 %v7450_v0 }
 0x28f   : > { %6846 = vmatpush3.msra.mxu0 %v1581_v17 }
 0x290   : > { %6847 = vmatprep.subr.mxu0 %v7450_v0 }
 0x340   : > { %v1658_v29 = vpop.f32.mrf.mxu1 }
 0x341   : > { %v1662_v30 = vmul.f32 0.35355338, %v1658_v29 }
 0x342   : > { %v6807_v31 = vpop.f32.mrf.mxu1 }
 0x343   : > { %v1663_v32 = vsel %vm1587_vm4, %v1662_v30, -inf }
 0x344   : > { %v1824_v33 = vpop.f32.mrf.mxu0  ;;  %1664 = vmax.xlane.f32.xlu1 %v1663_v32 }
 0x345   : > { %v1828_v34 = vmul.f32 0.35355338, %v1824_v33 }
 0x346   : > { %v6817_v35 = vpop.f32.mrf.mxu0 }
 0x347   : > { %v1829_v36 = vsel %vm1587_vm4, %v1828_v34, -inf }
 0x348   : > { %1830 = vmax.xlane.f32.xlu0 %v1829_v36  ;;  %v1990_v37 = vpop.f32.mrf.mxu0 }
 0x349   : > { %v1994_v38 = vmul.f32 0.35355338, %v1990_v37 }
 0x34a   : > { %v6827_v39 = vpop.f32.mrf.mxu0 }
 0x34b   : > { %v1995_v40 = vsel %vm1587_vm4, %v1994_v38, -inf }
 0x34c   : > { %1996 = vmax.xlane.f32.xlu0 %v1995_v40  ;;  %v2156_v41 = vpop.f32.mrf.mxu0  ;;  %v6438_v40 = vld [vmem:[%s8470_s8] ss:$0 sm:$0xff] }
 0x34d   : > { %v2160_v43 = vmul.f32 0.35355338, %v2156_v41 }
 0x34e   : > { %v6837_v42 = vpop.f32.mrf.mxu0 }
 0x34f   : > { %v2161_v44 = vsel %vm1587_vm4, %v2160_v43, -inf }
 0x355   : > { %1839 = vrot.lane.b32.xlu1 %v7766_v18, %s8417_s10 }
 0x362   : > { %1673 = vrot.lane.b32.xlu0 %v7766_v18, %s8407_s11  ;;  %s8479_s11 = sld [smem:[#allocation14_spill]] }
 0x366   : > { %2171 = vrot.lane.b32.xlu0 %v7766_v18, %s8401_s15  ;;  %s8403_s15 = smov 24  }
 0x379   : > { %2162 = vmax.xlane.f32.xlu1 %v2161_v44 }
 0x38a   : > { %2005 = vrot.lane.b32.xlu1 %v7766_v18, %s8397_s7  ;;  %s8399_s7 = smov 8   ;;  %v1580_v18 = vld [vmem:[%s8472_s3 + $0x8] sm:$0xff] }
 0x38b   : > { %6848 = vmatpush3.msra.mxu0 %v1580_v18 }
 0x38c   : > { %6849 = vmatprep.subr.mxu0 %v7450_v0 }
 0x38d   : > { %6850 = vmatpush3.msra.mxu0 %v1579_v24 }
 0x38e   : > { %6865 = vmatprep.subr.mxu0 %v7450_v0 }
 0x3cd   : > { %v1665_v45 = vpop.xlane.xlu1 %1664 }
 0x3ce   : > { %v1666_v46 = vsub.f32 %v1662_v30, %v1665_v45 }
 0x3d0   : > { %v1667_v47 = vmul.f32 1.442695, %v1666_v46 }
 0x3d1   : > { %v1831_v48 = vpop.xlane.xlu0 %1830  ;;  %v1840_v56 = vpop.permute.xlu1 %1839 }
 0x3d2   : > { %7246 = vpow2.f32 %v1667_v47  ;;  %v1832_v49 = vsub.f32 %v1828_v34, %v1831_v48 }
 0x3d4   : > { %v1833_v50 = vmul.f32 1.442695, %v1832_v49 }
 0x3d5   : > { %v1997_v51 = vpop.xlane.xlu0 %1996 }
 0x3d6   : > { %7248 = vpow2.f32 %v1833_v50  ;;  %v1998_v52 = vsub.f32 %v1994_v38, %v1997_v51  ;;  %v2378_v51 = vld [vmem:[%s7529_s24 + $0x18] sm:$0xff] }
 0x3d8   : > { %v1999_v53 = vmul.f32 1.442695, %v1998_v52  ;;  %v2377_v52 = vld [vmem:[%s7529_s24 + $0x10] sm:$0xff] }
 0x3d9   : > { %v1674_v54 = vpop.permute.xlu0 %1673 }
 0x3da   : > { %7250 = vpow2.f32 %v1999_v53  ;;  %6809 = vmatpush3.msra.mxu1 %v1674_v54  ;;  %v2375_v53 = vld [vmem:[%s7529_s24] sm:$0xff]  ;;  %v2467_v54 = vld [vmem:[%s8471_s6 + $0x38] sm:$0xff] }
 0x3db   : > { %6818 = vmatprep.subr.mxu1 %v7450_v0 }
 0x3dd   : > { %v2172_v3 = vpop.permute.xlu0 %2171 }
 0x3df   : > { %v7247_v55 = vpop.eup %7246 }
 0x3e0   : > { %6811 = vmatmul.mubr.msk.f32.vlgmr.msra.gmra.mxu1 %vm1587_vm4, %v7247_v55  ;;  %v1669_v61 = vsel %vm1587_vm4, %v7247_v55, 0.0  ;;  %v2466_v55 = vld [vmem:[%s8471_s6 + $0x30] sm:$0xff] }
 0x3e1   : > { %6819 = vmatpush3.msra.mxu1 %v1840_v56  ;;  %6820 = vmatprep.mubr.msk.f32.mxu1 %vm7451_vm0, %v7450_v0  ;;  %v2465_v56 = vld [vmem:[%s8471_s6 + $0x28] sm:$0xff] }
 0x3e2   : > { %6828 = vmatprep.subr.mxu1 %v7450_v0 }
 0x3e3   : > { %v7249_v57 = vpop.eup %7248 }
 0x3e4   : > { %6821 = vmatmul.mubr.msk.f32.vlgmr.msra.gmra.mxu1 %vm1587_vm4, %v7249_v57  ;;  %v1835_v58 = vsel %vm1587_vm4, %v7249_v57, 0.0  ;;  %v2464_v57 = vld [vmem:[%s8471_s6 + $0x20] sm:$0xff] }
 0x3e5   : > { %1836 = vadd.xlane.f32.xlu1 %v1835_v58  ;;  %6830 = vmatprep.mubr.msk.f32.mxu1 %vm7451_vm0, %v7450_v0  ;;  %v2463_v58 = vld [vmem:[%s8471_s6 + $0x18] sm:$0xff] }
 0x3e7   : > { %v7251_v59 = vpop.eup %7250 }
 0x3e8   : > { %v2001_v60 = vsel %vm1587_vm4, %v7251_v59, 0.0 }
 0x3e9   : > { %2002 = vadd.xlane.f32.xlu0 %v2001_v60  ;;  %1670 = vadd.xlane.f32.xlu1 %v1669_v61 }
 0x402   : > { %v2163_v62 = vpop.xlane.xlu1 %2162 }
 0x403   : > { %v2164_v63 = vsub.f32 %v2160_v43, %v2163_v62 }
 0x405   : > { %v2165_v1 = vmul.f32 1.442695, %v2164_v63  ;;  %v6440_v63 = vld [vmem:[%s8468_s14] ss:$0 sm:$0xff] }
 0x406   : > { %v2006_v2 = vpop.permute.xlu1 %2005 }
 0x407   : > { %7252 = vpow2.f32 %v2165_v1  ;;  %6829 = vmatpush3.msra.mxu1 %v2006_v2  ;;  %v6441_v2 = vld [vmem:[%s7524_s19] ss:$0 sm:$0xff] }
 0x408   : > { %6831 = vmatmul.mubr.msk.f32.vlgmr.msra.gmra.mxu1 %vm1587_vm4, %v7251_v59  ;;  %6838 = vmatprep.subr.mxu1 %v7450_v0 }
 0x409   : > { %6839 = vmatpush3.msra.mxu1 %v2172_v3  ;;  %6840 = vmatprep.mubr.msk.f32.mxu1 %vm7451_vm0, %v7450_v0 }
 0x40a   : > { %6854 = vmatprep.subr.mxu1 %v7450_v0 }
 0x414   : > { %v7253_v4 = vpop.eup %7252 }
 0x415   : > { %6841 = vmatmul.mubr.msk.f32.vlgmr.msra.gmra.mxu1 %vm1587_vm4, %v7253_v4  ;;  %v2167_v5 = vsel %vm1587_vm4, %v7253_v4, 0.0 }
 0x416   : > { %2168 = vadd.xlane.f32.xlu0 %v2167_v5  ;;  %6862 = vmatprep.mubr.msk.f32.mxu1 %vm7451_vm0, %v7450_v0  ;;  %v2462_v5 = vld [vmem:[%s8471_s6 + $0x10] sm:$0xff] }
 0x417   : > { %6855 = vmatpush3.msra.mxu1 %v2378_v51 }
 0x418   : > { %6856 = vmatprep.subr.mxu1 %v7450_v0 }
 0x419   : > { %6857 = vmatpush3.msra.mxu1 %v2377_v52 }
 0x41a   : > { %6858 = vmatprep.subr.mxu1 %v7450_v0 }
 0x46e   : > { %v1837_v6 = vpop.xlane.xlu1 %1836 }
 0x46f   : > { %7254 = vrcp.f32 %v1837_v6  ;;  %v2461_v6 = vld [vmem:[%s8471_s6 + $0x8] sm:$0xff] }
 0x472   : > { %v2003_v15 = vpop.xlane.xlu0 %2002  ;;  %v1671_v31 = vpop.xlane.xlu1 %1670 }
 0x473   : > { %7256 = vrcp.f32 %v2003_v15 }
 0x47c   : > { %v7255_v11 = vpop.eup %7254 }
 0x480   : > { %v7257_v20 = vpop.eup %7256 }
 0x49f   : > { %v2169_v19 = vpop.xlane.xlu0 %2168 }
 0x4a0   : > { %v1745_v7 = vpop.f32.mrf.mxu1  ;;  %7258 = vrcp.f32 %v2169_v19 }
 0x4a1   : > { %7260 = vrcp.f32 %v1671_v31  ;;  %v6448_v31 = vld [vmem:[%s7499_s25 + $0x20] sm:$0xff] }
 0x4a2   : > { %v6812_v9 = vpop.f32.mrf.mxu1 }
 0x4a3   : > { %v6442_v9 = vld [vmem:[%s7534_s30] ss:$0 sm:$0xff] }
 0x4a4   : > { %v1911_v12 = vpop.f32.mrf.mxu1 }
 0x4a5   : > { %v1915_v13 = vmul.f32 %v7255_v11, %v1911_v12 }
 0x4a6   : > { %v6822_v14 = vpop.f32.mrf.mxu1 }
 0x4a7   : > { %2249 = vrot.lane.b32.xlu0 %v1915_v13, %s8399_s7  ;;  %s8405_s7 = smov 16  }
 0x4ad   : > { %v7259_v25 = vpop.eup %7258 }
 0x4ae   : > { %v7261_v32 = vpop.eup %7260 }
 0x4af   : > { %v1749_v35 = vmul.f32 %v7261_v32, %v1745_v7  ;;  %v2460_v7 = vld [vmem:[%s8471_s6] sm:$0xff] }
 0x4c8   : > { %v2077_v21 = vpop.f32.mrf.mxu1 }
 0x4c9   : > { %v2081_v22 = vmul.f32 %v7257_v20, %v2077_v21 }
 0x4ca   : > { %v6832_v23 = vpop.f32.mrf.mxu1 }
 0x4cb   : > { %2253 = vrot.lane.b32.xlu1 %v2081_v22, %s8405_s7  ;;  %s8478_s7 = sld [smem:[#allocation13_spill]] }
 0x4d5   : > { %v2243_v26 = vpop.f32.mrf.mxu1 }
 0x4d6   : > { %v2247_v29 = vmul.f32 %v7259_v25, %v2243_v26  ;;  %v6451_v26 = vld [vmem:[%s7499_s25 + $0x38] sm:$0xff] }
 0x4d7   : > { %v6842_v30 = vpop.f32.mrf.mxu1 }
 0x4d8   : > { %2257 = vrot.lane.b32.xlu1 %v2247_v29, %s8403_s15  ;;  %s8477_s15 = sld [smem:[#allocation12_spill]]  ;;  %v6450_v29 = vld [vmem:[%s7499_s25 + $0x30] sm:$0xff]  ;;  %v6449_v30 = vld [vmem:[%s7499_s25 + $0x28] sm:$0xff] }
 0x4de   : > { %v6444_v15 = vld [vmem:[%s8477_s15] ss:$0 sm:$0xff] }
 0x519   : > { %v2250_v33 = vpop.permute.xlu0 %2249 }
 0x51a   : > { %v2260_v36 = vsel %vm1587_vm4, %v1749_v35, %v2250_v33 }
 0x53d   : > { %v2254_v34 = vpop.permute.xlu1 %2253 }
 0x53e   : > { %v2262_v37 = vsel %vm2261_vm5, %v2260_v36, %v2254_v34  ;;  %v6446_v36 = vld [vmem:[%s8478_s7] ss:$0 sm:$0xff] }
 0x54a   : > { %v2258_v38 = vpop.permute.xlu1 %2257 }
 0x54b   : > { %v2264_v39 = vsel %vm2263_vm6, %v2262_v37, %v2258_v38  ;;  %v6447_v38 = vld [vmem:[%s8479_s11] ss:$0 sm:$0xff] }
 0x54c   : > { %6852 = vmatmul.mubr.msk.f32.vlgmr.msra.gmra.mxu0 %vm1505_vm3, %v2264_v39 }
 0x54d   : > { %6881 = vmatprep.mubr.msk.f32.mxu0 %vm7451_vm0, %v7450_v0  ;;  %6866 = vmatpush3.msra.mxu0 %v2467_v54 }
 0x54e   : > { %6867 = vmatprep.subr.mxu0 %v7450_v0 }
 0x54f   : > { %6868 = vmatpush3.msra.mxu0 %v2466_v55 }
 0x550   : > { %6869 = vmatprep.subr.mxu0 %v7450_v0 }
 0x551   : > { %6870 = vmatpush3.msra.mxu0 %v2465_v56 }
 0x552   : > { %6871 = vmatprep.subr.mxu0 %v7450_v0 }
 0x553   : > { %6872 = vmatpush3.msra.mxu0 %v2464_v57 }
 0x554   : > { %6873 = vmatprep.subr.mxu0 %v7450_v0 }
 0x555   : > { %6874 = vmatpush3.msra.mxu0 %v2463_v58 }
 0x556   : > { %6875 = vmatprep.subr.mxu0 %v7450_v0 }
 0x557   : > { %6876 = vmatpush3.msra.mxu0 %v2462_v5 }
 0x558   : > { %6877 = vmatprep.subr.mxu0 %v7450_v0 }
 0x559   : > { %6878 = vmatpush3.msra.mxu0 %v2461_v6 }
 0x55a   : > { %6879 = vmatprep.subr.mxu0 %v7450_v0 }
 0x55b   : > { %6880 = vmatpush3.msra.mxu0 %v2460_v7 }
 0x55c   : > { %6905 = vmatprep.subr.mxu0 %v7450_v0 }
 0x60c   : > { %v2340_v41 = vpop.f32.mrf.mxu0 }
 0x60d   : > { %v2341_v42 = vadd.f32 %v6438_v40, %v2340_v41  ;;  %v6453_v41 = vld [vmem:[%s7504_s29 + $0x1] ss:$0 sm:$0xff] }
 0x60e   : > { %v6853_v43 = vpop.f32.mrf.mxu0 }
 0x60f   : > { %v2344_v44 = vadd.f32 %v2341_v42, %v7748_v10  ;;  %v2376_v10 = vld [vmem:[%s7529_s24 + $0x8] sm:$0xff] }
 0x610   : > { %6859 = vmatpush3.msra.mxu1 %v2376_v10 }
 0x611   : > { %v2347_v45 = vsel %vm1505_vm3, %v2344_v44, 0.0  ;;  %6860 = vmatprep.subr.mxu1 %v7450_v0 }
 0x612   : > { %2348 = vadd.xlane.f32.xlu0 %v2347_v45  ;;  %6861 = vmatpush3.msra.mxu1 %v2375_v53 }
 0x613   : > { %6884 = vmatprep.subr.mxu1 %v7450_v0 }
 0x69b   : > { %v2349_v46 = vpop.xlane.xlu0 %2348 }
 0x69c   : > { %v2351_v47 = vmul.f32 0.03125, %v2349_v46 }
 0x69e   : > { %v2352_v48 = vsub.f32 %v2344_v44, %v2351_v47 }
 0x6a0   : > { %v2353_v49 = vmul.f32 %v2352_v48, %v2352_v48 }
 0x6a2   : > { %v2354_v50 = vsel %vm1505_vm3, %v2353_v49, 0.0 }
 0x6a3   : > { %2355 = vadd.xlane.f32.xlu1 %v2354_v50 }
 0x72c   : > { %v2356_v59 = vpop.xlane.xlu1 %2355 }
 0x72d   : > { %v2357_v60 = vmul.f32 0.03125, %v2356_v59 }
 0x72f   : > { %v2358_v61 = vadd.f32 1e-05, %v2357_v60 }
 0x731   : > { %7262 = vrsqrt.f32 %v2358_v61 }
 0x73e   : > { %v7263_v62 = vpop.eup %7262 }
 0x73f   : > { %v2360_v1 = vmul.f32 %v7263_v62, %v2352_v48 }
 0x741   : > { %v2367_v3 = vmul.f32 %v6440_v63, %v2360_v1 }
 0x743   : > { %v2374_v4 = vadd.f32 %v6441_v2, %v2367_v3 }
 0x745   : > { %6863 = vmatmul.mubr.msk.f32.vlgmr.msra.gmra.mxu1 %vm1505_vm3, %v2374_v4 }
 0x746   : > { %6892 = vmatprep.mubr.msk.f32.mxu1 %vm7451_vm0, %v7450_v0  ;;  %6885 = vmatpush3.msra.mxu1 %v6451_v26 }
 0x747   : > { %6886 = vmatprep.subr.mxu1 %v7450_v0 }
 0x748   : > { %6887 = vmatpush3.msra.mxu1 %v6450_v29 }
 0x749   : > { %6888 = vmatprep.subr.mxu1 %v7450_v0 }
 0x74a   : > { %6889 = vmatpush3.msra.mxu1 %v6449_v30 }
 0x74b   : > { %6890 = vmatprep.subr.mxu1 %v7450_v0 }
 0x74c   : > { %6891 = vmatpush3.msra.mxu1 %v6448_v31 }
 0x74d   : > { %6895 = vmatprep.subr.mxu1 %v7450_v0 }
 0x805   : > { %v2455_v11 = vpop.f32.mrf.mxu1 }
 0x806   : > { %v2456_v12 = vadd.f32 %v6442_v9, %v2455_v11 }
 0x807   : > { %v6864_v13 = vpop.f32.mrf.mxu1 }
 0x808   : > { %v2459_v14 = vmax.f32 %v2456_v12, 0.0 }
 0x80a   : > { %6882 = vmatmul.mubr.msk.f32.vlgmr.msra.gmra.mxu0 %vm2475_vm7, %v2459_v14 }
 0x80b   : > { %6907 = vmatprep.mubr.msk.f32.mxu0 %vm7451_vm0, %v7450_v0 }
 0x8ca   : > { %v2545_v16 = vpop.f32.mrf.mxu0 }
 0x8cb   : > { %v2546_v17 = vadd.f32 %v6444_v15, %v2545_v16 }
 0x8cc   : > { %v6883_v18 = vpop.f32.mrf.mxu0 }
 0x8cd   : > { %v2549_v19 = vadd.f32 %v2546_v17, %v2374_v4 }
 0x8cf   : > { %v2552_v20 = vsel %vm1505_vm3, %v2549_v19, 0.0 }
 0x8d0   : > { %2553 = vadd.xlane.f32.xlu0 %v2552_v20 }
 0x959   : > { %v2554_v21 = vpop.xlane.xlu0 %2553 }
 0x95a   : > { %v2555_v22 = vmul.f32 0.03125, %v2554_v21 }
 0x95c   : > { %v2556_v23 = vsub.f32 %v2549_v19, %v2555_v22 }
 0x95e   : > { %v2557_v24 = vmul.f32 %v2556_v23, %v2556_v23 }
 0x960   : > { %v2558_v25 = vsel %vm1505_vm3, %v2557_v24, 0.0 }
 0x961   : > { %2559 = vadd.xlane.f32.xlu0 %v2558_v25 }
 0x9ea   : > { %v2560_v32 = vpop.xlane.xlu0 %2559 }
 0x9eb   : > { %v2561_v33 = vmul.f32 0.03125, %v2560_v32 }
 0x9ed   : > { %v2562_v34 = vadd.f32 1e-05, %v2561_v33 }
 0x9ef   : > { %7264 = vrsqrt.f32 %v2562_v34 }
 0x9fc   : > { %v7265_v35 = vpop.eup %7264 }
 0x9fd   : > { %v2564_v37 = vmul.f32 %v7265_v35, %v2556_v23 }
 0x9ff   : > { %v2571_v39 = vmul.f32 %v6446_v36, %v2564_v37 }
 0xa01   : > { %v7906_v40 = vadd.f32 %v6447_v38, %v2571_v39 }
 0xa03   : > { %6893 = vmatmul.mubr.msk.f32.vlgmr.msra.gmra.mxu1 %vm1505_vm3, %v7906_v40 }
 0xa04   : > { %6897 = vmatprep.mubr.msk.f32.mxu1 %vm7451_vm0, %v7450_v0 }
 0xac3   : > { %v2661_v42 = vpop.f32.mrf.mxu1 }
 0xac4   : > { %v2662_v43 = vadd.f32 %v6453_v41, %v2661_v42  ;;  %v6458_v41 = vld [vmem:[%s8472_s3 + $0x38] sm:$0xff]  ;;  %v6457_v42 = vld [vmem:[%s8472_s3 + $0x30] sm:$0xff] }
 0xac5   : > { %v6894_v44 = vpop.f32.mrf.mxu1 }
 0xac6   : > { %2839 = vrot.lane.b32.xlu0 %v2662_v43, %s8421_s26  ;;  %2673 = vrot.lane.b32.xlu1 %v2662_v43, %s8423_s18  ;;  %s8486_s26 = sld [smem:[#allocation15_spill]] }
 0xac7   : > { %s8487_s18 = sld [smem:[#allocation16_spill]] }
 0xaca   : > { %3003 = vrot.lane.b32.xlu0 %v2662_v43, %s8413_s1  ;;  %2837 = vrot.lane.b32.xlu1 %v2662_v43, %s8419_s16  ;;  %s8482_s1 = smov 48   ;;  %s8485_s16 = smov 24  }
 0xace   : > { %3169 = vrot.lane.b32.xlu0 %v2662_v43, %s8409_s2  ;;  %3005 = vrot.lane.b32.xlu1 %v2662_v43, %s8415_s0  ;;  %s8480_s2 = smov 64   ;;  %s8483_s0 = smov 8  }
 0xad2   : > { %3171 = vrot.lane.b32.xlu1 %v2662_v43, %s8411_s28  ;;  %s8481_s28 = smov 40  }
 0xb38   : > { %v2840_v45 = vpop.permute.xlu0 %2839  ;;  %v2674_v46 = vpop.permute.xlu1 %2673 }
 0xb39   : > { %6896 = vmatpush3.xpose.msk.msra.mxu1 %vm1587_vm4, %v2674_v46  ;;  %6906 = vmatpush3.xpose.msk.msra.mxu0 %vm1587_vm4, %v2840_v45 }
 0xb3a   : > { %6915 = vmatprep.subr.mxu0 %v7450_v0  ;;  %6900 = vmatprep.subr.mxu1 %v7450_v0 }
 0xb3c   : > { %6898 = vmatmul.mubr.msk.f32.vlgmr.msra.gmra.mxu1 %vm1587_vm4, %v2662_v43  ;;  %v2838_v47 = vpop.permute.xlu1 %2837  ;;  %v3004_v49 = vpop.permute.xlu0 %3003 }
 0xb3d   : > { %6908 = vmatmul.mubr.msk.f32.vlgmr.msra.gmra.mxu0 %vm1587_vm4, %v2838_v47  ;;  %6902 = vmatprep.mubr.msk.f32.mxu1 %vm7451_vm0, %v7450_v0 }
 0xb3e   : > { %6917 = vmatprep.mubr.msk.f32.mxu0 %vm7451_vm0, %v7450_v0 }
 0xb40   : > { %v3006_v48 = vpop.permute.xlu1 %3005  ;;  %v3170_v51 = vpop.permute.xlu0 %3169 }
 0xb41   : > { %6916 = vmatpush3.xpose.msk.msra.mxu0 %vm1587_vm4, %v3006_v48 }
 0xb42   : > { %6925 = vmatprep.subr.mxu0 %v7450_v0 }
 0xb44   : > { %6918 = vmatmul.mubr.msk.f32.vlgmr.msra.gmra.mxu0 %vm1587_vm4, %v3004_v49  ;;  %v3172_v50 = vpop.permute.xlu1 %3171  ;;  %v6455_v49 = vld [vmem:[%s8472_s3 + $0x20] sm:$0xff] }
 0xb45   : > { %6926 = vmatpush3.xpose.msk.msra.mxu0 %vm1587_vm4, %v3172_v50  ;;  %6927 = vmatprep.mubr.msk.f32.mxu0 %vm7451_vm0, %v7450_v0 }
 0xb46   : > { %6935 = vmatprep.subr.mxu0 %v7450_v0 }
 0xb48   : > { %6928 = vmatmul.mubr.msk.f32.vlgmr.msra.gmra.mxu0 %vm1587_vm4, %v3170_v51 }
 0xb49   : > { %6943 = vmatprep.mubr.msk.f32.mxu0 %vm7451_vm0, %v7450_v0  ;;  %6936 = vmatpush3.msra.mxu0 %v6458_v41 }
 0xb4a   : > { %6937 = vmatprep.subr.mxu0 %v7450_v0 }
 0xb4b   : > { %6938 = vmatpush3.msra.mxu0 %v6457_v42 }
 0xb4c   : > { %6939 = vmatprep.subr.mxu0 %v7450_v0 }
 0xbfc   : > { %v2745_v52 = vpop.f32.mrf.mxu1 }
 0xbfd   : > { %v2749_v10 = vmul.f32 0.35355338, %v2745_v52  ;;  %v2911_v53 = vpop.f32.mrf.mxu0 }
 0xbfe   : > { %v2915_v54 = vmul.f32 0.35355338, %v2911_v53  ;;  %v6899_v55 = vpop.f32.mrf.mxu1 }
 0xbff   : > { %v6909_v56 = vpop.f32.mrf.mxu0  ;;  %v2750_v57 = vsel %vm1587_vm4, %v2749_v10, -inf }
 0xc00   : > { %2751 = vmax.xlane.f32.xlu1 %v2750_v57  ;;  %v2916_v58 = vsel %vm1587_vm4, %v2915_v54, -inf }
 0xc01   : > { %2917 = vmax.xlane.f32.xlu0 %v2916_v58 }
 0xc04   : > { %v3077_v59 = vpop.f32.mrf.mxu0 }
 0xc05   : > { %v3081_v60 = vmul.f32 0.35355338, %v3077_v59 }
 0xc06   : > { %v6919_v61 = vpop.f32.mrf.mxu0 }
 0xc07   : > { %v3082_v62 = vsel %vm1587_vm4, %v3081_v60, -inf }
 0xc08   : > { %3083 = vmax.xlane.f32.xlu0 %v3082_v62  ;;  %v3243_v63 = vpop.f32.mrf.mxu0  ;;  %v6472_v62 = vld [vmem:[%s8470_s8 + $0x1] ss:$0 sm:$0xff]  ;;  %s8493_s8 = smov 112  }
 0xc09   : > { %v3247_v2 = vmul.f32 0.35355338, %v3243_v63 }
 0xc0a   : > { %v6929_v1 = vpop.f32.mrf.mxu0 }
 0xc0b   : > { %v3248_v3 = vsel %vm1587_vm4, %v3247_v2, -inf }
 0xc11   : > { %2926 = vrot.lane.b32.xlu1 %v2662_v43, %s8417_s10  ;;  %s8484_s10 = smov 16  }
 0xc1e   : > { %2760 = vrot.lane.b32.xlu0 %v2662_v43, %s8480_s2 }
 0xc22   : > { %3258 = vrot.lane.b32.xlu0 %v2662_v43, %s8481_s28 }
 0xc35   : > { %3249 = vmax.xlane.f32.xlu1 %v3248_v3 }
 0xc46   : > { %3092 = vrot.lane.b32.xlu1 %v2662_v43, %s8482_s1  ;;  %v6456_v43 = vld [vmem:[%s8472_s3 + $0x28] sm:$0xff]  ;;  %s8488_s3 = smov 96  }
 0xc47   : > { %6940 = vmatpush3.msra.mxu0 %v6456_v43 }
 0xc48   : > { %6941 = vmatprep.subr.mxu0 %v7450_v0 }
 0xc49   : > { %6942 = vmatpush3.msra.mxu0 %v6455_v49 }
 0xc4a   : > { %6957 = vmatprep.subr.mxu0 %v7450_v0 }
 0xc89   : > { %v2752_v4 = vpop.xlane.xlu1 %2751 }
 0xc8a   : > { %v2753_v5 = vsub.f32 %v2749_v10, %v2752_v4  ;;  %v2918_v6 = vpop.xlane.xlu0 %2917 }
 0xc8b   : > { %v2919_v7 = vsub.f32 %v2915_v54, %v2918_v6 }
 0xc8c   : > { %v2754_v9 = vmul.f32 1.442695, %v2753_v5 }
 0xc8d   : > { %v2920_v11 = vmul.f32 1.442695, %v2919_v7  ;;  %v2927_v18 = vpop.permute.xlu1 %2926 }
 0xc8e   : > { %7266 = vpow2.f32 %v2754_v9 }
 0xc8f   : > { %7268 = vpow2.f32 %v2920_v11 }
 0xc91   : > { %v3084_v12 = vpop.xlane.xlu0 %3083 }
 0xc92   : > { %v3085_v13 = vsub.f32 %v3081_v60, %v3084_v12  ;;  %v6481_v12 = vld [vmem:[%s7529_s24 + $0x38] sm:$0xff] }
 0xc94   : > { %v3086_v14 = vmul.f32 1.442695, %v3085_v13  ;;  %v6480_v13 = vld [vmem:[%s7529_s24 + $0x30] sm:$0xff] }
 0xc95   : > { %v2761_v15 = vpop.permute.xlu0 %2760 }
 0xc96   : > { %7270 = vpow2.f32 %v3086_v14  ;;  %6901 = vmatpush3.msra.mxu1 %v2761_v15  ;;  %v6478_v14 = vld [vmem:[%s7529_s24 + $0x20] sm:$0xff]  ;;  %v3702_v15 = vld [vmem:[%s8486_s26 + $0x18] sm:$0xff] }
 0xc97   : > { %6910 = vmatprep.subr.mxu1 %v7450_v0 }
 0xc99   : > { %v3259_v29 = vpop.permute.xlu0 %3258 }
 0xc9b   : > { %v7267_v16 = vpop.eup %7266 }
 0xc9c   : > { %v7269_v17 = vpop.eup %7268  ;;  %6903 = vmatmul.mubr.msk.f32.vlgmr.msra.gmra.mxu1 %vm1587_vm4, %v7267_v16  ;;  %v2756_v20 = vsel %vm1587_vm4, %v7267_v16, 0.0  ;;  %v6492_v16 = vld [vmem:[%s8471_s6 + $0x78] sm:$0xff] }
 0xc9d   : > { %6911 = vmatpush3.msra.mxu1 %v2927_v18  ;;  %v2922_v19 = vsel %vm1587_vm4, %v7269_v17, 0.0  ;;  %6912 = vmatprep.mubr.msk.f32.mxu1 %vm7451_vm0, %v7450_v0  ;;  %v6490_v18 = vld [vmem:[%s8471_s6 + $0x68] sm:$0xff] }
 0xc9e   : > { %2923 = vadd.xlane.f32.xlu1 %v2922_v19  ;;  %6920 = vmatprep.subr.mxu1 %v7450_v0  ;;  %v6489_v19 = vld [vmem:[%s8471_s6 + $0x60] sm:$0xff] }
 0xca0   : > { %6913 = vmatmul.mubr.msk.f32.vlgmr.msra.gmra.mxu1 %vm1587_vm4, %v7269_v17  ;;  %v6491_v17 = vld [vmem:[%s8471_s6 + $0x70] sm:$0xff] }
 0xca1   : > { %6922 = vmatprep.mubr.msk.f32.mxu1 %vm7451_vm0, %v7450_v0 }
 0xca2   : > { %2757 = vadd.xlane.f32.xlu1 %v2756_v20  ;;  %v6488_v20 = vld [vmem:[%s8471_s6 + $0x58] sm:$0xff] }
 0xca3   : > { %v7271_v21 = vpop.eup %7270 }
 0xca4   : > { %v3088_v22 = vsel %vm1587_vm4, %v7271_v21, 0.0 }
 0xca5   : > { %3089 = vadd.xlane.f32.xlu0 %v3088_v22 }
 0xcbe   : > { %v3250_v23 = vpop.xlane.xlu1 %3249 }
 0xcbf   : > { %v3251_v24 = vsub.f32 %v3247_v2, %v3250_v23 }
 0xcc1   : > { %v3252_v25 = vmul.f32 1.442695, %v3251_v24 }
 0xcc2   : > { %v3093_v26 = vpop.permute.xlu1 %3092 }
 0xcc3   : > { %7272 = vpow2.f32 %v3252_v25  ;;  %6921 = vmatpush3.msra.mxu1 %v3093_v26  ;;  %v6476_v25 = vld [vmem:[%s8468_s14 + $0x1] ss:$0 sm:$0xff]  ;;  %s8505_s14 = sld [smem:[#allocation20_spill]] }
 0xcc4   : > { %6923 = vmatmul.mubr.msk.f32.vlgmr.msra.gmra.mxu1 %vm1587_vm4, %v7271_v21  ;;  %6930 = vmatprep.subr.mxu1 %v7450_v0 }
 0xcc5   : > { %6931 = vmatpush3.msra.mxu1 %v3259_v29  ;;  %6932 = vmatprep.mubr.msk.f32.mxu1 %vm7451_vm0, %v7450_v0  ;;  %v6477_v29 = vld [vmem:[%s7524_s19 + $0x1] ss:$0 sm:$0xff] }
 0xcc6   : > { %6946 = vmatprep.subr.mxu1 %v7450_v0 }
 0xcd0   : > { %v7273_v30 = vpop.eup %7272 }
 0xcd1   : > { %6933 = vmatmul.mubr.msk.f32.vlgmr.msra.gmra.mxu1 %vm1587_vm4, %v7273_v30  ;;  %v3254_v31 = vsel %vm1587_vm4, %v7273_v30, 0.0 }
 0xcd2   : > { %3255 = vadd.xlane.f32.xlu0 %v3254_v31  ;;  %6954 = vmatprep.mubr.msk.f32.mxu1 %vm7451_vm0, %v7450_v0 }
 0xcd3   : > { %6947 = vmatpush3.msra.mxu1 %v6481_v12 }
 0xcd4   : > { %6948 = vmatprep.subr.mxu1 %v7450_v0 }
 0xcd5   : > { %6949 = vmatpush3.msra.mxu1 %v6480_v13 }
 0xcd6   : > { %6950 = vmatprep.subr.mxu1 %v7450_v0 }
 0xd27   : > { %v2924_v32 = vpop.xlane.xlu1 %2923 }
 0xd28   : > { %7274 = vrcp.f32 %v2924_v32  ;;  %v8013_v32 = vadd.f32 %v7805_v28, %v7745_v8  ;;  %v6487_v28 = vld [vmem:[%s8471_s6 + $0x50] sm:$0xff] }
 0xd2b   : > { %v2758_v53 = vpop.xlane.xlu1 %2757 }
 0xd2e   : > { %v3090_v39 = vpop.xlane.xlu0 %3089 }
 0xd2f   : > { %7276 = vrcp.f32 %v3090_v39  ;;  %v6483_v39 = vld [vmem:[%s7534_s30 + $0x1] ss:$0 sm:$0xff] }
 0xd35   : > { %v7275_v35 = vpop.eup %7274 }
 0xd3c   : > { %v7277_v45 = vpop.eup %7276 }
 0xd5b   : > { %v3256_v44 = vpop.xlane.xlu0 %3255 }
 0xd5c   : > { %v2832_v33 = vpop.f32.mrf.mxu1  ;;  %7278 = vrcp.f32 %v3256_v44  ;;  %v6502_v44 = vld [vmem:[%s8487_s18] ss:$0 sm:$0xff]  ;;  %s8490_s18 = smov 120  }
 0xd5d   : > { %7280 = vrcp.f32 %v2758_v53 }
 0xd5e   : > { %v6904_v34 = vpop.f32.mrf.mxu1 }
 0xd5f   : > { %v3700_v34 = vld [vmem:[%s8486_s26 + $0x8] sm:$0xff] }
 0xd60   : > { %v2998_v36 = vpop.f32.mrf.mxu1 }
 0xd61   : > { %v3002_v37 = vmul.f32 %v7275_v35, %v2998_v36  ;;  %v1327_v35 = vld [vmem:[%s8469_s13 + $0x8] sm:$0xf]  ;;  %v3699_v36 = vld [vmem:[%s8486_s26] sm:$0xff]  ;;  %s8502_s13 = sld [smem:[#allocation25_spill]] }
 0xd62   : > { %v6914_v38 = vpop.f32.mrf.mxu1  ;;  %v8024_v8 = vadd.f32 %v7803_v27, %v1327_v35 }
 0xd63   : > { %3336 = vrot.lane.b32.xlu0 %v3002_v37, %s8483_s0  ;;  %v6486_v37 = vld [vmem:[%s8471_s6 + $0x48] sm:$0xff]  ;;  %v6485_v38 = vld [vmem:[%s8471_s6 + $0x40] sm:$0xff]  ;;  %s8491_s6 = smov 56  }
 0xd69   : > { %v7279_v50 = vpop.eup %7278 }
 0xd6a   : > { %v7281_v54 = vpop.eup %7280 }
 0xd6b   : > { %v2836_v57 = vmul.f32 %v7281_v54, %v2832_v33  ;;  %v3701_v33 = vld [vmem:[%s8486_s26 + $0x10] sm:$0xff] }
 0xd84   : > { %v3164_v46 = vpop.f32.mrf.mxu1 }
 0xd85   : > { %v3168_v47 = vmul.f32 %v7277_v45, %v3164_v46 }
 0xd86   : > { %v6924_v48 = vpop.f32.mrf.mxu1 }
 0xd87   : > { %3340 = vrot.lane.b32.xlu1 %v3168_v47, %s8484_s10 }
 0xd91   : > { %v3330_v51 = vpop.f32.mrf.mxu1 }
 0xd92   : > { %v3334_v52 = vmul.f32 %v7279_v50, %v3330_v51 }
 0xd93   : > { %v6934_v10 = vpop.f32.mrf.mxu1 }
 0xd94   : > { %3344 = vrot.lane.b32.xlu1 %v3334_v52, %s8485_s16 }
 0xdd5   : > { %v3337_v55 = vpop.permute.xlu0 %3336 }
 0xdd6   : > { %v3347_v58 = vsel %vm1587_vm4, %v2836_v57, %v3337_v55 }
 0xdf9   : > { %v3341_v56 = vpop.permute.xlu1 %3340 }
 0xdfa   : > { %v3348_v59 = vsel %vm2261_vm5, %v3347_v58, %v3341_v56 }
 0xe06   : > { %v3345_v60 = vpop.permute.xlu1 %3344 }
 0xe07   : > { %v3349_v61 = vsel %vm2263_vm6, %v3348_v59, %v3345_v60  ;;  %v3796_v59 = vlaneseq }
 0xe08   : > { %6944 = vmatmul.mubr.msk.f32.vlgmr.msra.gmra.mxu0 %vm1505_vm3, %v3349_v61 }
 0xe09   : > { %6973 = vmatprep.mubr.msk.f32.mxu0 %vm7451_vm0, %v7450_v0  ;;  %6958 = vmatpush3.msra.mxu0 %v6492_v16  ;;  %v3797_v60 = vshrl.u32 %v3796_v59, 7 }
 0xe0a   : > { %6959 = vmatprep.subr.mxu0 %v7450_v0 }
 0xe0b   : > { %6960 = vmatpush3.msra.mxu0 %v6491_v17  ;;  %v3798_v61 = vadd.s32 8, %v3797_v60 }
 0xe0c   : > { %6961 = vmatprep.subr.mxu0 %v7450_v0 }
 0xe0d   : > { %6962 = vmatpush3.msra.mxu0 %v6490_v18 }
 0xe0e   : > { %6963 = vmatprep.subr.mxu0 %v7450_v0 }
 0xe0f   : > { %6964 = vmatpush3.msra.mxu0 %v6489_v19 }
 0xe10   : > { %6965 = vmatprep.subr.mxu0 %v7450_v0 }
 0xe11   : > { %6966 = vmatpush3.msra.mxu0 %v6488_v20 }
 0xe12   : > { %6967 = vmatprep.subr.mxu0 %v7450_v0 }
 0xe13   : > { %6968 = vmatpush3.msra.mxu0 %v6487_v28 }
 0xe14   : > { %6969 = vmatprep.subr.mxu0 %v7450_v0 }
 0xe15   : > { %6970 = vmatpush3.msra.mxu0 %v6486_v37 }
 0xe16   : > { %6971 = vmatprep.subr.mxu0 %v7450_v0 }
 0xe17   : > { %6972 = vmatpush3.msra.mxu0 %v6485_v38 }
 0xec8   : > { %v3425_v63 = vpop.f32.mrf.mxu0 }
 0xec9   : > { %v3426_v1 = vadd.f32 %v6472_v62, %v3425_v63  ;;  %v3800_v62 = vand.u32 127, %v3796_v59 }
 0xeca   : > { %v6945_v2 = vpop.f32.mrf.mxu0 }
 0xecb   : > { %v3429_v3 = vadd.f32 %v3426_v1, %v7906_v40  ;;  %v6479_v40 = vld [vmem:[%s7529_s24 + $0x28] sm:$0xff]  ;;  %vm3802_vm9 = vcmp.gt.s32.totalorder %v3800_v62, %v3798_v61  ;;  %vm3801_vm10 = vcmp.gt.s32.totalorder %v3800_v62, %v3797_v60 }
 0xecc   : > { %6951 = vmatpush3.msra.mxu1 %v6479_v40  ;;  %v8081_v1 = vsel %vm3802_vm9, -1e+30, %v7450_v0 }
 0xecd   : > { %v3434_v4 = vsel %vm1505_vm3, %v3429_v3, 0.0  ;;  %6952 = vmatprep.subr.mxu1 %v7450_v0 }
 0xece   : > { %3435 = vadd.xlane.f32.xlu0 %v3434_v4  ;;  %6953 = vmatpush3.msra.mxu1 %v6478_v14  ;;  %v8084_v4 = vsel %vm3801_vm10, -1e+30, %v7450_v0 }
 0xecf   : > { %6976 = vmatprep.subr.mxu1 %v3702_v15 }
 0xf57   : > { %v3436_v5 = vpop.xlane.xlu0 %3435 }
 0xf58   : > { %v3437_v6 = vmul.f32 0.03125, %v3436_v5 }
 0xf5a   : > { %v3438_v7 = vsub.f32 %v3429_v3, %v3437_v6 }
 0xf5c   : > { %v3439_v9 = vmul.f32 %v3438_v7, %v3438_v7 }
 0xf5e   : > { %v3440_v11 = vsel %vm1505_vm3, %v3439_v9, 0.0 }
 0xf5f   : > { %3441 = vadd.xlane.f32.xlu1 %v3440_v11 }
 0xfe8   : > { %v3442_v21 = vpop.xlane.xlu1 %3441 }
 0xfe9   : > { %v3443_v22 = vmul.f32 0.03125, %v3442_v21 }
 0xfeb   : > { %v3444_v23 = vadd.f32 1e-05, %v3443_v22 }
 0xfed   : > { %7282 = vrsqrt.f32 %v3444_v23 }
 0xffa   : > { %v7283_v24 = vpop.eup %7282 }
 0xffb   : > { %v3446_v26 = vmul.f32 %v7283_v24, %v3438_v7 }
 0xffd   : > { %v3453_v30 = vmul.f32 %v6476_v25, %v3446_v26 }
 0xfff   : > { %v8009_v31 = vadd.f32 %v6477_v29, %v3453_v30 }
0x1001   : > { %6955 = vmatmul.mubr.msk.f32.vlgmr.msra.gmra.mxu1 %vm1505_vm3, %v8009_v31 }
0x1002   : > { %6977 = vmatpush3.msra.mxu1 %v3702_v15  ;;  %6984 = vmatprep.mubr.msk.f32.mxu1 %vm1505_vm3, %v8013_v32 }
0x1003   : > { %6978 = vmatprep.subr.mxu1 %v3701_v33 }
0x1004   : > { %6979 = vmatpush3.msra.mxu1 %v3701_v33 }
0x1005   : > { %6980 = vmatprep.subr.mxu1 %v3700_v34 }
0x1006   : > { %6981 = vmatpush3.msra.mxu1 %v3700_v34 }
0x1007   : > { %6982 = vmatprep.subr.mxu1 %v3699_v36 }
0x1008   : > { %6983 = vmatpush3.msra.mxu1 %v3699_v36 }
0x1009   : > { %6985 = vmatmul.mubr.msk.f32.vlgmr.msra.gmra.mxu1 %vm1505_vm3, %v8024_v8 }
0x10c1   : > { %v3543_v41 = vpop.f32.mrf.mxu1 }
0x10c2   : > { %v3544_v27 = vadd.f32 %v6483_v39, %v3543_v41 }
0x10c3   : > { %v6956_v42 = vpop.f32.mrf.mxu1 }
0x10c4   : > { %v3547_v43 = vmax.f32 %v3544_v27, 0.0 }
0x10c6   : > { %6974 = vmatmul.mubr.msk.f32.vlgmr.msra.gmra.mxu0 %vm2475_vm7, %v3547_v43 }
0x10c9   : > { %v6986_v45 = vpop.f32.mrf.mxu1 }
0x10ca   : > { %v8036_v46 = vadd.f32 %v6986_v45, %v6502_v44 }
0x10cb   : > { %v3782_v47 = vpop.f32.mrf.mxu1 }
0x10cc   : > { %v8038_v48 = vadd.f32 %v6502_v44, %v3782_v47  ;;  %3809 = vrot.lane.b32.xlu0 %v8036_v46, %s8488_s3 }
0x10ce   : > { %3807 = vrot.lane.b32.xlu1 %v8038_v48, %s8488_s3  ;;  %6991 = vmatprep.mubr.msk.f32.mxu1 %vm1587_vm4, %v8038_v48 }
0x10d0   : > { %4017 = vrot.lane.b32.xlu0 %v8036_v46, %s8489_s5 }
0x10d2   : > { %4015 = vrot.lane.b32.xlu1 %v8038_v48, %s8489_s5 }
0x10d4   : > { %4011 = vrot.lane.b32.xlu0 %v8038_v48, %s8490_s18 }
0x10d6   : > { %4013 = vrot.lane.b32.xlu1 %v8036_v46, %s8490_s18 }
0x10d8   : > { %3920 = vrot.lane.b32.xlu0 %v8038_v48, %s8480_s2 }
0x10da   : > { %3922 = vrot.lane.b32.xlu1 %v8036_v46, %s8480_s2  ;;  %s8492_s2 = smov 80  }
0x10de   : > { %4128 = vrot.lane.b32.xlu1 %v8036_v46, %s8491_s6 }
0x113e   : > { %v3810_v49 = vpop.permute.xlu0 %3809 }
0x113f   : > { %6987 = vmatprep.subr.msk.mxu1 %vm1587_vm4, %v3810_v49 }
0x1140   : > { %6988 = vmatpush3.xpose.msk.msra.mxu1 %vm1587_vm4, %v3810_v49  ;;  %v3808_v50 = vpop.permute.xlu1 %3807 }
0x1141   : > { %6989 = vmatprep.subr.msk.mxu1 %vm1587_vm4, %v3808_v50 }
0x1142   : > { %v4018_v51 = vpop.permute.xlu0 %4017 }
0x1144   : > { %6990 = vmatpush3.xpose.msk.msra.mxu1 %vm1587_vm4, %v3808_v50  ;;  %v4016_v52 = vpop.permute.xlu1 %4015 }
0x1145   : > { %7001 = vmatprep.subr.msk.mxu1 %vm1587_vm4, %v4018_v51 }
0x1146   : > { %v4012_v10 = vpop.permute.xlu0 %4011 }
0x1147   : > { %6992 = vmatmul.mubr.msk.f32.vlgmr.msra.gmra.mxu1 %vm1587_vm4, %v8036_v46 }
0x1148   : > { %v4014_v53 = vpop.permute.xlu1 %4013  ;;  %7002 = vmatpush3.xpose.msk.msra.mxu1 %vm1587_vm4, %v4018_v51  ;;  %7005 = vmatprep.mubr.msk.f32.mxu1 %vm1587_vm4, %v4012_v10 }
0x1149   : > { %7003 = vmatprep.subr.msk.mxu1 %vm1587_vm4, %v4016_v52 }
0x114a   : > { %v3921_v55 = vpop.permute.xlu0 %3920 }
0x114c   : > { %v3923_v54 = vpop.permute.xlu1 %3922  ;;  %7004 = vmatpush3.xpose.msk.msra.mxu1 %vm1587_vm4, %v4016_v52 }
0x114d   : > { %6994 = vmatprep.subr.msk.mxu0 %vm3931_vm8, %v3923_v54 }
0x114e   : > { %6995 = vmatpush3.msk.msra.mxu0 %vm3931_vm8, %v3923_v54 }
0x114f   : > { %6996 = vmatprep.subr.mxu0 %v3921_v55  ;;  %7006 = vmatmul.mubr.msk.f32.vlgmr.msra.gmra.mxu1 %vm1587_vm4, %v4014_v53 }
0x1150   : > { %6997 = vmatpush3.msra.mxu0 %v3921_v55  ;;  %v8074_v56 = vpop.permute.xlu1 %4128 }
0x1151   : > { %7008 = vmatprep.subr.msk.mxu0 %vm3931_vm8, %v8074_v56 }
0x1186   : > { %v8078_v57 = vpop.f32.mrf.mxu0 }
0x1188   : > { %v6975_v58 = vpop.f32.mrf.mxu0 }
0x1207   : > { %v6993_v63 = vpop.f32.mrf.mxu1 }
0x1208   : > { %v3895_v2 = vmul.f32 0.35355338, %v6993_v63 }
0x1209   : > { %v3885_v3 = vpop.f32.mrf.mxu1 }
0x120a   : > { %v3894_v5 = vmul.f32 0.35355338, %v3885_v3  ;;  %v3897_v6 = vadd.f32 %v3895_v2, %v8081_v1 }
0x120c   : > { %v3903_v7 = vsel %vm3902_vm11, %v3897_v6, -inf  ;;  %v3896_v9 = vadd.f32 %v3894_v5, %v8084_v4 }
0x120d   : > { %3904 = vmax.xlane.f32.xlu1 %v3903_v7 }
0x120e   : > { %v3899_v11 = vsel %vm3898_vm12, %v3896_v9, -inf }
0x120f   : > { %v7007_v12 = vpop.f32.mrf.mxu1  ;;  %3900 = vmax.xlane.f32.xlu0 %v3899_v11 }
0x1210   : > { %v4103_v13 = vmul.f32 0.35355338, %v7007_v12 }
0x1211   : > { %v4093_v40 = vpop.f32.mrf.mxu1 }
0x1212   : > { %v4102_v14 = vmul.f32 0.35355338, %v4093_v40  ;;  %v4105_v15 = vadd.f32 %v4103_v13, %v8081_v1 }
0x1214   : > { %v4109_v16 = vsel %vm3902_vm11, %v4105_v15, -inf  ;;  %v4104_v17 = vadd.f32 %v4102_v14, %v8084_v4 }
0x1215   : > { %4110 = vmax.xlane.f32.xlu0 %v4109_v16 }
0x1216   : > { %v4106_v18 = vsel %vm3898_vm12, %v4104_v17, -inf }
0x1219   : > { %4107 = vmax.xlane.f32.xlu0 %v4106_v18 }
0x121e   : > { %4126 = vrot.lane.b32.xlu1 %v8038_v48, %s8491_s6  ;;  %s8494_s6 = smov 72  }
0x1222   : > { %4220 = vrot.lane.b32.xlu1 %v8038_v48, %s8492_s2 }
0x1226   : > { %4218 = vrot.lane.b32.xlu1 %v8036_v46, %s8493_s8 }
0x122a   : > { %4331 = vrot.lane.b32.xlu1 %v8038_v48, %s8482_s1 }
0x122f   : > { %4222 = vrot.lane.b32.xlu0 %v8036_v46, %s8492_s2 }
0x1233   : > { %4216 = vrot.lane.b32.xlu0 %v8038_v48, %s8493_s8 }
0x1237   : > { %4333 = vrot.lane.b32.xlu0 %v8036_v46, %s8482_s1  ;;  %s8495_s1 = smov 104  }
0x1296   : > { %v3905_v19 = vpop.xlane.xlu1 %3904 }
0x1297   : > { %v3907_v20 = vsub.f32 %v3897_v6, %v3905_v19 }
0x1298   : > { %v3901_v21 = vpop.xlane.xlu0 %3900 }
0x1299   : > { %v3906_v22 = vsub.f32 %v3896_v9, %v3901_v21  ;;  %v3910_v23 = vmul.f32 1.442695, %v3907_v20 }
0x129a   : > { %v4127_v25 = vpop.permute.xlu1 %4126 }
0x129b   : > { %v3908_v24 = vmul.f32 1.442695, %v3906_v22 }
0x129d   : > { %7284 = vpow2.f32 %v3908_v24 }
0x129e   : > { %7286 = vpow2.f32 %v3910_v23  ;;  %v4111_v26 = vpop.xlane.xlu0 %4110  ;;  %v4221_v34 = vpop.permute.xlu1 %4220 }
0x129f   : > { %v4113_v29 = vsub.f32 %v4105_v15, %v4111_v26 }
0x12a1   : > { %v4116_v35 = vmul.f32 1.442695, %v4113_v29 }
0x12a2   : > { %v4108_v30 = vpop.xlane.xlu0 %4107  ;;  %v4219_v38 = vpop.permute.xlu1 %4218 }
0x12a3   : > { %v4112_v33 = vsub.f32 %v4104_v17, %v4108_v30 }
0x12a5   : > { %v4114_v36 = vmul.f32 1.442695, %v4112_v33 }
0x12a6   : > { %v4223_v28 = vpop.permute.xlu0 %4222  ;;  %v4332_v42 = vpop.permute.xlu1 %4331 }
0x12a7   : > { %7288 = vpow2.f32 %v4114_v36 }
0x12a8   : > { %7290 = vpow2.f32 %v4116_v35 }
0x12aa   : > { %v8108_v37 = vpop.eup %7284  ;;  %v4217_v39 = vpop.permute.xlu0 %4216 }
0x12ab   : > { %v8110_v41 = vpop.eup %7286  ;;  %6998 = vmatprep.mubr.msk.f32.mxu0 %vm3898_vm12, %v8108_v37 }
0x12ac   : > { %6999 = vmatmul.mubr.msk.f32.vlgmr.msra.gmra.mxu0 %vm3898_vm12, %v8110_v41 }
0x12ad   : > { %7009 = vmatpush3.msk.msra.mxu0 %vm3931_vm8, %v8074_v56 }
0x12ae   : > { %7010 = vmatprep.subr.mxu0 %v4127_v25  ;;  %v4334_v27 = vpop.permute.xlu0 %4333 }
0x12af   : > { %7011 = vmatpush3.msra.mxu0 %v4127_v25  ;;  %7022 = vmatprep.subr.msk.mxu1 %vm3931_vm8, %v4334_v27 }
0x12b0   : > { %7015 = vmatprep.subr.msk.mxu0 %vm1587_vm4, %v4223_v28  ;;  %7023 = vmatpush3.msk.msra.mxu1 %vm3931_vm8, %v4334_v27 }
0x12b1   : > { %7024 = vmatprep.subr.mxu1 %v4332_v42 }
0x12b2   : > { %7025 = vmatpush3.msra.mxu1 %v4332_v42 }
0x12b4   : > { %v8121_v43 = vpop.eup %7288 }
0x12b5   : > { %v7291_v44 = vpop.eup %7290  ;;  %7012 = vmatprep.mubr.msk.f32.mxu0 %vm3898_vm12, %v8121_v43 }
0x12b6   : > { %7013 = vmatmul.mubr.msk.f32.vlgmr.msra.gmra.mxu0 %vm3898_vm12, %v7291_v44  ;;  %v4121_v21 = vsel %vm3902_vm11, %v7291_v44, 0.0 }
0x12b7   : > { %7016 = vmatpush3.xpose.msk.msra.mxu0 %vm1587_vm4, %v4223_v28  ;;  %7019 = vmatprep.mubr.msk.f32.mxu0 %vm1587_vm4, %v4217_v39  ;;  %v3915_v28 = vsel %vm3902_vm11, %v8110_v41, 0.0 }
0x12b8   : > { %7017 = vmatprep.subr.msk.mxu0 %vm1587_vm4, %v4221_v34 }
0x12bb   : > { %7018 = vmatpush3.xpose.msk.msra.mxu0 %vm1587_vm4, %v4221_v34 }
0x12be   : > { %7020 = vmatmul.mubr.msk.f32.vlgmr.msra.gmra.mxu0 %vm1587_vm4, %v4219_v38  ;;  %v3912_v38 = vsel %vm3898_vm12, %v8108_v37, 0.0 }
0x136c   : > { %v8131_v45 = vpop.f32.mrf.mxu0 }
0x136e   : > { %v8133_v47 = vpop.f32.mrf.mxu0 }
0x1376   : > { %v8135_v49 = vpop.f32.mrf.mxu0 }
0x1378   : > { %v8137_v50 = vpop.f32.mrf.mxu0 }
0x137e   : > { %v7021_v51 = vpop.f32.mrf.mxu0 }
0x137f   : > { %v4308_v52 = vmul.f32 0.35355338, %v7021_v51 }
0x1380   : > { %v4298_v10 = vpop.f32.mrf.mxu0 }
0x1381   : > { %v4307_v53 = vmul.f32 0.35355338, %v4298_v10  ;;  %v4310_v54 = vadd.f32 %v4308_v52, %v8081_v1 }
0x1383   : > { %v4314_v55 = vsel %vm3902_vm11, %v4310_v54, -inf  ;;  %v4309_v56 = vadd.f32 %v4307_v53, %v8084_v4 }
0x1384   : > { %4315 = vmax.xlane.f32.xlu1 %v4314_v55 }
0x1385   : > { %v4311_v58 = vsel %vm3898_vm12, %v4309_v56, -inf }
0x1386   : > { %4312 = vmax.xlane.f32.xlu0 %v4311_v58 }
0x1395   : > { %4425 = vrot.lane.b32.xlu1 %v8038_v48, %s8494_s6 }
0x1399   : > { %4423 = vrot.lane.b32.xlu1 %v8036_v46, %s8495_s1 }
0x139c   : > { %4427 = vrot.lane.b32.xlu0 %v8036_v46, %s8494_s6 }
0x13a0   : > { %4421 = vrot.lane.b32.xlu0 %v8038_v48, %s8495_s1 }
0x140d   : > { %v4316_v59 = vpop.xlane.xlu1 %4315 }
0x140e   : > { %v4318_v60 = vsub.f32 %v4310_v54, %v4316_v59 }
0x140f   : > { %v4313_v61 = vpop.xlane.xlu0 %4312 }
0x1410   : > { %v4317_v62 = vsub.f32 %v4309_v56, %v4313_v61  ;;  %v4321_v63 = vmul.f32 1.442695, %v4318_v60 }
0x1411   : > { %v4426_v9 = vpop.permute.xlu1 %4425 }
0x1412   : > { %v4319_v2 = vmul.f32 1.442695, %v4317_v62 }
0x1413   : > { %v4428_v3 = vpop.permute.xlu0 %4427 }
0x1414   : > { %7292 = vpow2.f32 %v4319_v2  ;;  %7029 = vmatprep.subr.msk.mxu1 %vm1587_vm4, %v4428_v3 }
0x1415   : > { %7294 = vpow2.f32 %v4321_v63  ;;  %v4424_v11 = vpop.permute.xlu1 %4423 }
0x1417   : > { %v4422_v7 = vpop.permute.xlu0 %4421 }
0x1421   : > { %v7293_v5 = vpop.eup %7292 }
0x1422   : > { %v7295_v6 = vpop.eup %7294  ;;  %7026 = vmatprep.mubr.msk.f32.mxu1 %vm3898_vm12, %v7293_v5  ;;  %v4323_v22 = vsel %vm3898_vm12, %v7293_v5, 0.0  ;;  %v6494_v5 = vld [vmem:[%s8477_s15 + $0x1] ss:$0 sm:$0xff] }
0x1423   : > { %7027 = vmatmul.mubr.msk.f32.vlgmr.msra.gmra.mxu1 %vm3898_vm12, %v7295_v6 }
0x1424   : > { %7030 = vmatpush3.xpose.msk.msra.mxu1 %vm1587_vm4, %v4428_v3  ;;  %7033 = vmatprep.mubr.msk.f32.mxu1 %vm1587_vm4, %v4422_v7 }
0x1425   : > { %7031 = vmatprep.subr.msk.mxu1 %vm1587_vm4, %v4426_v9 }
0x1428   : > { %7032 = vmatpush3.xpose.msk.msra.mxu1 %vm1587_vm4, %v4426_v9 }
0x142b   : > { %7034 = vmatmul.mubr.msk.f32.vlgmr.msra.gmra.mxu1 %vm1587_vm4, %v4424_v11 }
0x14e3   : > { %v8159_v12 = vpop.f32.mrf.mxu1 }
0x14e5   : > { %v4410_v13 = vpop.f32.mrf.mxu1 }
0x14eb   : > { %v7035_v40 = vpop.f32.mrf.mxu1 }
0x14ec   : > { %v4513_v14 = vmul.f32 0.35355338, %v7035_v40 }
0x14ed   : > { %v4503_v15 = vpop.f32.mrf.mxu1 }
0x14ee   : > { %v4512_v16 = vmul.f32 0.35355338, %v4503_v15  ;;  %v4515_v17 = vadd.f32 %v4513_v14, %v8081_v1  ;;  %v4118_v1 = vsel %vm3898_vm12, %v8121_v43, 0.0 }
0x14f0   : > { %v4519_v18 = vsel %vm3902_vm11, %v4515_v17, -inf  ;;  %v4514_v19 = vadd.f32 %v4512_v16, %v8084_v4  ;;  %v4326_v4 = vsel %vm3902_vm11, %v7295_v6, 0.0  ;;  %v3635_v6 = vadd.f32 %v6494_v5, %v8078_v57 }
0x14f1   : > { %4520 = vmax.xlane.f32.xlu1 %v4519_v18 }
0x14f2   : > { %v4516_v20 = vsel %vm3898_vm12, %v4514_v19, -inf  ;;  %v3638_v7 = vadd.f32 %v3635_v6, %v8009_v31 }
0x14f3   : > { %4517 = vmax.xlane.f32.xlu0 %v4516_v20 }
0x14f4   : > { %v3643_v9 = vsel %vm1505_vm3, %v3638_v7, 0.0 }
0x1502   : > { %4536 = vrot.lane.b32.xlu1 %v8038_v48, %s8481_s28 }
0x1509   : > { %4538 = vrot.lane.b32.xlu0 %v8036_v46, %s8481_s28  ;;  %s8496_s28 = sld [smem:[#allocation17_spill]] }
0x150f   : > { %v3794_v55 = vld [vmem:[%s8496_s28 + $0x18] sm:$0xff]  ;;  %v3792_v58 = vld [vmem:[%s8496_s28 + $0x8] sm:$0xff]  ;;  %v3791_v59 = vld [vmem:[%s8496_s28] sm:$0xff] }
0x1526   : > { %4122 = vadd.xlane.f32.xlu1 %v4121_v21 }
0x1528   : > { %4119 = vadd.xlane.f32.xlu0 %v4118_v1 }
0x152c   : > { %4324 = vadd.xlane.f32.xlu0 %v4323_v22 }
0x1530   : > { %4327 = vadd.xlane.f32.xlu0 %v4326_v4 }
0x157a   : > { %v4521_v23 = vpop.xlane.xlu1 %4520 }
0x157b   : > { %v4523_v24 = vsub.f32 %v4515_v17, %v4521_v23 }
0x157c   : > { %v4518_v25 = vpop.xlane.xlu0 %4517 }
0x157d   : > { %v4526_v48 = vmul.f32 1.442695, %v4523_v24  ;;  %v4522_v26 = vsub.f32 %v4514_v19, %v4518_v25 }
0x157e   : > { %v4537_v30 = vpop.permute.xlu1 %4536 }
0x157f   : > { %7296 = vpow2.f32 %v4526_v48  ;;  %v4524_v46 = vmul.f32 1.442695, %v4522_v26  ;;  %v6533_v26 = vld [vmem:[%s8497_s9] ss:$0 sm:$0xff]  ;;  %s8498_s9 = sld [smem:[#allocation21_spill]] }
0x1580   : > { %v4539_v29 = vpop.permute.xlu0 %4538 }
0x1581   : > { %7298 = vpow2.f32 %v4524_v46  ;;  %7036 = vmatprep.subr.msk.mxu0 %vm3931_vm8, %v4539_v29 }
0x1582   : > { %7037 = vmatpush3.msk.msra.mxu0 %vm3931_vm8, %v4539_v29 }
0x1583   : > { %7038 = vmatprep.subr.mxu0 %v4537_v30 }
0x1584   : > { %7039 = vmatpush3.msra.mxu0 %v4537_v30 }
0x1585   : > { %7043 = vmatprep.subr.mxu0 %v3794_v55  ;;  %v4883_v6 = vld [vmem:[%s8498_s9 + $0x8] sm:$0xff] }
0x158c   : > { %v7297_v33 = vpop.eup %7296 }
0x158d   : > { %v4531_v34 = vsel %vm3902_vm11, %v7297_v33, 0.0 }
0x158e   : > { %v7299_v35 = vpop.eup %7298  ;;  %4532 = vadd.xlane.f32.xlu0 %v4531_v34 }
0x158f   : > { %7040 = vmatprep.mubr.msk.f32.mxu0 %vm3898_vm12, %v7299_v35  ;;  %v4528_v36 = vsel %vm3898_vm12, %v7299_v35, 0.0 }
0x1590   : > { %4529 = vadd.xlane.f32.xlu1 %v4528_v36  ;;  %7041 = vmatmul.mubr.msk.f32.vlgmr.msra.gmra.mxu0 %vm3898_vm12, %v7297_v33 }
0x1591   : > { %7044 = vmatpush3.msra.mxu0 %v3794_v55 }
0x1592   : > { %3916 = vadd.xlane.f32.xlu0 %v3915_v28 }
0x1594   : > { %3913 = vadd.xlane.f32.xlu1 %v3912_v38 }
0x15af   : > { %v4123_v39 = vpop.xlane.xlu1 %4122 }
0x15b0   : > { %7300 = vrcp.f32 %v4123_v39  ;;  %v6498_v39 = vld [vmem:[%s8478_s7 + $0x1] ss:$0 sm:$0xff]  ;;  %s8499_s7 = sld [smem:[#allocation19_spill]] }
0x15b1   : > { %v4120_v27 = vpop.xlane.xlu0 %4119 }
0x15b2   : > { %7302 = vrcp.f32 %v4120_v27 }
0x15b5   : > { %v4325_v42 = vpop.xlane.xlu0 %4324 }
0x15b6   : > { %7304 = vrcp.f32 %v4325_v42  ;;  %v6499_v42 = vld [vmem:[%s8479_s11 + $0x1] ss:$0 sm:$0xff]  ;;  %v4793_v5 = vld [vmem:[%s8499_s7 + $0x18] sm:$0xff]  ;;  %s8500_s11 = sld [smem:[#allocation35_spill]] }
0x15b7   : > { %7054 = vmatprep.subr.mxu1 %v4793_v5 }
0x15b8   : > { %7055 = vmatpush3.msra.mxu1 %v4793_v5 }
0x15b9   : > { %v4328_v43 = vpop.xlane.xlu0 %4327 }
0x15ba   : > { %7306 = vrcp.f32 %v4328_v43 }
0x15bd   : > { %v7301_v44 = vpop.eup %7300 }
0x15be   : > { %v4215_v51 = vmul.f32 %v7301_v44, %v8135_v49  ;;  %v3793_v49 = vld [vmem:[%s8496_s28 + $0x10] sm:$0xff] }
0x15bf   : > { %v7303_v52 = vpop.eup %7302  ;;  %7045 = vmatprep.subr.mxu0 %v3793_v49 }
0x15c0   : > { %4630 = vrot.lane.b32.xlu0 %v4215_v51, %s8483_s0  ;;  %v4214_v41 = vmul.f32 %v7303_v52, %v8137_v50  ;;  %7046 = vmatpush3.msra.mxu0 %v3793_v49 }
0x15c1   : > { %7047 = vmatprep.subr.mxu0 %v3792_v58 }
0x15c2   : > { %4628 = vrot.lane.b32.xlu1 %v4214_v41, %s8483_s0  ;;  %7048 = vmatpush3.msra.mxu0 %v3792_v58 }
0x15c3   : > { %v7305_v37 = vpop.eup %7304  ;;  %7049 = vmatprep.subr.mxu0 %v3791_v59 }
0x15c4   : > { %v4419_v10 = vmul.f32 %v7305_v37, %v4410_v13  ;;  %7050 = vmatpush3.msra.mxu0 %v3791_v59 }
0x15c5   : > { %7065 = vmatprep.subr.mxu0 %v7450_v0 }
0x15c6   : > { %4636 = vrot.lane.b32.xlu1 %v4419_v10, %s8484_s10 }
0x15c7   : > { %v7307_v53 = vpop.eup %7306 }
0x15c8   : > { %v4420_v54 = vmul.f32 %v7307_v53, %v8159_v12 }
0x15ca   : > { %4638 = vrot.lane.b32.xlu1 %v4420_v54, %s8484_s10 }
0x1617   : > { %v4533_v50 = vpop.xlane.xlu0 %4532 }
0x1618   : > { %7308 = vrcp.f32 %v4533_v50 }
0x1619   : > { %v4530_v56 = vpop.xlane.xlu1 %4529 }
0x161a   : > { %7310 = vrcp.f32 %v4530_v56 }
0x161b   : > { %v3917_v12 = vpop.xlane.xlu0 %3916 }
0x161d   : > { %v3914_v11 = vpop.xlane.xlu1 %3913 }
0x161e   : > { %7312 = vrcp.f32 %v3914_v11  ;;  %v4791_v11 = vld [vmem:[%s8499_s7 + $0x8] sm:$0xff] }
0x161f   : > { %7314 = vrcp.f32 %v3917_v12  ;;  %v4790_v12 = vld [vmem:[%s8499_s7] sm:$0xff] }
0x1625   : > { %v7309_v60 = vpop.eup %7308 }
0x1627   : > { %v7311_v63 = vpop.eup %7310 }
0x162b   : > { %v7313_v14 = vpop.eup %7312 }
0x162c   : > { %v7315_v15 = vpop.eup %7314  ;;  %v4009_v18 = vmul.f32 %v7313_v14, %v8133_v47 }
0x162d   : > { %v4010_v19 = vmul.f32 %v7315_v15, %v8131_v45 }
0x1632   : > { %v4631_v17 = vpop.permute.xlu0 %4630 }
0x1633   : > { %v4651_v20 = vsel %vm1587_vm4, %v4010_v19, %v4631_v17 }
0x1634   : > { %v4629_v13 = vpop.permute.xlu1 %4628 }
0x1635   : > { %v4650_v57 = vsel %vm1587_vm4, %v4009_v18, %v4629_v13 }
0x1638   : > { %v4637_v40 = vpop.permute.xlu1 %4636 }
0x1639   : > { %v4652_v21 = vsel %vm2261_vm5, %v4650_v57, %v4637_v40 }
0x163c   : > { %v4639_v16 = vpop.permute.xlu1 %4638 }
0x163d   : > { %v4653_v22 = vsel %vm2261_vm5, %v4651_v20, %v4639_v16 }
0x1650   : > { %v7042_v61 = vpop.f32.mrf.mxu0 }
0x1651   : > { %v4625_v62 = vmul.f32 %v7309_v60, %v7042_v61 }
0x1652   : > { %v4615_v2 = vpop.f32.mrf.mxu0 }
0x1653   : > { %v4624_v3 = vmul.f32 %v7311_v63, %v4615_v2  ;;  %4646 = vrot.lane.b32.xlu1 %v4625_v62, %s8485_s16  ;;  %v4885_v2 = vld [vmem:[%s8498_s9 + $0x18] sm:$0xff] }
0x1655   : > { %4644 = vrot.lane.b32.xlu0 %v4624_v3, %s8485_s16  ;;  %v4884_v3 = vld [vmem:[%s8498_s9 + $0x10] sm:$0xff] }
0x1674   : > { %3644 = vadd.xlane.f32.xlu0 %v3643_v9  ;;  %v4882_v9 = vld [vmem:[%s8498_s9] sm:$0xff]  ;;  %s8503_s9 = sld [smem:[#allocation26_spill]] }
0x16c5   : > { %v4647_v31 = vpop.permute.xlu1 %4646 }
0x16c6   : > { %v4655_v23 = vsel %vm2263_vm6, %v4653_v22, %v4647_v31  ;;  %v6500_v31 = vld [vmem:[%s8500_s11] ss:$0 sm:$0xff]  ;;  %s8516_s11 = sld [smem:[#allocation37_spill]] }
0x16c7   : > { %v4645_v1 = vpop.permute.xlu0 %4644 }
0x16c8   : > { %v4654_v4 = vsel %vm2263_vm6, %v4652_v21, %v4645_v1  ;;  %v6501_v21 = vld [vmem:[%s8501_s12] ss:$0 sm:$0xff]  ;;  %s8511_s12 = sld [smem:[#allocation28_spill]] }
0x16c9   : > { %7051 = vmatprep.mubr.msk.f32.mxu0 %vm1505_vm3, %v4654_v4  ;;  %v6536_v4 = vld [vmem:[%s8502_s13] ss:$0 sm:$0xff]  ;;  %s8507_s13 = sld [smem:[#allocation24_spill]] }
0x16ca   : > { %7052 = vmatmul.mubr.msk.f32.vlgmr.msra.gmra.mxu0 %vm1505_vm3, %v4655_v23 }
0x16cb   : > { %7073 = vmatprep.mubr.msk.f32.mxu0 %vm7451_vm0, %v7450_v0  ;;  %7066 = vmatpush3.msra.mxu0 %v4885_v2  ;;  %vm6284_vm0 = vcmask 31748  }
0x16cc   : > { %7067 = vmatprep.subr.mxu0 %v7450_v0 }
0x16cd   : > { %7068 = vmatpush3.msra.mxu0 %v4884_v3 }
0x16ce   : > { %7069 = vmatprep.subr.mxu0 %v7450_v0 }
0x16cf   : > { %7070 = vmatpush3.msra.mxu0 %v4883_v6 }
0x16d0   : > { %7071 = vmatprep.subr.mxu0 %v7450_v0 }
0x16d1   : > { %7072 = vmatpush3.msra.mxu0 %v4882_v9 }
0x16fd   : > { %v3645_v45 = vpop.xlane.xlu0 %3644 }
0x16fe   : > { %v3646_v47 = vmul.f32 0.03125, %v3645_v45 }
0x1700   : > { %v3647_v24 = vsub.f32 %v3638_v7, %v3646_v47  ;;  %v4792_v7 = vld [vmem:[%s8499_s7 + $0x10] sm:$0xff]  ;;  %s8504_s7 = sld [smem:[#allocation22_spill]] }
0x1701   : > { %7056 = vmatprep.subr.mxu1 %v4792_v7 }
0x1702   : > { %v3648_v25 = vmul.f32 %v3647_v24, %v3647_v24  ;;  %7057 = vmatpush3.msra.mxu1 %v4792_v7 }
0x1703   : > { %7058 = vmatprep.subr.mxu1 %v4791_v11 }
0x1704   : > { %v3649_v48 = vsel %vm1505_vm3, %v3648_v25, 0.0  ;;  %7059 = vmatpush3.msra.mxu1 %v4791_v11 }
0x1705   : > { %3650 = vadd.xlane.f32.xlu1 %v3649_v48  ;;  %7060 = vmatprep.subr.mxu1 %v4790_v12 }
0x1706   : > { %7061 = vmatpush3.msra.mxu1 %v4790_v12 }
0x178a   : > { %v7053_v46 = vpop.f32.mrf.mxu0 }
0x178b   : > { %v4740_v29 = vadd.f32 %v7053_v46, %v6533_v26 }
0x178c   : > { %v4734_v38 = vpop.f32.mrf.mxu0 }
0x178d   : > { %v4744_v30 = vadd.f32 %v4740_v29, %v8024_v8  ;;  %v4735_v43 = vadd.f32 %v6533_v26, %v4734_v38 }
0x178e   : > { %v3651_v33 = vpop.xlane.xlu1 %3650 }
0x178f   : > { %v3652_v34 = vmul.f32 0.03125, %v3651_v33  ;;  %v4751_v35 = vsel %vm4750_vm13, %v4744_v30, 0.0  ;;  %v4743_v52 = vadd.f32 %v4735_v43, %v8013_v32 }
0x1790   : > { %4752 = vadd.xlane.f32.xlu1 %v4751_v35 }
0x1791   : > { %v3653_v36 = vadd.f32 1e-05, %v3652_v34  ;;  %v4747_v8 = vsel %vm1505_vm3, %v4743_v52, 0.0 }
0x1793   : > { %7316 = vrsqrt.f32 %v3653_v36 }
0x17a0   : > { %v7317_v28 = vpop.eup %7316 }
0x17a1   : > { %v3655_v27 = vmul.f32 %v7317_v28, %v3647_v24  ;;  %v6537_v24 = vld [vmem:[%s8503_s9] ss:$0 sm:$0xff] }
0x17a2   : > { %v6538_v28 = vld [vmem:[%s8505_s14] ss:$0 sm:$0xff]  ;;  %s8510_s14 = sld [smem:[#allocation27_spill]] }
0x17a3   : > { %v3662_v44 = vmul.f32 %v6498_v39, %v3655_v27 }
0x17a5   : > { %v3669_v51 = vadd.f32 %v6499_v42, %v3662_v44 }
0x17a7   : > { %v3672_v41 = vsel %vm1505_vm3, %v3669_v51, 0.0 }
0x17a8   : > { %3673 = vadd.xlane.f32.xlu0 %v3672_v41 }
0x17ac   : > { %4748 = vadd.xlane.f32.xlu0 %v4747_v8 }
0x1819   : > { %v4753_v37 = vpop.xlane.xlu1 %4752 }
0x181a   : > { %v4755_v10 = vmul.f32 0.03125, %v4753_v37 }
0x181c   : > { %v4757_v55 = vsub.f32 %v4744_v30, %v4755_v10  ;;  %v6541_v30 = vld [vmem:[%s8504_s7] ss:$0 sm:$0xff]  ;;  %s8512_s7 = sld [smem:[#allocation30_spill]] }
0x181e   : > { %v4759_v60 = vmul.f32 %v4757_v55, %v4757_v55 }
0x1820   : > { %v4763_v63 = vsel %vm4750_vm13, %v4759_v60, 0.0 }
0x1831   : > { %v3674_v53 = vpop.xlane.xlu0 %3673 }
0x1832   : > { %v3675_v54 = vmul.f32 0.03125, %v3674_v53 }
0x1834   : > { %v3676_v49 = vsub.f32 %v3669_v51, %v3675_v54 }
0x1835   : > { %v4749_v50 = vpop.xlane.xlu0 %4748 }
0x1836   : > { %v4754_v56 = vmul.f32 0.03125, %v4749_v50  ;;  %v3677_v58 = vmul.f32 %v3676_v49, %v3676_v49 }
0x1838   : > { %v4756_v32 = vsub.f32 %v4743_v52, %v4754_v56  ;;  %v3678_v59 = vsel %vm1505_vm3, %v3677_v58, 0.0 }
0x1839   : > { %3679 = vadd.xlane.f32.xlu0 %v3678_v59 }
0x183a   : > { %v4758_v61 = vmul.f32 %v4756_v32, %v4756_v32 }
0x183c   : > { %v4760_v62 = vsel %vm1505_vm3, %v4758_v61, 0.0 }
0x183d   : > { %4761 = vadd.xlane.f32.xlu1 %v4760_v62  ;;  %4764 = vadd.xlane.f32.xlu0 %v4763_v63 }
0x18c2   : > { %v3680_v13 = vpop.xlane.xlu0 %3679 }
0x18c3   : > { %v3681_v40 = vmul.f32 0.03125, %v3680_v13 }
0x18c5   : > { %v3682_v14 = vadd.f32 1e-05, %v3681_v40 }
0x18c6   : > { %v4765_v15 = vpop.xlane.xlu0 %4764  ;;  %v4762_v16 = vpop.xlane.xlu1 %4761 }
0x18c7   : > { %7318 = vrsqrt.f32 %v3682_v14  ;;  %v4767_v17 = vmul.f32 0.03125, %v4765_v15  ;;  %v4766_v18 = vmul.f32 0.03125, %v4762_v16 }
0x18c9   : > { %v4769_v0 = vadd.f32 1e-05, %v4767_v17  ;;  %v4768_v19 = vadd.f32 1e-05, %v4766_v18 }
0x18cb   : > { %7320 = vrsqrt.f32 %v4769_v0 }
0x18cc   : > { %7322 = vrsqrt.f32 %v4768_v19 }
0x18d4   : > { %v7319_v57 = vpop.eup %7318 }
0x18d5   : > { %v3684_v20 = vmul.f32 %v7319_v57, %v3676_v49 }
0x18d7   : > { %v3691_v1 = vmul.f32 %v6500_v31, %v3684_v20 }
0x18d8   : > { %v7321_v22 = vpop.eup %7320 }
0x18d9   : > { %v7323_v23 = vpop.eup %7322  ;;  %v3698_v45 = vadd.f32 %v6501_v21, %v3691_v1  ;;  %v4773_v47 = vmul.f32 %v7321_v22, %v4757_v55 }
0x18da   : > { %v4772_v25 = vmul.f32 %v7323_v23, %v4756_v32 }
0x18db   : > { %7074 = vmatmul.mubr.msk.f32.vlgmr.msra.gmra.mxu0 %vm1505_vm3, %v3698_v45  ;;  %v4781_v48 = vmul.f32 %v6536_v4, %v4773_v47 }
0x18dc   : > { %v4780_v26 = vmul.f32 %v6536_v4, %v4772_v25 }
0x18dd   : > { %v8242_v46 = vadd.f32 %v6537_v24, %v4781_v48 }
0x18de   : > { %v8244_v29 = vadd.f32 %v6537_v24, %v4780_v26 }
0x18e0   : > { %7062 = vmatprep.mubr.msk.f32.mxu1 %vm1505_vm3, %v8244_v29 }
0x18e1   : > { %7063 = vmatmul.mubr.msk.f32.vlgmr.msra.gmra.mxu1 %vm1505_vm3, %v8242_v46 }
0x199b   : > { %v4962_v33 = vpop.f32.mrf.mxu0 }
0x199c   : > { %v8251_v34 = vadd.f32 %v6541_v30, %v4962_v33 }
0x199d   : > { %v7075_v35 = vpop.f32.mrf.mxu0 }
0x199e   : > { %5168 = vrot.lane.b32.xlu1 %v8251_v34, %s8490_s18  ;;  %7076 = vmatprep.subr.msk.mxu1 %vm1587_vm4, %v8251_v34 }
0x199f   : > { %7077 = vmatpush3.xpose.msk.msra.mxu1 %vm1587_vm4, %v8251_v34 }
0x19a1   : > { %v7064_v36 = vpop.f32.mrf.mxu1 }
0x19a2   : > { %5363 = vrot.lane.b32.xlu1 %v8251_v34, %s8493_s8  ;;  %v4879_v27 = vadd.f32 %v7064_v36, %v6538_v28 }
0x19a3   : > { %v4873_v38 = vpop.f32.mrf.mxu1 }
0x19a4   : > { %v4874_v39 = vadd.f32 %v6538_v28, %v4873_v38 }
0x19a6   : > { %5164 = vrot.lane.b32.xlu0 %v4874_v39, %s8490_s18  ;;  %7078 = vmatprep.mubr.msk.f32.mxu1 %vm1587_vm4, %v4874_v39 }
0x19a7   : > { %5166 = vrot.lane.b32.xlu1 %v4879_v27, %s8490_s18  ;;  %7079 = vmatmul.mubr.msk.f32.vlgmr.msra.gmra.mxu1 %vm1587_vm4, %v4879_v27  ;;  %s8517_s18 = sshll.u32 %s8519_s23, 3 }
0x19aa   : > { %5359 = vrot.lane.b32.xlu0 %v4874_v39, %s8493_s8 }
0x19ab   : > { %5361 = vrot.lane.b32.xlu1 %v4879_v27, %s8493_s8  ;;  %s8509_s8 = sld [smem:[#allocation31_spill]] }
0x19ae   : > { %5558 = vrot.lane.b32.xlu0 %v8251_v34, %s8495_s1 }
0x19af   : > { %5554 = vrot.lane.b32.xlu1 %v4874_v39, %s8495_s1 }
0x19b2   : > { %5556 = vrot.lane.b32.xlu0 %v4879_v27, %s8495_s1 }
0x19b3   : > { %5273 = vrot.lane.b32.xlu1 %v8251_v34, %s8489_s5  ;;  %s8506_s5 = sld [smem:[#allocation23_spill]] }
0x19b6   : > { %5078 = vrot.lane.b32.xlu0 %v8251_v34, %s8488_s3  ;;  %s8508_s3 = sld [smem:[#allocation29_spill]] }
0x1a10   : > { %v5169_v42 = vpop.permute.xlu1 %5168 }
0x1a11   : > { %7086 = vmatprep.subr.msk.mxu0 %vm1587_vm4, %v5169_v42 }
0x1a12   : > { %7087 = vmatpush3.xpose.msk.msra.mxu0 %vm1587_vm4, %v5169_v42 }
0x1a14   : > { %v5364_v43 = vpop.permute.xlu1 %5363 }
0x1a15   : > { %7096 = vmatprep.subr.msk.mxu0 %vm1587_vm4, %v5364_v43 }
0x1a18   : > { %v5165_v44 = vpop.permute.xlu0 %5164 }
0x1a19   : > { %7088 = vmatprep.mubr.msk.f32.mxu0 %vm1587_vm4, %v5165_v44  ;;  %v5167_v51 = vpop.permute.xlu1 %5166 }
0x1a1a   : > { %7089 = vmatmul.mubr.msk.f32.vlgmr.msra.gmra.mxu0 %vm1587_vm4, %v5167_v51 }
0x1a1b   : > { %7097 = vmatpush3.xpose.msk.msra.mxu0 %vm1587_vm4, %v5364_v43 }
0x1a1c   : > { %v5360_v52 = vpop.permute.xlu0 %5359 }
0x1a1d   : > { %7098 = vmatprep.mubr.msk.f32.mxu0 %vm1587_vm4, %v5360_v52  ;;  %v5362_v41 = vpop.permute.xlu1 %5361 }
0x1a1e   : > { %7099 = vmatmul.mubr.msk.f32.vlgmr.msra.gmra.mxu0 %vm1587_vm4, %v5362_v41 }
0x1a20   : > { %v5559_v8 = vpop.permute.xlu0 %5558 }
0x1a21   : > { %7106 = vmatprep.subr.msk.mxu0 %vm1587_vm4, %v5559_v8  ;;  %v5555_v37 = vpop.permute.xlu1 %5554 }
0x1a22   : > { %7107 = vmatpush3.xpose.msk.msra.mxu0 %vm1587_vm4, %v5559_v8  ;;  %7108 = vmatprep.mubr.msk.f32.mxu0 %vm1587_vm4, %v5555_v37 }
0x1a24   : > { %v5557_v10 = vpop.permute.xlu0 %5556 }
0x1a25   : > { %7109 = vmatmul.mubr.msk.f32.vlgmr.msra.gmra.mxu0 %vm1587_vm4, %v5557_v10  ;;  %v5274_v54 = vpop.permute.xlu1 %5273 }
0x1a28   : > { %v5079_v53 = vpop.permute.xlu0 %5078 }
0x1a29   : > { %7081 = vmatprep.subr.mxu1 %v5079_v53 }
0x1a2a   : > { %7082 = vmatpush3.msra.mxu1 %v5079_v53 }
0x1a2b   : > { %7091 = vmatprep.subr.mxu1 %v5274_v54 }
0x1a67   : > { %v7080_v55 = vpop.f32.mrf.mxu1 }
0x1a68   : > { %v5056_v49 = vmul.f32 0.35355338, %v7080_v55 }
0x1a69   : > { %v5046_v50 = vpop.f32.mrf.mxu1 }
0x1a6a   : > { %v5055_v56 = vmul.f32 0.35355338, %v5046_v50  ;;  %v5061_v58 = vsel %vm5060_vm14, %v5056_v49, -inf }
0x1a6b   : > { %5062 = vmax.xlane.f32.xlu0 %v5061_v58 }
0x1a6c   : > { %v5057_v32 = vsel %vm1587_vm4, %v5055_v56, -inf }
0x1a6d   : > { %5058 = vmax.xlane.f32.xlu1 %v5057_v32 }
0x1ada   : > { %v7090_v59 = vpop.f32.mrf.mxu0 }
0x1adb   : > { %v5252_v60 = vmul.f32 0.35355338, %v7090_v59 }
0x1adc   : > { %v5242_v61 = vpop.f32.mrf.mxu0 }
0x1add   : > { %v5251_v62 = vmul.f32 0.35355338, %v5242_v61  ;;  %v5256_v63 = vsel %vm5060_vm14, %v5252_v60, -inf }
0x1ade   : > { %5257 = vmax.xlane.f32.xlu1 %v5256_v63  ;;  %v7100_v2 = vpop.f32.mrf.mxu0 }
0x1adf   : > { %v5447_v3 = vmul.f32 0.35355338, %v7100_v2  ;;  %v5253_v5 = vsel %vm1587_vm4, %v5251_v62, -inf  ;;  %v4969_v2 = vld [vmem:[%s8506_s5 + $0x18] sm:$0xff] }
0x1ae0   : > { %5254 = vmax.xlane.f32.xlu0 %v5253_v5  ;;  %v5437_v6 = vpop.f32.mrf.mxu0  ;;  %7116 = vmatprep.subr.mxu0 %v4969_v2 }
0x1ae1   : > { %v5446_v7 = vmul.f32 0.35355338, %v5437_v6  ;;  %v5451_v9 = vsel %vm5060_vm14, %v5447_v3, -inf  ;;  %7117 = vmatpush3.msra.mxu0 %v4969_v2  ;;  %v6013_v2 = vld [vmem:[%s8509_s8 + $0x38] sm:$0xff] }
0x1ae2   : > { %5452 = vmax.xlane.f32.xlu1 %v5451_v9 }
0x1ae3   : > { %v5448_v11 = vsel %vm1587_vm4, %v5446_v7, -inf }
0x1ae4   : > { %5449 = vmax.xlane.f32.xlu0 %v5448_v11  ;;  %v4967_v11 = vld [vmem:[%s8506_s5 + $0x8] sm:$0xff] }
0x1ae5   : > { %v7110_v12 = vpop.f32.mrf.mxu0 }
0x1ae6   : > { %v5642_v13 = vmul.f32 0.35355338, %v7110_v12 }
0x1ae7   : > { %v5632_v40 = vpop.f32.mrf.mxu0 }
0x1ae8   : > { %v5641_v14 = vmul.f32 0.35355338, %v5632_v40  ;;  %v5646_v15 = vsel %vm5060_vm14, %v5642_v13, -inf }
0x1ae9   : > { %5647 = vmax.xlane.f32.xlu1 %v5646_v15 }
0x1aea   : > { %v5643_v16 = vsel %vm1587_vm4, %v5641_v14, -inf }
0x1aeb   : > { %5644 = vmax.xlane.f32.xlu0 %v5643_v16 }
0x1af4   : > { %v5063_v17 = vpop.xlane.xlu0 %5062 }
0x1af5   : > { %v5065_v18 = vsub.f32 %v5056_v49, %v5063_v17 }
0x1af6   : > { %v5059_v0 = vpop.xlane.xlu1 %5058 }
0x1af7   : > { %v5064_v19 = vsub.f32 %v5055_v56, %v5059_v0  ;;  %v5068_v57 = vmul.f32 1.442695, %v5065_v18 }
0x1af9   : > { %v5066_v31 = vmul.f32 1.442695, %v5064_v19 }
0x1afa   : > { %5468 = vrot.lane.b32.xlu1 %v8251_v34, %s8492_s2  ;;  %s1322_s2 = scalar_lea.vmem %s7689_s20, %s8517_s18 }
0x1afb   : > { %7324 = vpow2.f32 %v5066_v31 }
0x1afc   : > { %7326 = vpow2.f32 %v5068_v57 }
0x1b01   : > { %5663 = vrot.lane.b32.xlu0 %v8251_v34, %s8494_s6 }
0x1b08   : > { %v7325_v20 = vpop.eup %7324 }
0x1b09   : > { %v7327_v21 = vpop.eup %7326  ;;  %7083 = vmatprep.mubr.msk.f32.mxu1 %vm1587_vm4, %v7325_v20  ;;  %v5070_v56 = vsel %vm1587_vm4, %v7325_v20, 0.0 }
0x1b0a   : > { %7084 = vmatmul.mubr.msk.f32.vlgmr.msra.gmra.mxu1 %vm1587_vm4, %v7327_v21  ;;  %v5073_v50 = vsel %vm5060_vm14, %v7327_v21, 0.0 }
0x1b0b   : > { %7092 = vmatpush3.msra.mxu1 %v5274_v54 }
0x1b67   : > { %v5258_v1 = vpop.xlane.xlu1 %5257 }
0x1b68   : > { %v5260_v22 = vsub.f32 %v5252_v60, %v5258_v1 }
0x1b69   : > { %v5255_v4 = vpop.xlane.xlu0 %5254 }
0x1b6a   : > { %v5263_v23 = vmul.f32 1.442695, %v5260_v22  ;;  %v5259_v45 = vsub.f32 %v5251_v62, %v5255_v4 }
0x1b6b   : > { %v5453_v47 = vpop.xlane.xlu1 %5452 }
0x1b6c   : > { %7328 = vpow2.f32 %v5263_v23  ;;  %v5261_v24 = vmul.f32 1.442695, %v5259_v45  ;;  %v5455_v25 = vsub.f32 %v5447_v3, %v5453_v47  ;;  %v4968_v3 = vld [vmem:[%s8506_s5 + $0x10] sm:$0xff] }
0x1b6d   : > { %v5450_v48 = vpop.xlane.xlu0 %5449  ;;  %7118 = vmatprep.subr.mxu0 %v4968_v3 }
0x1b6e   : > { %7330 = vpow2.f32 %v5261_v24  ;;  %v5458_v26 = vmul.f32 1.442695, %v5455_v25  ;;  %v5454_v30 = vsub.f32 %v5446_v7, %v5450_v48  ;;  %7119 = vmatpush3.msra.mxu0 %v4968_v3  ;;  %v6012_v3 = vld [vmem:[%s8509_s8 + $0x30] sm:$0xff] }
0x1b6f   : > { %7120 = vmatprep.subr.mxu0 %v4967_v11 }
0x1b70   : > { %7332 = vpow2.f32 %v5458_v26  ;;  %v5456_v33 = vmul.f32 1.442695, %v5454_v30  ;;  %7121 = vmatpush3.msra.mxu0 %v4967_v11 }
0x1b72   : > { %7334 = vpow2.f32 %v5456_v33  ;;  %v5648_v34 = vpop.xlane.xlu1 %5647 }
0x1b73   : > { %v5650_v35 = vsub.f32 %v5642_v13, %v5648_v34 }
0x1b74   : > { %v5645_v36 = vpop.xlane.xlu0 %5644 }
0x1b75   : > { %v5653_v28 = vmul.f32 1.442695, %v5650_v35  ;;  %v5649_v38 = vsub.f32 %v5641_v14, %v5645_v36  ;;  %v4966_v14 = vld [vmem:[%s8506_s5] sm:$0xff] }
0x1b76   : > { %v5469_v39 = vpop.permute.xlu1 %5468  ;;  %7122 = vmatprep.subr.mxu0 %v4966_v14 }
0x1b77   : > { %7336 = vpow2.f32 %v5653_v28  ;;  %v5651_v27 = vmul.f32 1.442695, %v5649_v38  ;;  %7101 = vmatprep.subr.mxu1 %v5469_v39  ;;  %7123 = vmatpush3.msra.mxu0 %v4966_v14 }
0x1b78   : > { %v5664_v41 = vpop.permute.xlu0 %5663  ;;  %7138 = vmatprep.subr.mxu0 %v6013_v2 }
0x1b79   : > { %v7329_v42 = vpop.eup %7328  ;;  %7338 = vpow2.f32 %v5651_v27 }
0x1b7a   : > { %v5268_v43 = vsel %vm5060_vm14, %v7329_v42, 0.0 }
0x1b7b   : > { %v7331_v44 = vpop.eup %7330  ;;  %5269 = vadd.xlane.f32.xlu0 %v5268_v43  ;;  %v6563_v43 = vld [vmem:[%s8507_s13] ss:$0 sm:$0xff] }
0x1b7c   : > { %7093 = vmatprep.mubr.msk.f32.mxu1 %vm1587_vm4, %v7331_v44  ;;  %v5265_v51 = vsel %vm1587_vm4, %v7331_v44, 0.0 }
0x1b7d   : > { %v7333_v52 = vpop.eup %7332  ;;  %5266 = vadd.xlane.f32.xlu1 %v5265_v51  ;;  %7094 = vmatmul.mubr.msk.f32.vlgmr.msra.gmra.mxu1 %vm1587_vm4, %v7329_v42 }
0x1b7e   : > { %7102 = vmatpush3.msra.mxu1 %v5469_v39  ;;  %v5463_v10 = vsel %vm5060_vm14, %v7333_v52, 0.0 }
0x1b7f   : > { %v7335_v8 = vpop.eup %7334  ;;  %7111 = vmatprep.subr.mxu1 %v5664_v41 }
0x1b80   : > { %7103 = vmatprep.mubr.msk.f32.mxu1 %vm1587_vm4, %v7335_v8  ;;  %v5460_v37 = vsel %vm1587_vm4, %v7335_v8, 0.0 }
0x1b81   : > { %5461 = vadd.xlane.f32.xlu0 %v5460_v37  ;;  %5464 = vadd.xlane.f32.xlu1 %v5463_v10 }
0x1b82   : > { %7104 = vmatmul.mubr.msk.f32.vlgmr.msra.gmra.mxu1 %vm1587_vm4, %v7333_v52 }
0x1b83   : > { %7112 = vmatpush3.msra.mxu1 %v5664_v41 }
0x1b84   : > { %v7337_v53 = vpop.eup %7336 }
0x1b85   : > { %v5658_v54 = vsel %vm5060_vm14, %v7337_v53, 0.0 }
0x1b86   : > { %v7339_v55 = vpop.eup %7338  ;;  %5659 = vadd.xlane.f32.xlu1 %v5658_v54 }
0x1b87   : > { %7113 = vmatprep.mubr.msk.f32.mxu1 %vm1587_vm4, %v7339_v55  ;;  %v5655_v49 = vsel %vm1587_vm4, %v7339_v55, 0.0 }
0x1b88   : > { %5656 = vadd.xlane.f32.xlu0 %v5655_v49  ;;  %7114 = vmatmul.mubr.msk.f32.vlgmr.msra.gmra.mxu1 %vm1587_vm4, %v7337_v53 }
0x1b8a   : > { %5074 = vadd.xlane.f32.xlu1 %v5073_v50 }
0x1b8c   : > { %5071 = vadd.xlane.f32.xlu0 %v5070_v56 }
0x1bca   : > { %v7085_v61 = vpop.f32.mrf.mxu1 }
0x1bcc   : > { %v5153_v5 = vpop.f32.mrf.mxu1 }
0x1c04   : > { %v5270_v32 = vpop.xlane.xlu0 %5269 }
0x1c05   : > { %7340 = vrcp.f32 %v5270_v32 }
0x1c06   : > { %v5267_v58 = vpop.xlane.xlu1 %5266 }
0x1c07   : > { %7342 = vrcp.f32 %v5267_v58 }
0x1c0a   : > { %v5465_v59 = vpop.xlane.xlu1 %5464  ;;  %v5462_v60 = vpop.xlane.xlu0 %5461 }
0x1c0b   : > { %7344 = vrcp.f32 %v5465_v59 }
0x1c0c   : > { %7346 = vrcp.f32 %v5462_v60  ;;  %v5915_v60 = vld [vmem:[%s8508_s3 + $0x18] sm:$0xff] }
0x1c0d   : > { %7127 = vmatprep.subr.mxu1 %v5915_v60 }
0x1c0e   : > { %7128 = vmatpush3.msra.mxu1 %v5915_v60 }
0x1c0f   : > { %v5660_v62 = vpop.xlane.xlu1 %5659 }
0x1c10   : > { %7348 = vrcp.f32 %v5660_v62  ;;  %v5913_v62 = vld [vmem:[%s8508_s3 + $0x8] sm:$0xff] }
0x1c11   : > { %v5657_v63 = vpop.xlane.xlu0 %5656 }
0x1c12   : > { %v7341_v6 = vpop.eup %7340  ;;  %7350 = vrcp.f32 %v5657_v63  ;;  %v5912_v63 = vld [vmem:[%s8508_s3] sm:$0xff] }
0x1c13   : > { %v5075_v23 = vpop.xlane.xlu1 %5074 }
0x1c14   : > { %v7343_v12 = vpop.eup %7342 }
0x1c15   : > { %v5072_v4 = vpop.xlane.xlu0 %5071 }
0x1c16   : > { %7352 = vrcp.f32 %v5072_v4  ;;  %v6006_v4 = vld [vmem:[%s8509_s8] sm:$0xff] }
0x1c17   : > { %7354 = vrcp.f32 %v5075_v23  ;;  %v6568_v23 = vld [vmem:[%s8512_s7] ss:$0 sm:$0xff] }
0x1c18   : > { %v7345_v16 = vpop.eup %7344 }
0x1c19   : > { %v7347_v17 = vpop.eup %7346 }
0x1c1d   : > { %v7349_v57 = vpop.eup %7348 }
0x1c1f   : > { %v7351_v21 = vpop.eup %7350 }
0x1c23   : > { %v7353_v25 = vpop.eup %7352 }
0x1c24   : > { %v7355_v48 = vpop.eup %7354  ;;  %v5162_v30 = vmul.f32 %v7353_v25, %v5153_v5  ;;  %v6011_v5 = vld [vmem:[%s8509_s8 + $0x28] sm:$0xff] }
0x1c25   : > { %v5163_v33 = vmul.f32 %v7355_v48, %v7085_v61  ;;  %v5914_v61 = vld [vmem:[%s8508_s3 + $0x10] sm:$0xff] }
0x1c26   : > { %7129 = vmatprep.subr.mxu1 %v5914_v61 }
0x1c27   : > { %7130 = vmatpush3.msra.mxu1 %v5914_v61 }
0x1c28   : > { %7131 = vmatprep.subr.mxu1 %v5913_v62 }
0x1c29   : > { %7132 = vmatpush3.msra.mxu1 %v5913_v62 }
0x1c2a   : > { %7133 = vmatprep.subr.mxu1 %v5912_v63 }
0x1c2b   : > { %7134 = vmatpush3.msra.mxu1 %v5912_v63 }
0x1c3d   : > { %v7095_v7 = vpop.f32.mrf.mxu1 }
0x1c3e   : > { %v5358_v9 = vmul.f32 %v7341_v6, %v7095_v7  ;;  %v6010_v6 = vld [vmem:[%s8509_s8 + $0x20] sm:$0xff] }
0x1c3f   : > { %v5348_v13 = vpop.f32.mrf.mxu1 }
0x1c40   : > { %v5357_v40 = vmul.f32 %v7343_v12, %v5348_v13  ;;  %5753 = vrot.lane.b32.xlu1 %v5358_v9, %s8483_s0 }
0x1c42   : > { %v7105_v15 = vpop.f32.mrf.mxu1  ;;  %5751 = vrot.lane.b32.xlu0 %v5357_v40, %s8483_s0  ;;  %s8514_s0 = sld [smem:[#allocation33_spill]] }
0x1c43   : > { %v5553_v18 = vmul.f32 %v7345_v16, %v7105_v15  ;;  %v6566_v15 = vld [vmem:[%s8510_s14] ss:$0 sm:$0xff] }
0x1c44   : > { %v5543_v0 = vpop.f32.mrf.mxu1 }
0x1c45   : > { %v5552_v19 = vmul.f32 %v7347_v17, %v5543_v0 }
0x1c46   : > { %5761 = vrot.lane.b32.xlu0 %v5553_v18, %s8484_s10 }
0x1c47   : > { %5759 = vrot.lane.b32.xlu1 %v5552_v19, %s8484_s10  ;;  %v6567_v19 = vld [vmem:[%s8511_s12] ss:$0 sm:$0xff]  ;;  %s8515_s10 = sld [smem:[#allocation34_spill]] }
0x1c48   : > { %v7115_v31 = vpop.f32.mrf.mxu1 }
0x1c49   : > { %v5748_v20 = vmul.f32 %v7349_v57, %v7115_v31 }
0x1c4a   : > { %v5738_v1 = vpop.f32.mrf.mxu1 }
0x1c4b   : > { %v5747_v22 = vmul.f32 %v7351_v21, %v5738_v1  ;;  %5769 = vrot.lane.b32.xlu0 %v5748_v20, %s8485_s16  ;;  %v6009_v21 = vld [vmem:[%s8509_s8 + $0x18] sm:$0xff]  ;;  %v6008_v1 = vld [vmem:[%s8509_s8 + $0x10] sm:$0xff] }
0x1c4d   : > { %5767 = vrot.lane.b32.xlu1 %v5747_v22, %s8485_s16  ;;  %s8513_s16 = sld [smem:[#allocation32_spill]]  ;;  %v6007_v22 = vld [vmem:[%s8509_s8 + $0x8] sm:$0xff]  ;;  %v6575_v60 = vld [vmem:[%s8515_s10] ss:$0 sm:$0xff] }
0x1cb2   : > { %v5754_v47 = vpop.permute.xlu1 %5753 }
0x1cb3   : > { %v5774_v36 = vsel %vm1587_vm4, %v5163_v33, %v5754_v47 }
0x1cb4   : > { %v5752_v45 = vpop.permute.xlu0 %5751 }
0x1cb5   : > { %v5773_v34 = vsel %vm1587_vm4, %v5162_v30, %v5752_v45  ;;  %v6571_v30 = vld [vmem:[%s8513_s16] ss:$0 sm:$0xff] }
0x1cb8   : > { %v5762_v24 = vpop.permute.xlu0 %5761 }
0x1cb9   : > { %v5760_v26 = vpop.permute.xlu1 %5759  ;;  %v5776_v39 = vsel %vm2261_vm5, %v5774_v36, %v5762_v24 }
0x1cba   : > { %v5775_v28 = vsel %vm2261_vm5, %v5773_v34, %v5760_v26 }
0x1cbd   : > { %v5770_v35 = vpop.permute.xlu0 %5769 }
0x1cbe   : > { %v5778_v42 = vsel %vm2263_vm6, %v5776_v39, %v5770_v35 }
0x1cbf   : > { %v5768_v38 = vpop.permute.xlu1 %5767 }
0x1cc0   : > { %v5777_v27 = vsel %vm2263_vm6, %v5775_v28, %v5768_v38 }
0x1cc1   : > { %7124 = vmatprep.mubr.msk.f32.mxu0 %vm1505_vm3, %v5777_v27 }
0x1cc2   : > { %7125 = vmatmul.mubr.msk.f32.vlgmr.msra.gmra.mxu0 %vm1505_vm3, %v5778_v42 }
0x1cc3   : > { %7139 = vmatpush3.msra.mxu0 %v6013_v2 }
0x1cc4   : > { %7140 = vmatprep.subr.mxu0 %v6012_v3 }
0x1cc5   : > { %7141 = vmatpush3.msra.mxu0 %v6012_v3 }
0x1cc6   : > { %7142 = vmatprep.subr.mxu0 %v6011_v5 }
0x1cc7   : > { %7143 = vmatpush3.msra.mxu0 %v6011_v5 }
0x1cc8   : > { %7144 = vmatprep.subr.mxu0 %v6010_v6 }
0x1cc9   : > { %7145 = vmatpush3.msra.mxu0 %v6010_v6 }
0x1cca   : > { %7146 = vmatprep.subr.mxu0 %v6009_v21 }
0x1ccb   : > { %7147 = vmatpush3.msra.mxu0 %v6009_v21 }
0x1ccc   : > { %7148 = vmatprep.subr.mxu0 %v6008_v1 }
0x1ccd   : > { %7149 = vmatpush3.msra.mxu0 %v6008_v1 }
0x1cce   : > { %7150 = vmatprep.subr.mxu0 %v6007_v22 }
0x1ccf   : > { %7151 = vmatpush3.msra.mxu0 %v6007_v22 }
0x1cd0   : > { %7152 = vmatprep.subr.mxu0 %v6006_v4 }
0x1cd1   : > { %7153 = vmatpush3.msra.mxu0 %v6006_v4 }
0x1d82   : > { %v7126_v44 = vpop.f32.mrf.mxu0 }
0x1d83   : > { %v5863_v51 = vadd.f32 %v7126_v44, %v6563_v43 }
0x1d84   : > { %v5857_v52 = vpop.f32.mrf.mxu0 }
0x1d85   : > { %v5867_v41 = vadd.f32 %v5863_v51, %v8242_v46  ;;  %v5858_v8 = vadd.f32 %v6563_v43, %v5857_v52 }
0x1d87   : > { %v5866_v37 = vadd.f32 %v5858_v8, %v8244_v29  ;;  %v5873_v10 = vsel %vm4750_vm13, %v5867_v41, 0.0 }
0x1d88   : > { %5874 = vadd.xlane.f32.xlu0 %v5873_v10 }
0x1d89   : > { %v5870_v53 = vsel %vm1505_vm3, %v5866_v37, 0.0 }
0x1d8a   : > { %5871 = vadd.xlane.f32.xlu1 %v5870_v53 }
0x1e11   : > { %v5875_v54 = vpop.xlane.xlu0 %5874 }
0x1e12   : > { %v5877_v55 = vmul.f32 0.03125, %v5875_v54 }
0x1e13   : > { %v5872_v49 = vpop.xlane.xlu1 %5871 }
0x1e14   : > { %v5879_v50 = vsub.f32 %v5867_v41, %v5877_v55  ;;  %v5876_v56 = vmul.f32 0.03125, %v5872_v49 }
0x1e16   : > { %v5878_v58 = vsub.f32 %v5866_v37, %v5876_v56  ;;  %v5881_v46 = vmul.f32 %v5879_v50, %v5879_v50 }
0x1e18   : > { %v5885_v32 = vsel %vm4750_vm13, %v5881_v46, 0.0  ;;  %v5880_v29 = vmul.f32 %v5878_v58, %v5878_v58 }
0x1e19   : > { %5886 = vadd.xlane.f32.xlu1 %v5885_v32  ;;  %v6574_v32 = vld [vmem:[%s8514_s0] ss:$0 sm:$0xff] }
0x1e1a   : > { %v5882_v59 = vsel %vm1505_vm3, %v5880_v29, 0.0 }
0x1e1b   : > { %5883 = vadd.xlane.f32.xlu0 %v5882_v59 }
0x1ea2   : > { %v5887_v7 = vpop.xlane.xlu1 %5886 }
0x1ea3   : > { %v5889_v9 = vmul.f32 0.03125, %v5887_v7 }
0x1ea4   : > { %v5884_v11 = vpop.xlane.xlu0 %5883 }
0x1ea5   : > { %v5891_v12 = vadd.f32 1e-05, %v5889_v9  ;;  %v5888_v13 = vmul.f32 0.03125, %v5884_v11 }
0x1ea7   : > { %7356 = vrsqrt.f32 %v5891_v12  ;;  %v5890_v40 = vadd.f32 1e-05, %v5888_v13 }
0x1ea9   : > { %7358 = vrsqrt.f32 %v5890_v40 }
0x1eb4   : > { %v7357_v14 = vpop.eup %7356 }
0x1eb5   : > { %v5895_v16 = vmul.f32 %v7357_v14, %v5879_v50 }
0x1eb6   : > { %v7359_v17 = vpop.eup %7358 }
0x1eb7   : > { %v5894_v18 = vmul.f32 %v7359_v17, %v5878_v58  ;;  %v5903_v0 = vmul.f32 %v6566_v15, %v5895_v16 }
0x1eb9   : > { %v5902_v57 = vmul.f32 %v6566_v15, %v5894_v18  ;;  %v5911_v20 = vadd.f32 %v6567_v19, %v5903_v0  ;;  %v6195_v18 = vld [vmem:[%s7679_s4 + $0x18] sm:$0xff]  ;;  %v6194_v0 = vld [vmem:[%s7679_s4 + $0x10] sm:$0xff] }
0x1eba   : > { %7157 = vmatprep.subr.mxu1 %v6195_v18 }
0x1ebb   : > { %v5910_v31 = vadd.f32 %v6567_v19, %v5902_v57  ;;  %v6193_v19 = vld [vmem:[%s7679_s4 + $0x8] sm:$0xff]  ;;  %v6192_v57 = vld [vmem:[%s7679_s4] sm:$0xff] }
0x1ebd   : > { %7135 = vmatprep.mubr.msk.f32.mxu1 %vm1505_vm3, %v5910_v31 }
0x1ebe   : > { %7136 = vmatmul.mubr.msk.f32.vlgmr.msra.gmra.mxu1 %vm1505_vm3, %v5911_v20 }
0x1ebf   : > { %7158 = vmatpush3.msra.mxu1 %v6195_v18 }
0x1ec0   : > { %7159 = vmatprep.subr.mxu1 %v6194_v0 }
0x1ec1   : > { %7160 = vmatpush3.msra.mxu1 %v6194_v0 }
0x1ec2   : > { %7161 = vmatprep.subr.mxu1 %v6193_v19 }
0x1ec3   : > { %7162 = vmatpush3.msra.mxu1 %v6193_v19 }
0x1ec4   : > { %7163 = vmatprep.subr.mxu1 %v6192_v57 }
0x1ec5   : > { %7164 = vmatpush3.msra.mxu1 %v6192_v57 }
0x1f7e   : > { %v7137_v45 = vpop.f32.mrf.mxu1 }
0x1f7f   : > { %v6001_v47 = vadd.f32 %v7137_v45, %v6568_v23  ;;  %v6576_v45 = vld [vmem:[%s8516_s11] ss:$0 sm:$0xff] }
0x1f80   : > { %v5995_v24 = vpop.f32.mrf.mxu1 }
0x1f81   : > { %v5996_v25 = vadd.f32 %v6568_v23, %v5995_v24  ;;  %v6005_v26 = vmax.f32 %v6001_v47, 0.0 }
0x1f83   : > { %v6004_v48 = vmax.f32 %v5996_v25, 0.0 }
0x1f85   : > { %7154 = vmatprep.mubr.msk.f32.mxu0 %vm2475_vm7, %v6004_v48 }
0x1f86   : > { %7155 = vmatmul.mubr.msk.f32.vlgmr.msra.gmra.mxu0 %vm2475_vm7, %v6005_v26  ;;  %v6577_v26 = vld [vmem:[%s7674_s27] ss:$0 sm:$0xff] }
0x2046   : > { %v7156_v33 = vpop.f32.mrf.mxu0 }
0x2047   : > { %v6099_v34 = vadd.f32 %v7156_v33, %v6571_v30 }
0x2048   : > { %v6093_v35 = vpop.f32.mrf.mxu0 }
0x2049   : > { %v6103_v36 = vadd.f32 %v6099_v34, %v5911_v20  ;;  %v6094_v28 = vadd.f32 %v6571_v30, %v6093_v35  ;;  %v6578_v35 = vld [vmem:[#allocation2] ss:$0 sm:$0xff] }
0x204b   : > { %v6102_v38 = vadd.f32 %v6094_v28, %v5910_v31  ;;  %v6109_v39 = vsel %vm4750_vm13, %v6103_v36, 0.0 }
0x204c   : > { %6110 = vadd.xlane.f32.xlu1 %v6109_v39 }
0x204d   : > { %v6106_v27 = vsel %vm1505_vm3, %v6102_v38, 0.0 }
0x204e   : > { %6107 = vadd.xlane.f32.xlu0 %v6106_v27 }
0x20d5   : > { %v6111_v42 = vpop.xlane.xlu1 %6110 }
0x20d6   : > { %v6113_v43 = vmul.f32 0.03125, %v6111_v42 }
0x20d7   : > { %v6108_v44 = vpop.xlane.xlu0 %6107 }
0x20d8   : > { %v6115_v51 = vsub.f32 %v6103_v36, %v6113_v43  ;;  %v6112_v52 = vmul.f32 0.03125, %v6108_v44 }
0x20da   : > { %v6114_v41 = vsub.f32 %v6102_v38, %v6112_v52  ;;  %v6117_v8 = vmul.f32 %v6115_v51, %v6115_v51 }
0x20dc   : > { %v6121_v37 = vsel %vm4750_vm13, %v6117_v8, 0.0  ;;  %v6116_v10 = vmul.f32 %v6114_v41, %v6114_v41 }
0x20dd   : > { %6122 = vadd.xlane.f32.xlu1 %v6121_v37 }
0x20de   : > { %v6118_v53 = vsel %vm1505_vm3, %v6116_v10, 0.0 }
0x20df   : > { %6119 = vadd.xlane.f32.xlu0 %v6118_v53 }
0x2166   : > { %v6123_v54 = vpop.xlane.xlu1 %6122 }
0x2167   : > { %v6125_v55 = vmul.f32 0.03125, %v6123_v54 }
0x2168   : > { %v6120_v49 = vpop.xlane.xlu0 %6119 }
0x2169   : > { %v6127_v50 = vadd.f32 1e-05, %v6125_v55  ;;  %v6124_v56 = vmul.f32 0.03125, %v6120_v49 }
0x216b   : > { %7360 = vrsqrt.f32 %v6127_v50  ;;  %v6126_v58 = vadd.f32 1e-05, %v6124_v56 }
0x216d   : > { %7362 = vrsqrt.f32 %v6126_v58 }
0x2178   : > { %v7361_v46 = vpop.eup %7360 }
0x2179   : > { %v6131_v29 = vmul.f32 %v7361_v46, %v6115_v51 }
0x217a   : > { %v7363_v59 = vpop.eup %7362 }
0x217b   : > { %v6139_v61 = vmul.f32 %v6574_v32, %v6131_v29  ;;  %v6130_v62 = vmul.f32 %v7363_v59, %v6114_v41 }
0x217d   : > { %v6147_v63 = vadd.f32 %v6575_v60, %v6139_v61  ;;  %v6138_v2 = vmul.f32 %v6574_v32, %v6130_v62 }
0x217f   : > { %v6153_v3 = vsel %vm4750_vm13, %v6147_v63, 0.0  ;;  %v6146_v5 = vadd.f32 %v6575_v60, %v6138_v2 }
0x2180   : > { %6154 = vadd.xlane.f32.xlu1 %v6153_v3 }
0x2181   : > { %v6150_v6 = vsel %vm1505_vm3, %v6146_v5, 0.0 }
0x2182   : > { %6151 = vadd.xlane.f32.xlu0 %v6150_v6 }
0x2209   : > { %v6155_v7 = vpop.xlane.xlu1 %6154 }
0x220a   : > { %v6157_v9 = vmul.f32 0.03125, %v6155_v7 }
0x220b   : > { %v6152_v11 = vpop.xlane.xlu0 %6151 }
0x220c   : > { %v6159_v12 = vsub.f32 %v6147_v63, %v6157_v9  ;;  %v6156_v13 = vmul.f32 0.03125, %v6152_v11 }
0x220e   : > { %v6158_v40 = vsub.f32 %v6146_v5, %v6156_v13  ;;  %v6161_v14 = vmul.f32 %v6159_v12, %v6159_v12 }
0x2210   : > { %v6165_v15 = vsel %vm4750_vm13, %v6161_v14, 0.0  ;;  %v6160_v16 = vmul.f32 %v6158_v40, %v6158_v40 }
0x2211   : > { %6166 = vadd.xlane.f32.xlu1 %v6165_v15 }
0x2212   : > { %v6162_v17 = vsel %vm1505_vm3, %v6160_v16, 0.0 }
0x2213   : > { %6163 = vadd.xlane.f32.xlu0 %v6162_v17 }
0x229a   : > { %v6167_v31 = vpop.xlane.xlu1 %6166 }
0x229b   : > { %v6169_v20 = vmul.f32 0.03125, %v6167_v31 }
0x229c   : > { %v6164_v21 = vpop.xlane.xlu0 %6163 }
0x229d   : > { %v6171_v1 = vadd.f32 1e-05, %v6169_v20  ;;  %v6168_v22 = vmul.f32 0.03125, %v6164_v21 }
0x229f   : > { %7364 = vrsqrt.f32 %v6171_v1  ;;  %v6170_v4 = vadd.f32 1e-05, %v6168_v22 }
0x22a1   : > { %7366 = vrsqrt.f32 %v6170_v4 }
0x22ac   : > { %v7365_v23 = vpop.eup %7364 }
0x22ad   : > { %v6175_v47 = vmul.f32 %v7365_v23, %v6159_v12 }
0x22ae   : > { %v7367_v24 = vpop.eup %7366 }
0x22af   : > { %v6174_v25 = vmul.f32 %v7367_v24, %v6158_v40  ;;  %v6183_v48 = vmul.f32 %v6576_v45, %v6175_v47 }
0x22b1   : > { %v6182_v30 = vmul.f32 %v6576_v45, %v6174_v25  ;;  %v6191_v34 = vadd.f32 %v6577_v26, %v6183_v48 }
0x22b3   : > { %v6190_v33 = vadd.f32 %v6577_v26, %v6182_v30 }
0x22b5   : > { %7165 = vmatprep.mubr.msk.f32.mxu1 %vm1505_vm3, %v6190_v33 }
0x22b6   : > { %7166 = vmatmul.mubr.msk.f32.vlgmr.msra.gmra.mxu1 %vm1505_vm3, %v6191_v34 }
0x2376   : > { %v7167_v36 = vpop.f32.mrf.mxu1 }
0x2377   : > { %v6281_v28 = vadd.f32 %v7167_v36, %v6578_v35 }
0x2378   : > { %v6275_v38 = vpop.f32.mrf.mxu1 }
0x2379   : > { %6287 = vst.msk [vmem:[%s1322_s2 + $0x4] sm:$0xf] %vm6286_vm15, %v6281_v28  ;;  %v6276_v39 = vadd.f32 %v6578_v35, %v6275_v38 }
0x237b   : > { %6285 = vst.msk [vmem:[%s1322_s2 - $0x4] sm:$0xf0] %vm6284_vm0, %v6276_v39 }
0x237c PF: > { %s98_s22 = sadd.s32 1, %s7404_s22  }
0x237d   : > { %p95_p1 = scmp.ge.s32.totalorder %s98_s22, 4  }
0x237f   :  { %97 = sbr.rel (!%p95_p1) target bundleno = 97 (0x61), region = 285 }
0x2384   :  { %6307 = vsyncpa [#allocation3], 1 }
0x2385   :  { %6309 = vsyncpa [#allocation3 + $0x1], 1 }

</bundles_post_ra>
